<compile_context>
chip_gen: v7x
topology: tpu7x:2x2x1
jax: 0.10.0
libtpu: 0.0.40
codegen_flags: <defaults>
</compile_context>

<pallas_src>
import math
from functools import partial

import jax
import jax.numpy as jnp
from jax import lax
from jax.experimental import pallas as pl
from jax.experimental.pallas import tpu as pltpu


# ----------------------------------------------------------------------------
# helpers
# ----------------------------------------------------------------------------
def _pad_to(x, m):
    return (x + m - 1) // m * m


# ----------------------------------------------------------------------------
# Pallas kernel 1: tiled MXU matmul with fused bias (+ optional activation)
#   bf16 operands, f32 accumulator kept resident across the K grid axis.
# ----------------------------------------------------------------------------
def _mm_kernel(a_ref, b_ref, bias_ref, o_ref, acc_ref, *, act):
    @pl.when(pl.program_id(2) == 0)
    def _():
        acc_ref[...] = jnp.zeros_like(acc_ref)

    acc_ref[...] += jnp.dot(a_ref[...], b_ref[...],
                            preferred_element_type=jnp.float32)

    @pl.when(pl.program_id(2) == pl.num_programs(2) - 1)
    def _():
        r = acc_ref[...] + bias_ref[...]
        if act == "relu":
            r = jnp.maximum(r, 0.0)
        o_ref[...] = r.astype(o_ref.dtype)


def mm(a, b, bias=None, act=None):
    """a:(M,K) @ b:(K,N) + bias. bf16 MXU operands, f32 accumulation/output."""
    M, K = a.shape
    K2, N = b.shape
    assert K == K2

    # K: single full-extent block when small (legal even if not a 128 multiple),
    #    else 512-wide chunks. No blanket padding to 256.
    if K <= 2048:
        Kp = _pad_to(K, 16)
        tk = Kp
    else:
        tk = 512
        Kp = _pad_to(K, tk)
    # M: 256-wide tiles so larger convs expose >=2 parallel (i,j) blocks.
    if M > 256:
        tm = 256
        Mp = _pad_to(M, tm)
    else:
        Mp = _pad_to(M, 16)
        tm = Mp
    # N: lane-dense (multiple of 128); 256-wide tiles when they divide evenly.
    Np = _pad_to(N, 128)
    tn = 256 if Np % 256 == 0 else 128

    a_bf = a.astype(jnp.bfloat16)
    b_bf = b.astype(jnp.bfloat16)
    if (Mp, Kp) != (M, K):
        a_bf = jnp.pad(a_bf, ((0, Mp - M), (0, Kp - K)))
    if (Kp, Np) != (K, N):
        b_bf = jnp.pad(b_bf, ((0, Kp - K), (0, Np - N)))
    if bias is None:
        bias_p = jnp.zeros((1, Np), jnp.float32)
    else:
        bias_p = bias.astype(jnp.float32).reshape(1, N)
        if Np != N:
            bias_p = jnp.pad(bias_p, ((0, 0), (0, Np - N)))

    out = pl.pallas_call(
        partial(_mm_kernel, act=act),
        out_shape=jax.ShapeDtypeStruct((Mp, Np), jnp.float32),
        grid_spec=pltpu.PrefetchScalarGridSpec(
            num_scalar_prefetch=0,
            grid=(Mp // tm, Np // tn, Kp // tk),
            in_specs=[pl.BlockSpec((tm, tk), lambda i, j, k: (i, k)),
                      pl.BlockSpec((tk, tn), lambda i, j, k: (k, j)),
                      pl.BlockSpec((1, tn), lambda i, j, k: (0, j))],
            out_specs=pl.BlockSpec((tm, tn), lambda i, j, k: (i, j)),
            scratch_shapes=[pltpu.VMEM((tm, tn), jnp.float32)]),
        compiler_params=pltpu.CompilerParams(
            dimension_semantics=("parallel", "parallel", "arbitrary")),
    )(a_bf, b_bf, bias_p)
    if (Mp, Np) != (M, N):
        out = out[:M, :N]
    return out


# ----------------------------------------------------------------------------
# Pallas kernel 2: fused InstanceNorm(eps) + AdaIN (x*gamma + beta)
#                  + optional ReLU + optional residual add.
#   Layout: (B, H*W, C); one grid step per batch element, spatial reduction
#   along the sublane axis inside the block.
# ----------------------------------------------------------------------------
def _in_adain_kernel(*refs, eps, relu, has_res):
    if has_res:
        y_ref, g_ref, b_ref, x_ref, o_ref = refs
    else:
        y_ref, g_ref, b_ref, o_ref = refs
    y = y_ref[...]                                   # (1, L, C) f32
    m = jnp.mean(y, axis=1, keepdims=True)           # (1, 1, C)
    yc = y - m
    v = jnp.mean(yc * yc, axis=1, keepdims=True)     # biased variance (PyTorch ref)
    r = yc * lax.rsqrt(v + eps)
    r = r * g_ref[...] + b_ref[...]                  # AdaIN scale/shift
    if relu:
        r = jnp.maximum(r, 0.0)
    if has_res:
        r = r + x_ref[...]
    o_ref[...] = r.astype(o_ref.dtype)


def in_adain(y, gamma, beta, *, eps, relu, residual=None):
    """y:(B,L,C), gamma/beta:(B,1,C), residual:(B,L,C) or None -> (B,L,C)."""
    B, L, C = y.shape
    has_res = residual is not None
    inputs = [y, gamma, beta]
    in_specs = [pl.BlockSpec((1, L, C), lambda b: (b, 0, 0)),
                pl.BlockSpec((1, 1, C), lambda b: (b, 0, 0)),
                pl.BlockSpec((1, 1, C), lambda b: (b, 0, 0))]
    if has_res:
        inputs.append(residual)
        in_specs.append(pl.BlockSpec((1, L, C), lambda b: (b, 0, 0)))
    return pl.pallas_call(
        partial(_in_adain_kernel, eps=eps, relu=relu, has_res=has_res),
        out_shape=jax.ShapeDtypeStruct((B, L, C), jnp.float32),
        grid_spec=pltpu.PrefetchScalarGridSpec(
            num_scalar_prefetch=0, grid=(B,),
            in_specs=in_specs,
            out_specs=pl.BlockSpec((1, L, C), lambda b: (b, 0, 0))),
        compiler_params=pltpu.CompilerParams(dimension_semantics=("parallel",)),
    )(*inputs)


# ----------------------------------------------------------------------------
# 3x3 reflect-padded conv as im2col + Pallas matmul (NHWC)
# ----------------------------------------------------------------------------
def _im2col_3x3_reflect(xn):
    """xn: (B,H,W,C) -> patches (B*H*W, 9*C), ReflectionPad2d(1) semantics."""
    B, H, W, C = xn.shape
    xp = jnp.pad(xn, ((0, 0), (1, 1), (1, 1), (0, 0)), mode="reflect")
    cols = []
    for i in range(3):
        for j in range(3):
            cols.append(xp[:, i:i + H, j:j + W, :])
    return jnp.concatenate(cols, axis=-1).reshape(B * H * W, 9 * C)


def conv3x3_reflect(xn, w_mat, bias):
    """xn: (B,H,W,C); w_mat pre-packed (9*Cin, Cout). Returns (B, H*W, Cout), f32."""
    B, H, W, C = xn.shape
    patches = _im2col_3x3_reflect(xn)
    y = mm(patches, w_mat, bias=bias)
    return y.reshape(B, H * W, w_mat.shape[1])


# ----------------------------------------------------------------------------
# ResnetBlock_Adain forward
# ----------------------------------------------------------------------------
def resnet_block_adain(params, x, dlatents):
    """x: (B, C, H, W) NCHW, dlatents: (B, latent_size). Returns NCHW."""
    B, C, H, W = x.shape
    xn = jnp.transpose(x, (0, 2, 3, 1))                       # NHWC

    # ApplyStyle_id linears: style = Linear(latent -> 2C); [:, :C]=gamma, [:, C:]=beta
    style1 = mm(dlatents, params["style1"]["w_t"], bias=params["style1"]["b"])
    style2 = mm(dlatents, params["style2"]["w_t"], bias=params["style2"]["b"])
    g1 = style1[:, :C].reshape(B, 1, C)
    b1 = style1[:, C:].reshape(B, 1, C)
    g2 = style2[:, :C].reshape(B, 1, C)
    b2 = style2[:, C:].reshape(B, 1, C)

    # conv1 -> InstanceNorm -> AdaIN -> ReLU   (norm/AdaIN/ReLU fused in one kernel)
    y1 = conv3x3_reflect(xn, params["conv1"]["w_mat"], params["conv1"]["b"])
    z = in_adain(y1, g1, b1, eps=1e-8, relu=True)

    # conv2 -> InstanceNorm -> AdaIN -> residual add (fused)
    y2 = conv3x3_reflect(z.reshape(B, H, W, C),
                         params["conv2"]["w_mat"], params["conv2"]["b"])
    out = in_adain(y2, g2, b2, eps=1e-8, relu=False,
                   residual=xn.reshape(B, H * W, C))

    return out.reshape(B, H, W, C).transpose(0, 3, 1, 2)


# ----------------------------------------------------------------------------
# Deterministic synthetic parameters (PyTorch shapes, pre-packed for matmul)
# ----------------------------------------------------------------------------
def init_params(key, dim, latent_size):
    ks = jax.random.split(key, 8)
    s = 0.05

    def conv(k1, k2, cout, cin):
        w = jax.random.normal(k1, (cout, cin, 3, 3), jnp.float32) * s
        # pre-pack once to (ki, kj, cin, cout) -> (9*cin, cout), matching im2col order
        w_mat = jnp.transpose(w, (2, 3, 1, 0)).reshape(9 * cin, cout)
        b = jax.random.normal(k2, (cout,), jnp.float32) * s
        return {"w_mat": w_mat, "b": b}

    def lin(k1, k2, dout, din):
        w = jax.random.normal(k1, (dout, din), jnp.float32) * s
        b = jax.random.normal(k2, (dout,), jnp.float32) * s
        return {"w_t": w.T, "b": b}           # pre-transposed for x @ w_t

    return {
        "conv1": conv(ks[0], ks[1], dim, dim),
        "conv2": conv(ks[2], ks[3], dim, dim),
        "style1": lin(ks[4], ks[5], 2 * dim, latent_size),
        "style2": lin(ks[6], ks[7], 2 * dim, latent_size),
    }


# ----------------------------------------------------------------------------
if __name__ == "__main__":
    key = jax.random.PRNGKey(0)
    k = jax.random.split(key, 4)

    B, C, H, W, latent = 2, 128, 16, 16, 64

    params = init_params(k[0], C, latent)
    x = jax.random.normal(k[1], (B, C, H, W), jnp.float32)
    dlatents = jax.random.normal(k[2], (B, latent), jnp.float32)

    fwd = jax.jit(resnet_block_adain)
    out = fwd(params, x, dlatents)
    jax.block_until_ready(out)

    assert out.shape == (B, C, H, W), out.shape
    assert bool(jnp.all(jnp.isfinite(out)))
    print("KERNEL_OK")
</pallas_src>

<mosaic_0001>
module attributes {stable_mosaic.version = 11 : i64} {
  func.func @_mm_kernel(%arg0: i32, %arg1: i32, %arg2: i32, %arg3: memref<256x1152xbf16, #tpu.memory_space<vmem>>, %arg4: memref<1152x128xbf16, #tpu.memory_space<vmem>>, %arg5: memref<1x128xf32, #tpu.memory_space<vmem>>, %arg6: memref<256x128xf32, #tpu.memory_space<vmem>>, %arg7: memref<256x128xf32, #tpu.memory_space<vmem>>) attributes {dimension_semantics = [#tpu.dimension_semantics<parallel>, #tpu.dimension_semantics<parallel>, #tpu.dimension_semantics<arbitrary>], iteration_bounds = array<i64: 2, 1, 1>, scalar_prefetch = 0 : i64, scratch_operands = 1 : i64, tpu.core_type = #tpu.core_type<tc>, window_params = [{transform_indices = @transform_0, window_bounds = array<i64: 256, 1152>}, {transform_indices = @transform_1, window_bounds = array<i64: 1152, 128>}, {transform_indices = @transform_2, window_bounds = array<i64: 1, 128>}, {transform_indices = @transform_3, window_bounds = array<i64: 256, 128>}]} {
    %c0_i32 = arith.constant 0 : i32
    %0 = arith.cmpi eq, %arg2, %c0_i32 : i32
    %1 = arith.extui %0 : i1 to i32
    %c0_i32_0 = arith.constant 0 : i32
    %2 = arith.cmpi ne, %1, %c0_i32_0 : i32
    scf.if %2 {
      %cst_10 = arith.constant 0.000000e+00 : f32
      %12 = vector.broadcast %cst_10 : f32 to vector<256x128xf32>
      %c0_11 = arith.constant 0 : index
      %c0_12 = arith.constant 0 : index
      %13 = vector.load %arg7[%c0_11, %c0_12] : memref<256x128xf32, #tpu.memory_space<vmem>>, vector<256x128xf32>
      tpu.vector_store %arg7[%c0_11, %c0_12], %12 {strides = array<i32>} : memref<256x128xf32, #tpu.memory_space<vmem>>, vector<256x128xf32>,
    } else {
    }
    %c0 = arith.constant 0 : index
    %c0_1 = arith.constant 0 : index
    %3 = vector.load %arg7[%c0, %c0_1] : memref<256x128xf32, #tpu.memory_space<vmem>>, vector<256x128xf32>
    %c0_2 = arith.constant 0 : index
    %c0_3 = arith.constant 0 : index
    %4 = vector.load %arg3[%c0_2, %c0_3] : memref<256x1152xbf16, #tpu.memory_space<vmem>>, vector<256x1152xbf16>
    %c0_4 = arith.constant 0 : index
    %c0_5 = arith.constant 0 : index
    %5 = vector.load %arg4[%c0_4, %c0_5] : memref<1152x128xbf16, #tpu.memory_space<vmem>>, vector<1152x128xbf16>
    %cst = arith.constant dense<0.000000e+00> : vector<256x128xf32>
    %6 = tpu.matmul %4, %5, %cst {dimension_numbers = #tpu.dot_dimension_numbers<[1], [0], [0], [1], [0, 0, 1, 1], [], []>} : vector<256x1152xbf16>, vector<1152x128xbf16>, vector<256x128xf32> -> vector<256x128xf32>
    %7 = arith.addf %3, %6 : vector<256x128xf32>
    %c0_6 = arith.constant 0 : index
    %c0_7 = arith.constant 0 : index
    %8 = vector.load %arg7[%c0_6, %c0_7] : memref<256x128xf32, #tpu.memory_space<vmem>>, vector<256x128xf32>
    tpu.vector_store %arg7[%c0_6, %c0_7], %7 {strides = array<i32>} : memref<256x128xf32, #tpu.memory_space<vmem>>, vector<256x128xf32>,
    %c0_i32_8 = arith.constant 0 : i32
    %9 = arith.cmpi eq, %arg2, %c0_i32_8 : i32
    %10 = arith.extui %9 : i1 to i32
    %c0_i32_9 = arith.constant 0 : i32
    %11 = arith.cmpi ne, %10, %c0_i32_9 : i32
    scf.if %11 {
      %c0_10 = arith.constant 0 : index
      %c0_11 = arith.constant 0 : index
      %12 = vector.load %arg7[%c0_10, %c0_11] : memref<256x128xf32, #tpu.memory_space<vmem>>, vector<256x128xf32>
      %c0_12 = arith.constant 0 : index
      %c0_13 = arith.constant 0 : index
      %13 = vector.load %arg5[%c0_12, %c0_13] : memref<1x128xf32, #tpu.memory_space<vmem>>, vector<1x128xf32>
      %14 = vector.broadcast %13 : vector<1x128xf32> to vector<256x128xf32>
      %15 = arith.addf %12, %14 : vector<256x128xf32>
      %c0_14 = arith.constant 0 : index
      %c0_15 = arith.constant 0 : index
      %16 = vector.load %arg6[%c0_14, %c0_15] : memref<256x128xf32, #tpu.memory_space<vmem>>, vector<256x128xf32>
      tpu.vector_store %arg6[%c0_14, %c0_15], %15 {strides = array<i32>} : memref<256x128xf32, #tpu.memory_space<vmem>>, vector<256x128xf32>,
    } else {
    }
    return
  }
  func.func @transform_0(%arg0: i32, %arg1: i32, %arg2: i32) -> (i32, i32) {
    %c0_i32 = arith.constant 0 : i32
    return %arg0, %arg2 : i32, i32
  }
  func.func @transform_1(%arg0: i32, %arg1: i32, %arg2: i32) -> (i32, i32) {
    %c0_i32 = arith.constant 0 : i32
    return %arg2, %arg1 : i32, i32
  }
  func.func @transform_2(%arg0: i32, %arg1: i32, %arg2: i32) -> (i32, i32) {
    %c0_i32 = arith.constant 0 : i32
    %c0_i32_0 = arith.constant 0 : i32
    return %c0_i32, %arg1 : i32, i32
  }
  func.func @transform_3(%arg0: i32, %arg1: i32, %arg2: i32) -> (i32, i32) {
    %c0_i32 = arith.constant 0 : i32
    return %arg0, %arg1 : i32, i32
  }
}

module attributes {stable_mosaic.version = 11 : i64} {
  func.func @_mm_kernel(%arg0: i32, %arg1: i32, %arg2: i32, %arg3: memref<16x64xbf16, #tpu.memory_space<vmem>>, %arg4: memref<64x256xbf16, #tpu.memory_space<vmem>>, %arg5: memref<1x256xf32, #tpu.memory_space<vmem>>, %arg6: memref<16x256xf32, #tpu.memory_space<vmem>>, %arg7: memref<16x256xf32, #tpu.memory_space<vmem>>) attributes {dimension_semantics = [#tpu.dimension_semantics<parallel>, #tpu.dimension_semantics<parallel>, #tpu.dimension_semantics<arbitrary>], iteration_bounds = array<i64: 1, 1, 1>, scalar_prefetch = 0 : i64, scratch_operands = 1 : i64, tpu.core_type = #tpu.core_type<tc>, window_params = [{transform_indices = @transform_0, window_bounds = array<i64: 16, 64>}, {transform_indices = @transform_1, window_bounds = array<i64: 64, 256>}, {transform_indices = @transform_2, window_bounds = array<i64: 1, 256>}, {transform_indices = @transform_3, window_bounds = array<i64: 16, 256>}]} {
    %c0_i32 = arith.constant 0 : i32
    %0 = arith.cmpi eq, %arg2, %c0_i32 : i32
    %1 = arith.extui %0 : i1 to i32
    %c0_i32_0 = arith.constant 0 : i32
    %2 = arith.cmpi ne, %1, %c0_i32_0 : i32
    scf.if %2 {
      %cst_10 = arith.constant 0.000000e+00 : f32
      %12 = vector.broadcast %cst_10 : f32 to vector<16x256xf32>
      %c0_11 = arith.constant 0 : index
      %c0_12 = arith.constant 0 : index
      %13 = vector.load %arg7[%c0_11, %c0_12] : memref<16x256xf32, #tpu.memory_space<vmem>>, vector<16x256xf32>
      tpu.vector_store %arg7[%c0_11, %c0_12], %12 {strides = array<i32>} : memref<16x256xf32, #tpu.memory_space<vmem>>, vector<16x256xf32>,
    } else {
    }
    %c0 = arith.constant 0 : index
    %c0_1 = arith.constant 0 : index
    %3 = vector.load %arg7[%c0, %c0_1] : memref<16x256xf32, #tpu.memory_space<vmem>>, vector<16x256xf32>
    %c0_2 = arith.constant 0 : index
    %c0_3 = arith.constant 0 : index
    %4 = vector.load %arg3[%c0_2, %c0_3] : memref<16x64xbf16, #tpu.memory_space<vmem>>, vector<16x64xbf16>
    %c0_4 = arith.constant 0 : index
    %c0_5 = arith.constant 0 : index
    %5 = vector.load %arg4[%c0_4, %c0_5] : memref<64x256xbf16, #tpu.memory_space<vmem>>, vector<64x256xbf16>
    %cst = arith.constant dense<0.000000e+00> : vector<16x256xf32>
    %6 = tpu.matmul %4, %5, %cst {dimension_numbers = #tpu.dot_dimension_numbers<[1], [0], [0], [1], [0, 0, 1, 1], [], []>} : vector<16x64xbf16>, vector<64x256xbf16>, vector<16x256xf32> -> vector<16x256xf32>
    %7 = arith.addf %3, %6 : vector<16x256xf32>
    %c0_6 = arith.constant 0 : index
    %c0_7 = arith.constant 0 : index
    %8 = vector.load %arg7[%c0_6, %c0_7] : memref<16x256xf32, #tpu.memory_space<vmem>>, vector<16x256xf32>
    tpu.vector_store %arg7[%c0_6, %c0_7], %7 {strides = array<i32>} : memref<16x256xf32, #tpu.memory_space<vmem>>, vector<16x256xf32>,
    %c0_i32_8 = arith.constant 0 : i32
    %9 = arith.cmpi eq, %arg2, %c0_i32_8 : i32
    %10 = arith.extui %9 : i1 to i32
    %c0_i32_9 = arith.constant 0 : i32
    %11 = arith.cmpi ne, %10, %c0_i32_9 : i32
    scf.if %11 {
      %c0_10 = arith.constant 0 : index
      %c0_11 = arith.constant 0 : index
      %12 = vector.load %arg7[%c0_10, %c0_11] : memref<16x256xf32, #tpu.memory_space<vmem>>, vector<16x256xf32>
      %c0_12 = arith.constant 0 : index
      %c0_13 = arith.constant 0 : index
      %13 = vector.load %arg5[%c0_12, %c0_13] : memref<1x256xf32, #tpu.memory_space<vmem>>, vector<1x256xf32>
      %14 = vector.broadcast %13 : vector<1x256xf32> to vector<16x256xf32>
      %15 = arith.addf %12, %14 : vector<16x256xf32>
      %c0_14 = arith.constant 0 : index
      %c0_15 = arith.constant 0 : index
      %16 = vector.load %arg6[%c0_14, %c0_15] : memref<16x256xf32, #tpu.memory_space<vmem>>, vector<16x256xf32>
      tpu.vector_store %arg6[%c0_14, %c0_15], %15 {strides = array<i32>} : memref<16x256xf32, #tpu.memory_space<vmem>>, vector<16x256xf32>,
    } else {
    }
    return
  }
  func.func @transform_0(%arg0: i32, %arg1: i32, %arg2: i32) -> (i32, i32) {
    %c0_i32 = arith.constant 0 : i32
    return %arg0, %arg2 : i32, i32
  }
  func.func @transform_1(%arg0: i32, %arg1: i32, %arg2: i32) -> (i32, i32) {
    %c0_i32 = arith.constant 0 : i32
    return %arg2, %arg1 : i32, i32
  }
  func.func @transform_2(%arg0: i32, %arg1: i32, %arg2: i32) -> (i32, i32) {
    %c0_i32 = arith.constant 0 : i32
    %c0_i32_0 = arith.constant 0 : i32
    return %c0_i32, %arg1 : i32, i32
  }
  func.func @transform_3(%arg0: i32, %arg1: i32, %arg2: i32) -> (i32, i32) {
    %c0_i32 = arith.constant 0 : i32
    return %arg0, %arg1 : i32, i32
  }
}

module attributes {stable_mosaic.version = 11 : i64} {
  func.func @_in_adain_kernel(%arg0: i32, %arg1: memref<1x256x128xf32, #tpu.memory_space<vmem>>, %arg2: memref<1x1x128xf32, #tpu.memory_space<vmem>>, %arg3: memref<1x1x128xf32, #tpu.memory_space<vmem>>, %arg4: memref<1x256x128xf32, #tpu.memory_space<vmem>>) attributes {dimension_semantics = [#tpu.dimension_semantics<parallel>], iteration_bounds = array<i64: 2>, scalar_prefetch = 0 : i64, scratch_operands = 0 : i64, tpu.core_type = #tpu.core_type<tc>, window_params = [{transform_indices = @transform_0, window_bounds = array<i64: 1, 256, 128>}, {transform_indices = @transform_1, window_bounds = array<i64: 1, 1, 128>}, {transform_indices = @transform_2, window_bounds = array<i64: 1, 1, 128>}, {transform_indices = @transform_3, window_bounds = array<i64: 1, 256, 128>}]} {
    %c0 = arith.constant 0 : index
    %c0_0 = arith.constant 0 : index
    %c0_1 = arith.constant 0 : index
    %0 = vector.load %arg1[%c0, %c0_0, %c0_1] : memref<1x256x128xf32, #tpu.memory_space<vmem>>, vector<1x256x128xf32>
    %cst = arith.constant dense<0.000000e+00> : vector<1x128xf32>
    %1 = vector.multi_reduction <add>, %0, %cst [1] : vector<1x256x128xf32> to vector<1x128xf32>
    %2 = vector.shape_cast %1 : vector<1x128xf32> to vector<1x1x128xf32>
    %cst_2 = arith.constant 2.560000e+02 : f32
    %3 = vector.broadcast %cst_2 : f32 to vector<1x1x128xf32>
    %4 = arith.divf %2, %3 : vector<1x1x128xf32>
    %5 = vector.broadcast %4 : vector<1x1x128xf32> to vector<1x256x128xf32>
    %6 = arith.subf %0, %5 : vector<1x256x128xf32>
    %7 = arith.mulf %6, %6 : vector<1x256x128xf32>
    %cst_3 = arith.constant dense<0.000000e+00> : vector<1x128xf32>
    %8 = vector.multi_reduction <add>, %7, %cst_3 [1] : vector<1x256x128xf32> to vector<1x128xf32>
    %9 = vector.shape_cast %8 : vector<1x128xf32> to vector<1x1x128xf32>
    %cst_4 = arith.constant 2.560000e+02 : f32
    %10 = vector.broadcast %cst_4 : f32 to vector<1x1x128xf32>
    %11 = arith.divf %9, %10 : vector<1x1x128xf32>
    %cst_5 = arith.constant 9.99999993E-9 : f32
    %12 = vector.broadcast %cst_5 : f32 to vector<1x1x128xf32>
    %13 = arith.addf %11, %12 : vector<1x1x128xf32>
    %14 = math.rsqrt %13 : vector<1x1x128xf32>
    %15 = vector.broadcast %14 : vector<1x1x128xf32> to vector<1x256x128xf32>
    %16 = arith.mulf %6, %15 : vector<1x256x128xf32>
    %c0_6 = arith.constant 0 : index
    %c0_7 = arith.constant 0 : index
    %c0_8 = arith.constant 0 : index
    %17 = vector.load %arg2[%c0_6, %c0_7, %c0_8] : memref<1x1x128xf32, #tpu.memory_space<vmem>>, vector<1x1x128xf32>
    %18 = vector.broadcast %17 : vector<1x1x128xf32> to vector<1x256x128xf32>
    %19 = arith.mulf %16, %18 : vector<1x256x128xf32>
    %c0_9 = arith.constant 0 : index
    %c0_10 = arith.constant 0 : index
    %c0_11 = arith.constant 0 : index
    %20 = vector.load %arg3[%c0_9, %c0_10, %c0_11] : memref<1x1x128xf32, #tpu.memory_space<vmem>>, vector<1x1x128xf32>
    %21 = vector.broadcast %20 : vector<1x1x128xf32> to vector<1x256x128xf32>
    %22 = arith.addf %19, %21 : vector<1x256x128xf32>
    %cst_12 = arith.constant 0.000000e+00 : f32
    %23 = vector.broadcast %cst_12 : f32 to vector<1x256x128xf32>
    %24 = arith.maximumf %22, %23 : vector<1x256x128xf32>
    %c0_13 = arith.constant 0 : index
    %c0_14 = arith.constant 0 : index
    %c0_15 = arith.constant 0 : index
    %25 = vector.load %arg4[%c0_13, %c0_14, %c0_15] : memref<1x256x128xf32, #tpu.memory_space<vmem>>, vector<1x256x128xf32>
    tpu.vector_store %arg4[%c0_13, %c0_14, %c0_15], %24 {strides = array<i32>} : memref<1x256x128xf32, #tpu.memory_space<vmem>>, vector<1x256x128xf32>,
    return
  }
  func.func @transform_0(%arg0: i32) -> (i32, i32, i32) {
    %c0_i32 = arith.constant 0 : i32
    %c0_i32_0 = arith.constant 0 : i32
    %c0_i32_1 = arith.constant 0 : i32
    return %arg0, %c0_i32, %c0_i32_0 : i32, i32, i32
  }
  func.func @transform_1(%arg0: i32) -> (i32, i32, i32) {
    %c0_i32 = arith.constant 0 : i32
    %c0_i32_0 = arith.constant 0 : i32
    %c0_i32_1 = arith.constant 0 : i32
    return %arg0, %c0_i32, %c0_i32_0 : i32, i32, i32
  }
  func.func @transform_2(%arg0: i32) -> (i32, i32, i32) {
    %c0_i32 = arith.constant 0 : i32
    %c0_i32_0 = arith.constant 0 : i32
    %c0_i32_1 = arith.constant 0 : i32
    return %arg0, %c0_i32, %c0_i32_0 : i32, i32, i32
  }
  func.func @transform_3(%arg0: i32) -> (i32, i32, i32) {
    %c0_i32 = arith.constant 0 : i32
    %c0_i32_0 = arith.constant 0 : i32
    %c0_i32_1 = arith.constant 0 : i32
    return %arg0, %c0_i32, %c0_i32_0 : i32, i32, i32
  }
}

module attributes {stable_mosaic.version = 11 : i64} {
  func.func @_in_adain_kernel(%arg0: i32, %arg1: memref<1x256x128xf32, #tpu.memory_space<vmem>>, %arg2: memref<1x1x128xf32, #tpu.memory_space<vmem>>, %arg3: memref<1x1x128xf32, #tpu.memory_space<vmem>>, %arg4: memref<1x256x128xf32, #tpu.memory_space<vmem>>, %arg5: memref<1x256x128xf32, #tpu.memory_space<vmem>>) attributes {dimension_semantics = [#tpu.dimension_semantics<parallel>], iteration_bounds = array<i64: 2>, scalar_prefetch = 0 : i64, scratch_operands = 0 : i64, tpu.core_type = #tpu.core_type<tc>, window_params = [{transform_indices = @transform_0, window_bounds = array<i64: 1, 256, 128>}, {transform_indices = @transform_1, window_bounds = array<i64: 1, 1, 128>}, {transform_indices = @transform_2, window_bounds = array<i64: 1, 1, 128>}, {transform_indices = @transform_3, window_bounds = array<i64: 1, 256, 128>}, {transform_indices = @transform_4, window_bounds = array<i64: 1, 256, 128>}]} {
    %c0 = arith.constant 0 : index
    %c0_0 = arith.constant 0 : index
    %c0_1 = arith.constant 0 : index
    %0 = vector.load %arg1[%c0, %c0_0, %c0_1] : memref<1x256x128xf32, #tpu.memory_space<vmem>>, vector<1x256x128xf32>
    %cst = arith.constant dense<0.000000e+00> : vector<1x128xf32>
    %1 = vector.multi_reduction <add>, %0, %cst [1] : vector<1x256x128xf32> to vector<1x128xf32>
    %2 = vector.shape_cast %1 : vector<1x128xf32> to vector<1x1x128xf32>
    %cst_2 = arith.constant 2.560000e+02 : f32
    %3 = vector.broadcast %cst_2 : f32 to vector<1x1x128xf32>
    %4 = arith.divf %2, %3 : vector<1x1x128xf32>
    %5 = vector.broadcast %4 : vector<1x1x128xf32> to vector<1x256x128xf32>
    %6 = arith.subf %0, %5 : vector<1x256x128xf32>
    %7 = arith.mulf %6, %6 : vector<1x256x128xf32>
    %cst_3 = arith.constant dense<0.000000e+00> : vector<1x128xf32>
    %8 = vector.multi_reduction <add>, %7, %cst_3 [1] : vector<1x256x128xf32> to vector<1x128xf32>
    %9 = vector.shape_cast %8 : vector<1x128xf32> to vector<1x1x128xf32>
    %cst_4 = arith.constant 2.560000e+02 : f32
    %10 = vector.broadcast %cst_4 : f32 to vector<1x1x128xf32>
    %11 = arith.divf %9, %10 : vector<1x1x128xf32>
    %cst_5 = arith.constant 9.99999993E-9 : f32
    %12 = vector.broadcast %cst_5 : f32 to vector<1x1x128xf32>
    %13 = arith.addf %11, %12 : vector<1x1x128xf32>
    %14 = math.rsqrt %13 : vector<1x1x128xf32>
    %15 = vector.broadcast %14 : vector<1x1x128xf32> to vector<1x256x128xf32>
    %16 = arith.mulf %6, %15 : vector<1x256x128xf32>
    %c0_6 = arith.constant 0 : index
    %c0_7 = arith.constant 0 : index
    %c0_8 = arith.constant 0 : index
    %17 = vector.load %arg2[%c0_6, %c0_7, %c0_8] : memref<1x1x128xf32, #tpu.memory_space<vmem>>, vector<1x1x128xf32>
    %18 = vector.broadcast %17 : vector<1x1x128xf32> to vector<1x256x128xf32>
    %19 = arith.mulf %16, %18 : vector<1x256x128xf32>
    %c0_9 = arith.constant 0 : index
    %c0_10 = arith.constant 0 : index
    %c0_11 = arith.constant 0 : index
    %20 = vector.load %arg3[%c0_9, %c0_10, %c0_11] : memref<1x1x128xf32, #tpu.memory_space<vmem>>, vector<1x1x128xf32>
    %21 = vector.broadcast %20 : vector<1x1x128xf32> to vector<1x256x128xf32>
    %22 = arith.addf %19, %21 : vector<1x256x128xf32>
    %c0_12 = arith.constant 0 : index
    %c0_13 = arith.constant 0 : index
    %c0_14 = arith.constant 0 : index
    %23 = vector.load %arg4[%c0_12, %c0_13, %c0_14] : memref<1x256x128xf32, #tpu.memory_space<vmem>>, vector<1x256x128xf32>
    %24 = arith.addf %22, %23 : vector<1x256x128xf32>
    %c0_15 = arith.constant 0 : index
    %c0_16 = arith.constant 0 : index
    %c0_17 = arith.constant 0 : index
    %25 = vector.load %arg5[%c0_15, %c0_16, %c0_17] : memref<1x256x128xf32, #tpu.memory_space<vmem>>, vector<1x256x128xf32>
    tpu.vector_store %arg5[%c0_15, %c0_16, %c0_17], %24 {strides = array<i32>} : memref<1x256x128xf32, #tpu.memory_space<vmem>>, vector<1x256x128xf32>,
    return
  }
  func.func @transform_0(%arg0: i32) -> (i32, i32, i32) {
    %c0_i32 = arith.constant 0 : i32
    %c0_i32_0 = arith.constant 0 : i32
    %c0_i32_1 = arith.constant 0 : i32
    return %arg0, %c0_i32, %c0_i32_0 : i32, i32, i32
  }
  func.func @transform_1(%arg0: i32) -> (i32, i32, i32) {
    %c0_i32 = arith.constant 0 : i32
    %c0_i32_0 = arith.constant 0 : i32
    %c0_i32_1 = arith.constant 0 : i32
    return %arg0, %c0_i32, %c0_i32_0 : i32, i32, i32
  }
  func.func @transform_2(%arg0: i32) -> (i32, i32, i32) {
    %c0_i32 = arith.constant 0 : i32
    %c0_i32_0 = arith.constant 0 : i32
    %c0_i32_1 = arith.constant 0 : i32
    return %arg0, %c0_i32, %c0_i32_0 : i32, i32, i32
  }
  func.func @transform_3(%arg0: i32) -> (i32, i32, i32) {
    %c0_i32 = arith.constant 0 : i32
    %c0_i32_0 = arith.constant 0 : i32
    %c0_i32_1 = arith.constant 0 : i32
    return %arg0, %c0_i32, %c0_i32_0 : i32, i32, i32
  }
  func.func @transform_4(%arg0: i32) -> (i32, i32, i32) {
    %c0_i32 = arith.constant 0 : i32
    %c0_i32_0 = arith.constant 0 : i32
    %c0_i32_1 = arith.constant 0 : i32
    return %arg0, %c0_i32, %c0_i32_0 : i32, i32, i32
  }
}

</mosaic_0001>

<bundles_post_ra>
// kernel: resnet_block_adain.6
= control target key start
LH: loop header
LB: loop body
LE: loop exit
PB: predicated region body
PF: predicated region fallthrough
CT: control target
= control target key end

     0   :  { %v192_v1 = vmov 0   ;;  %vm82_vm0 = vcmask 523264   ;;  %v146_v10 = vlaneseq  ;;  %s255_s1 = inlined_call_operand.vmem [shape: bf16[64,256], index: 1, kind: input, shape index: {}]   ;;  %s256_s0 = inlined_call_operand.vmem [shape: bf16[16,64], index: 0, kind: input, shape index: {}]   ;;  %s257_s2 = inlined_call_operand.vmem [shape: f32[1,256], index: 2, kind: input, shape index: {}]   ;;  %s258_s3 = inlined_call_operand.vmem [shape: f32[16,256], index: 3, kind: output, shape index: {}]  }
   0x1   :  { %v179_v0 = vld [vmem:[%s255_s1 + $0x4] ss:$8 sps:$4 sm:$0xff]   ;;  %118 = vmatprep.mubr.bf16.mxu0 %v192_v1  ;;  %v181_v2 = vld [vmem:[%s255_s1] ss:$8 sps:$4 sm:$0xff]   ;;  %v182_v3 = vld [vmem:[%s255_s1 + $0x14] ss:$8 sps:$4 sm:$0xff]  }
   0x2   :  { %86 = vmatprep.subr.bf16.mxu0 %v179_v0  ;;  %v184_v4 = vld [vmem:[%s255_s1 + $0x10] ss:$8 sps:$4 sm:$0xff]   ;;  %v185_v5 = vld [vmem:[%s255_s1 + $0x24] ss:$8 sps:$4 sm:$0xff]   ;;  %v187_v6 = vld [vmem:[%s255_s1 + $0x20] ss:$8 sps:$4 sm:$0xff]  }
   0x3   :  { %87 = vmatpush1.bf16.msra.mxu0 %v181_v2  ;;  %v188_v7 = vld [vmem:[%s255_s1 + $0x34] ss:$8 sps:$4 sm:$0xff]   ;;  %v190_v8 = vld [vmem:[%s255_s1 + $0x30] ss:$8 sps:$4 sm:$0xff]   ;;  %v191_v9 = vld [vmem:[%s256_s0] sm:$0xff]   ;;  %v147_v11 = vshrl.u32 %v146_v10, 7 }
   0x4   :  { %88 = vmatprep.subr.bf16.mxu0 %v182_v3  ;;  %v144_v13 = vld [vmem:[%s257_s2] sm:$0x3] }
   0x5   :  { %v148_v12 = vsub.s32 0, %v147_v11  ;;  %v152_v14 = vsub.s32 1, %v147_v11 }
   0x7   :  { %89 = vmatpush1.bf16.msra.mxu0 %v184_v4  ;;  %v149_v15 = vrot.slane %v144_v13, %v148_v12  ;;  %v153_v16 = vrot.slane %v144_v13, %v152_v14 }
   0x8   :  { %90 = vmatprep.subr.bf16.mxu0 %v185_v5 }
   0xb   :  { %91 = vmatpush1.bf16.msra.mxu0 %v187_v6 }
   0xc   :  { %92 = vmatprep.subr.bf16.mxu0 %v188_v7 }
   0xf   :  { %93 = vmatpush1.bf16.msra.mxu0 %v190_v8 }
  0x12   :  { %177 = vmatmul.mubr.msk.bf16.vlgmr.msra.gmra.mrb[0].mxu0 %vm82_vm0, %v191_v9 }
  0xe5   :  { %v120_v17 = vpop.f32.mrb[0].mxu0 }
  0xe6   :  { %v156_v18 = vadd.f32 %v149_v15, %v120_v17  ;;  %v122_v19 = vpop.f32.mrb[1].mxu0 }
  0xe7   :  { %v157_v20 = vadd.f32 %v153_v16, %v122_v19  ;;  %v124_v21 = vpop.f32.mrb[2].mxu0 }
  0xe8   :  { %160 = vst [vmem:[%s258_s3] sm:$0xff] %v156_v18  ;;  %v158_v22 = vadd.f32 %v149_v15, %v124_v21  ;;  %v126_v23 = vpop.f32.mrb[3].mxu0 }
  0xe9   :  { %161 = vst [vmem:[%s258_s3 + $0x8] sm:$0xff] %v157_v20  ;;  %v159_v24 = vadd.f32 %v153_v16, %v126_v23 }
  0xea   :  { %162 = vst [vmem:[%s258_s3 + $0x10] sm:$0xff] %v158_v22 }
  0xeb   :  { %163 = vst [vmem:[%s258_s3 + $0x18] sm:$0xff] %v159_v24 }

// kernel: resnet_block_adain.9
= control target key start
LH: loop header
LB: loop body
LE: loop exit
PB: predicated region body
PF: predicated region fallthrough
CT: control target
= control target key end

     0   :  { %s674_s12 = smov 0   ;;  %s1198_s0 = inlined_call_operand.vmem [shape: f32[2,256,128], index: 0, kind: input, shape index: {}]   ;;  %s1199_s1 = inlined_call_operand.vmem [shape: f32[2,1,128], index: 1, kind: input, shape index: {}]   ;;  %s1200_s2 = inlined_call_operand.vmem [shape: f32[2,1,128], index: 2, kind: input, shape index: {}]   ;;  %s1201_s3 = inlined_call_operand.vmem [shape: f32[2,256,128], index: 3, kind: output, shape index: {}]  }
   0x1 LB: > { %s621_s13 = sadd.s32 4294967295, %s652_s12   ;;  %p625_p0 = scmp.ge.s32.totalorder %s652_s12, 1  ;;  %s652_s12 = sphi %s674_s12, %s13_s12  }
   0x2   : > { %p153_p1 = scmp.lt.s32.totalorder %s652_s12, 3 }
   0x4   : > { %p154_p2 = pnand %p625_p0, %p153_p1 }
   0x5   : > { %p183_p3 = scmp.lt.s32.totalorder (!%p154_p2), %s621_s13, 1 }
   0x6   : > { %157 = sbr.rel (%p154_p2) target bundleno = 225 (0xe1), region = 32 }
   0xd   : > { %s1203_s13 = smov (!%p183_p3, %s621_s13), 1 }
   0xe   : > { %s634_s14 = sshll.u32 %s1203_s13, 8  ;;  %s190_s20 = scalar_lea.vmem %s1199_s1, %s1203_s13 }
   0xf   : > { %s690_s17 = scalar_lea.vmem %s1198_s0, %s634_s14  ;;  %s193_s23 = scalar_lea.vmem %s1200_s2, %s1203_s13 }
  0x10   : > { %v693_v0 = vld [vmem:[%s690_s17] sm:$0xff]  ;;  %v696_v1 = vld [vmem:[%s690_s17 + $0x8] sm:$0xff]  ;;  %v699_v2 = vld [vmem:[%s690_s17 + $0x10] sm:$0xff]  ;;  %s1061_s26 = scalar_lea.vmem %s1201_s3, %s634_s14 }
  0x11   : > { %v231_v3 = vadd.f32 %v696_v1, %v693_v0  ;;  %v704_v4 = vld [vmem:[%s690_s17 + $0x18] sm:$0xff]  ;;  %v708_v6 = vld [vmem:[%s690_s17 + $0x20] sm:$0xff]  ;;  %v712_v8 = vld [vmem:[%s690_s17 + $0x28] sm:$0xff] }
  0x12   : > { %v716_v10 = vld [vmem:[%s690_s17 + $0x30] sm:$0xff]  ;;  %v720_v12 = vld [vmem:[%s690_s17 + $0x38] sm:$0xff]  ;;  %v724_v14 = vld [vmem:[%s690_s17 + $0x40] sm:$0xff] }
  0x13   : > { %v232_v5 = vadd.f32 %v231_v3, %v699_v2  ;;  %v728_v16 = vld [vmem:[%s690_s17 + $0x48] sm:$0xff]  ;;  %v732_v18 = vld [vmem:[%s690_s17 + $0x50] sm:$0xff]  ;;  %v736_v20 = vld [vmem:[%s690_s17 + $0x58] sm:$0xff] }
  0x14   : > { %v740_v22 = vld [vmem:[%s690_s17 + $0x60] sm:$0xff]  ;;  %v744_v24 = vld [vmem:[%s690_s17 + $0x68] sm:$0xff]  ;;  %v748_v26 = vld [vmem:[%s690_s17 + $0x70] sm:$0xff] }
  0x15   : > { %v233_v7 = vadd.f32 %v232_v5, %v704_v4  ;;  %v752_v28 = vld [vmem:[%s690_s17 + $0x78] sm:$0xff]  ;;  %v756_v30 = vld [vmem:[%s690_s17 + $0x80] sm:$0xff]  ;;  %v760_v32 = vld [vmem:[%s690_s17 + $0x88] sm:$0xff] }
  0x16   : > { %v764_v34 = vld [vmem:[%s690_s17 + $0x90] sm:$0xff]  ;;  %v768_v36 = vld [vmem:[%s690_s17 + $0x98] sm:$0xff]  ;;  %v772_v38 = vld [vmem:[%s690_s17 + $0xa0] sm:$0xff] }
  0x17   : > { %v234_v9 = vadd.f32 %v233_v7, %v708_v6  ;;  %v776_v40 = vld [vmem:[%s690_s17 + $0xa8] sm:$0xff]  ;;  %v780_v42 = vld [vmem:[%s690_s17 + $0xb0] sm:$0xff]  ;;  %v784_v44 = vld [vmem:[%s690_s17 + $0xb8] sm:$0xff] }
  0x18   : > { %v788_v46 = vld [vmem:[%s690_s17 + $0xc0] sm:$0xff]  ;;  %v792_v48 = vld [vmem:[%s690_s17 + $0xc8] sm:$0xff]  ;;  %v796_v50 = vld [vmem:[%s690_s17 + $0xd0] sm:$0xff] }
  0x19   : > { %v235_v11 = vadd.f32 %v234_v9, %v712_v8  ;;  %v800_v52 = vld [vmem:[%s690_s17 + $0xd8] sm:$0xff]  ;;  %v804_v54 = vld [vmem:[%s690_s17 + $0xe0] sm:$0xff]  ;;  %v808_v56 = vld [vmem:[%s690_s17 + $0xe8] sm:$0xff] }
  0x1a   : > { %v812_v58 = vld [vmem:[%s690_s17 + $0xf0] sm:$0xff]  ;;  %v816_v60 = vld [vmem:[%s690_s17 + $0xf8] sm:$0xff] }
  0x1b   : > { %v236_v13 = vadd.f32 %v235_v11, %v716_v10 }
  0x1d   : > { %v237_v15 = vadd.f32 %v236_v13, %v720_v12 }
  0x1f   : > { %v238_v17 = vadd.f32 %v237_v15, %v724_v14 }
  0x21   : > { %v239_v19 = vadd.f32 %v238_v17, %v728_v16 }
  0x23   : > { %v240_v21 = vadd.f32 %v239_v19, %v732_v18 }
  0x25   : > { %v241_v23 = vadd.f32 %v240_v21, %v736_v20 }
  0x27   : > { %v242_v25 = vadd.f32 %v241_v23, %v740_v22 }
  0x29   : > { %v243_v27 = vadd.f32 %v242_v25, %v744_v24 }
  0x2b   : > { %v244_v29 = vadd.f32 %v243_v27, %v748_v26 }
  0x2d   : > { %v245_v31 = vadd.f32 %v244_v29, %v752_v28 }
  0x2f   : > { %v246_v33 = vadd.f32 %v245_v31, %v756_v30 }
  0x31   : > { %v247_v35 = vadd.f32 %v246_v33, %v760_v32 }
  0x33   : > { %v248_v37 = vadd.f32 %v247_v35, %v764_v34 }
  0x35   : > { %v249_v39 = vadd.f32 %v248_v37, %v768_v36 }
  0x37   : > { %v250_v41 = vadd.f32 %v249_v39, %v772_v38 }
  0x39   : > { %v251_v43 = vadd.f32 %v250_v41, %v776_v40 }
  0x3b   : > { %v252_v45 = vadd.f32 %v251_v43, %v780_v42 }
  0x3d   : > { %v253_v47 = vadd.f32 %v252_v45, %v784_v44 }
  0x3f   : > { %v254_v49 = vadd.f32 %v253_v47, %v788_v46 }
  0x41   : > { %v255_v51 = vadd.f32 %v254_v49, %v792_v48 }
  0x43   : > { %v256_v53 = vadd.f32 %v255_v51, %v796_v50 }
  0x45   : > { %v257_v55 = vadd.f32 %v256_v53, %v800_v52 }
  0x47   : > { %v258_v57 = vadd.f32 %v257_v55, %v804_v54 }
  0x49   : > { %v259_v59 = vadd.f32 %v258_v57, %v808_v56 }
  0x4b   : > { %v260_v61 = vadd.f32 %v259_v59, %v812_v58 }
  0x4d   : > { %v261_v62 = vadd.f32 %v260_v61, %v816_v60 }
  0x4f   : > { %v262_v63 = vrot.slane %v261_v62, 4 }
  0x51   : > { %v263_v3 = vadd.f32 %v262_v63, %v261_v62 }
  0x53   : > { %v264_v5 = vrot.slane %v263_v3, 2 }
  0x55   : > { %v265_v7 = vadd.f32 %v264_v5, %v263_v3 }
  0x57   : > { %v266_v9 = vrot.slane %v265_v7, 1 }
  0x59   : > { %v267_v11 = vadd.f32 %v266_v9, %v265_v7 }
  0x5b   : > { %v820_v13 = vmul.f32 0.00390625, %v267_v11 }
  0x5d   : > { %v824_v15 = vsub.f32 %v693_v0, %v820_v13  ;;  %v828_v17 = vsub.f32 %v696_v1, %v820_v13  ;;  %v832_v19 = vsub.f32 %v699_v2, %v820_v13  ;;  %v836_v21 = vsub.f32 %v704_v4, %v820_v13 }
  0x5e   : > { %v844_v0 = vsub.f32 %v708_v6, %v820_v13  ;;  %v850_v2 = vsub.f32 %v712_v8, %v820_v13  ;;  %v856_v29 = vsub.f32 %v716_v10, %v820_v13  ;;  %v862_v33 = vsub.f32 %v720_v12, %v820_v13 }
  0x5f   : > { %v302_v23 = vmul.f32 %v824_v15, %v824_v15  ;;  %v303_v25 = vmul.f32 %v828_v17, %v828_v17  ;;  %v304_v1 = vmul.f32 %v832_v19, %v832_v19  ;;  %v305_v4 = vmul.f32 %v836_v21, %v836_v21 }
  0x60   : > { %v306_v31 = vmul.f32 %v844_v0, %v844_v0  ;;  %v307_v8 = vmul.f32 %v850_v2, %v850_v2  ;;  %v868_v37 = vsub.f32 %v724_v14, %v820_v13  ;;  %v308_v10 = vmul.f32 %v856_v29, %v856_v29 }
  0x61   : > { %v334_v27 = vadd.f32 %v303_v25, %v302_v23  ;;  %v874_v41 = vsub.f32 %v728_v16, %v820_v13  ;;  %v309_v12 = vmul.f32 %v862_v33, %v862_v33  ;;  %v880_v45 = vsub.f32 %v732_v18, %v820_v13 }
  0x62   : > { %v310_v14 = vmul.f32 %v868_v37, %v868_v37  ;;  %v886_v49 = vsub.f32 %v736_v20, %v820_v13  ;;  %v892_v53 = vsub.f32 %v740_v22, %v820_v13  ;;  %v898_v57 = vsub.f32 %v744_v24, %v820_v13 }
  0x63   : > { %v335_v6 = vadd.f32 %v334_v27, %v304_v1  ;;  %v311_v16 = vmul.f32 %v874_v41, %v874_v41  ;;  %v312_v18 = vmul.f32 %v880_v45, %v880_v45  ;;  %v904_v61 = vsub.f32 %v748_v26, %v820_v13 }
  0x64   : > { %v313_v20 = vmul.f32 %v886_v49, %v886_v49  ;;  %v314_v22 = vmul.f32 %v892_v53, %v892_v53  ;;  %v910_v63 = vsub.f32 %v752_v28, %v820_v13  ;;  %v315_v24 = vmul.f32 %v898_v57, %v898_v57 }
  0x65   : > { %v336_v35 = vadd.f32 %v335_v6, %v305_v4  ;;  %v916_v5 = vsub.f32 %v756_v30, %v820_v13  ;;  %v316_v26 = vmul.f32 %v904_v61, %v904_v61  ;;  %v922_v9 = vsub.f32 %v760_v32, %v820_v13 }
  0x66   : > { %v317_v28 = vmul.f32 %v910_v63, %v910_v63  ;;  %v928_v23 = vsub.f32 %v764_v34, %v820_v13  ;;  %v934_v1 = vsub.f32 %v768_v36, %v820_v13  ;;  %v940_v27 = vsub.f32 %v772_v38, %v820_v13 }
  0x67   : > { %v337_v39 = vadd.f32 %v336_v35, %v306_v31  ;;  %v318_v30 = vmul.f32 %v916_v5, %v916_v5  ;;  %v319_v32 = vmul.f32 %v922_v9, %v922_v9  ;;  %v946_v6 = vsub.f32 %v776_v40, %v820_v13 }
  0x68   : > { %v320_v34 = vmul.f32 %v928_v23, %v928_v23  ;;  %v321_v36 = vmul.f32 %v934_v1, %v934_v1  ;;  %v952_v35 = vsub.f32 %v780_v42, %v820_v13  ;;  %v322_v38 = vmul.f32 %v940_v27, %v940_v27 }
  0x69   : > { %v338_v43 = vadd.f32 %v337_v39, %v307_v8  ;;  %v958_v39 = vsub.f32 %v784_v44, %v820_v13  ;;  %v323_v40 = vmul.f32 %v946_v6, %v946_v6 }
  0x6a   : > { %v324_v42 = vmul.f32 %v952_v35, %v952_v35 }
  0x6b   : > { %v339_v47 = vadd.f32 %v338_v43, %v308_v10  ;;  %v964_v43 = vsub.f32 %v788_v46, %v820_v13  ;;  %v325_v44 = vmul.f32 %v958_v39, %v958_v39 }
  0x6d   : > { %v340_v51 = vadd.f32 %v339_v47, %v309_v12  ;;  %v970_v47 = vsub.f32 %v792_v48, %v820_v13  ;;  %v326_v46 = vmul.f32 %v964_v43, %v964_v43 }
  0x6f   : > { %v341_v55 = vadd.f32 %v340_v51, %v310_v14  ;;  %v976_v51 = vsub.f32 %v796_v50, %v820_v13  ;;  %v327_v48 = vmul.f32 %v970_v47, %v970_v47 }
  0x71   : > { %v342_v59 = vadd.f32 %v341_v55, %v311_v16  ;;  %v982_v55 = vsub.f32 %v800_v52, %v820_v13  ;;  %v328_v50 = vmul.f32 %v976_v51, %v976_v51 }
  0x73   : > { %v343_v62 = vadd.f32 %v342_v59, %v312_v18  ;;  %v988_v59 = vsub.f32 %v804_v54, %v820_v13  ;;  %v329_v52 = vmul.f32 %v982_v55, %v982_v55 }
  0x75   : > { %v344_v3 = vadd.f32 %v343_v62, %v313_v20  ;;  %v994_v62 = vsub.f32 %v808_v56, %v820_v13  ;;  %v330_v54 = vmul.f32 %v988_v59, %v988_v59 }
  0x77   : > { %v345_v7 = vadd.f32 %v344_v3, %v314_v22  ;;  %v1000_v3 = vsub.f32 %v812_v58, %v820_v13  ;;  %v331_v56 = vmul.f32 %v994_v62, %v994_v62 }
  0x79   : > { %v346_v11 = vadd.f32 %v345_v7, %v315_v24  ;;  %v1006_v7 = vsub.f32 %v816_v60, %v820_v13 }
  0x7b   : > { %v347_v25 = vadd.f32 %v346_v11, %v316_v26  ;;  %v332_v11 = vmul.f32 %v1000_v3, %v1000_v3  ;;  %v333_v58 = vmul.f32 %v1006_v7, %v1006_v7 }
  0x7d   : > { %v348_v4 = vadd.f32 %v347_v25, %v317_v28 }
  0x7f   : > { %v349_v31 = vadd.f32 %v348_v4, %v318_v30 }
  0x81   : > { %v350_v8 = vadd.f32 %v349_v31, %v319_v32 }
  0x83   : > { %v351_v10 = vadd.f32 %v350_v8, %v320_v34 }
  0x85   : > { %v352_v12 = vadd.f32 %v351_v10, %v321_v36 }
  0x87   : > { %v353_v14 = vadd.f32 %v352_v12, %v322_v38  ;;  %v1024_v12 = vld [vmem:[%s190_s20] ss:$0 sm:$0xff] }
  0x89   : > { %v354_v16 = vadd.f32 %v353_v14, %v323_v40 }
  0x8b   : > { %v355_v18 = vadd.f32 %v354_v16, %v324_v42 }
  0x8d   : > { %v356_v20 = vadd.f32 %v355_v18, %v325_v44 }
  0x8f   : > { %v357_v22 = vadd.f32 %v356_v20, %v326_v46  ;;  %v1034_v46 = vld [vmem:[%s193_s23] ss:$0 sm:$0xff] }
  0x91   : > { %v358_v24 = vadd.f32 %v357_v22, %v327_v48 }
  0x93   : > { %v359_v26 = vadd.f32 %v358_v24, %v328_v50 }
  0x95   : > { %v360_v28 = vadd.f32 %v359_v26, %v329_v52 }
  0x97   : > { %v361_v30 = vadd.f32 %v360_v28, %v330_v54 }
  0x99   : > { %v362_v25 = vadd.f32 %v361_v30, %v331_v56 }
  0x9b   : > { %v363_v32 = vadd.f32 %v362_v25, %v332_v11 }
  0x9d   : > { %v364_v4 = vadd.f32 %v363_v32, %v333_v58 }
  0x9f   : > { %v365_v34 = vrot.slane %v364_v4, 4 }
  0xa1   : > { %v366_v31 = vadd.f32 %v365_v34, %v364_v4 }
  0xa3   : > { %v367_v60 = vrot.slane %v366_v31, 2 }
  0xa5   : > { %v368_v13 = vadd.f32 %v367_v60, %v366_v31 }
  0xa7   : > { %v369_v36 = vrot.slane %v368_v13, 1 }
  0xa9   : > { %v370_v8 = vadd.f32 %v369_v36, %v368_v13 }
  0xab   : > { %v371_v38 = vmul.f32 0.00390625, %v370_v8 }
  0xad   : > { %v372_v10 = vadd.f32 1e-08, %v371_v38 }
  0xaf   : > { %644 = vrsqrt.f32 %v372_v10 }
  0xb9   : > { %v1022_v40 = vpop.eup %644 }
  0xba   : > { %v374_v42 = vmul.f32 %v1022_v40, %v824_v15  ;;  %v375_v14 = vmul.f32 %v1022_v40, %v828_v17  ;;  %v376_v44 = vmul.f32 %v1022_v40, %v832_v19  ;;  %v377_v16 = vmul.f32 %v1022_v40, %v836_v21 }
  0xbb   : > { %v378_v18 = vmul.f32 %v1022_v40, %v844_v0  ;;  %v379_v48 = vmul.f32 %v1022_v40, %v850_v2  ;;  %v380_v15 = vmul.f32 %v1022_v40, %v856_v29  ;;  %v381_v17 = vmul.f32 %v1022_v40, %v862_v33 }
  0xbc   : > { %v413_v19 = vmul.f32 %v1024_v12, %v374_v42  ;;  %v414_v20 = vmul.f32 %v1024_v12, %v375_v14  ;;  %v415_v21 = vmul.f32 %v1024_v12, %v376_v44  ;;  %v416_v50 = vmul.f32 %v1024_v12, %v377_v16 }
  0xbd   : > { %v417_v0 = vmul.f32 %v1024_v12, %v378_v18  ;;  %v418_v22 = vmul.f32 %v1024_v12, %v379_v48  ;;  %v419_v2 = vmul.f32 %v1024_v12, %v380_v15  ;;  %v420_v52 = vmul.f32 %v1024_v12, %v381_v17 }
  0xbe   : > { %v452_v29 = vadd.f32 %v1034_v46, %v413_v19  ;;  %v453_v33 = vadd.f32 %v1034_v46, %v414_v20  ;;  %v454_v24 = vadd.f32 %v1034_v46, %v415_v21  ;;  %v455_v54 = vadd.f32 %v1034_v46, %v416_v50 }
  0xbf   : > { %v456_v26 = vadd.f32 %v1034_v46, %v417_v0  ;;  %v457_v56 = vadd.f32 %v1034_v46, %v418_v22  ;;  %v458_v28 = vadd.f32 %v1034_v46, %v419_v2  ;;  %v459_v11 = vadd.f32 %v1034_v46, %v420_v52 }
  0xc0   : > { %v484_v30 = vmax.f32 %v452_v29, 0.0  ;;  %v485_v58 = vmax.f32 %v453_v33, 0.0  ;;  %v486_v25 = vmax.f32 %v454_v24, 0.0  ;;  %v487_v32 = vmax.f32 %v455_v54, 0.0 }
  0xc1   : > { %v488_v4 = vmax.f32 %v456_v26, 0.0  ;;  %v489_v34 = vmax.f32 %v457_v56, 0.0  ;;  %v490_v31 = vmax.f32 %v458_v28, 0.0  ;;  %v491_v60 = vmax.f32 %v459_v11, 0.0 }
  0xc2   : > { %516 = vst [vmem:[%s1061_s26] sm:$0xff] %v484_v30  ;;  %517 = vst [vmem:[%s1061_s26 + $0x8] sm:$0xff] %v485_v58  ;;  %v382_v13 = vmul.f32 %v1022_v40, %v868_v37  ;;  %v383_v36 = vmul.f32 %v1022_v40, %v874_v41  ;;  %v384_v8 = vmul.f32 %v1022_v40, %v880_v45 }
  0xc3   : > { %518 = vst [vmem:[%s1061_s26 + $0x10] sm:$0xff] %v486_v25  ;;  %519 = vst [vmem:[%s1061_s26 + $0x18] sm:$0xff] %v487_v32  ;;  %v385_v38 = vmul.f32 %v1022_v40, %v886_v49  ;;  %v386_v10 = vmul.f32 %v1022_v40, %v892_v53  ;;  %v387_v42 = vmul.f32 %v1022_v40, %v898_v57 }
  0xc4   : > { %520 = vst [vmem:[%s1061_s26 + $0x20] sm:$0xff] %v488_v4  ;;  %521 = vst [vmem:[%s1061_s26 + $0x28] sm:$0xff] %v489_v34  ;;  %v388_v37 = vmul.f32 %v1022_v40, %v904_v61  ;;  %v389_v41 = vmul.f32 %v1022_v40, %v910_v63  ;;  %v421_v45 = vmul.f32 %v1024_v12, %v382_v13 }
  0xc5   : > { %522 = vst [vmem:[%s1061_s26 + $0x30] sm:$0xff] %v490_v31  ;;  %523 = vst [vmem:[%s1061_s26 + $0x38] sm:$0xff] %v491_v60  ;;  %v422_v49 = vmul.f32 %v1024_v12, %v383_v36  ;;  %v423_v14 = vmul.f32 %v1024_v12, %v384_v8  ;;  %v424_v44 = vmul.f32 %v1024_v12, %v385_v38 }
  0xc6   : > { %v425_v16 = vmul.f32 %v1024_v12, %v386_v10  ;;  %v426_v53 = vmul.f32 %v1024_v12, %v387_v42  ;;  %v427_v57 = vmul.f32 %v1024_v12, %v388_v37  ;;  %v428_v18 = vmul.f32 %v1024_v12, %v389_v41 }
  0xc7   : > { %v460_v61 = vadd.f32 %v1034_v46, %v421_v45  ;;  %v461_v63 = vadd.f32 %v1034_v46, %v422_v49  ;;  %v462_v48 = vadd.f32 %v1034_v46, %v423_v14  ;;  %v463_v15 = vadd.f32 %v1034_v46, %v424_v44 }
  0xc8   : > { %v464_v17 = vadd.f32 %v1034_v46, %v425_v16  ;;  %v465_v19 = vadd.f32 %v1034_v46, %v426_v53  ;;  %v466_v20 = vadd.f32 %v1034_v46, %v427_v57  ;;  %v467_v21 = vadd.f32 %v1034_v46, %v428_v18 }
  0xc9   : > { %v492_v50 = vmax.f32 %v460_v61, 0.0  ;;  %v493_v0 = vmax.f32 %v461_v63, 0.0  ;;  %v494_v22 = vmax.f32 %v462_v48, 0.0  ;;  %v495_v2 = vmax.f32 %v463_v15, 0.0 }
  0xca   : > { %v496_v52 = vmax.f32 %v464_v17, 0.0  ;;  %v497_v29 = vmax.f32 %v465_v19, 0.0  ;;  %v498_v33 = vmax.f32 %v466_v20, 0.0  ;;  %v499_v24 = vmax.f32 %v467_v21, 0.0 }
  0xcb   : > { %524 = vst [vmem:[%s1061_s26 + $0x40] sm:$0xff] %v492_v50  ;;  %525 = vst [vmem:[%s1061_s26 + $0x48] sm:$0xff] %v493_v0  ;;  %v390_v54 = vmul.f32 %v1022_v40, %v916_v5  ;;  %v391_v26 = vmul.f32 %v1022_v40, %v922_v9  ;;  %v392_v56 = vmul.f32 %v1022_v40, %v928_v23 }
  0xcc   : > { %526 = vst [vmem:[%s1061_s26 + $0x50] sm:$0xff] %v494_v22  ;;  %527 = vst [vmem:[%s1061_s26 + $0x58] sm:$0xff] %v495_v2  ;;  %v393_v28 = vmul.f32 %v1022_v40, %v934_v1  ;;  %v394_v11 = vmul.f32 %v1022_v40, %v940_v27  ;;  %v395_v30 = vmul.f32 %v1022_v40, %v946_v6 }
  0xcd   : > { %528 = vst [vmem:[%s1061_s26 + $0x60] sm:$0xff] %v496_v52  ;;  %529 = vst [vmem:[%s1061_s26 + $0x68] sm:$0xff] %v497_v29  ;;  %v396_v5 = vmul.f32 %v1022_v40, %v952_v35  ;;  %v397_v9 = vmul.f32 %v1022_v40, %v958_v39  ;;  %v429_v23 = vmul.f32 %v1024_v12, %v390_v54 }
  0xce   : > { %530 = vst [vmem:[%s1061_s26 + $0x70] sm:$0xff] %v498_v33  ;;  %531 = vst [vmem:[%s1061_s26 + $0x78] sm:$0xff] %v499_v24  ;;  %v430_v1 = vmul.f32 %v1024_v12, %v391_v26  ;;  %v431_v58 = vmul.f32 %v1024_v12, %v392_v56  ;;  %v432_v25 = vmul.f32 %v1024_v12, %v393_v28 }
  0xcf   : > { %v433_v32 = vmul.f32 %v1024_v12, %v394_v11  ;;  %v434_v27 = vmul.f32 %v1024_v12, %v395_v30  ;;  %v435_v6 = vmul.f32 %v1024_v12, %v396_v5  ;;  %v436_v4 = vmul.f32 %v1024_v12, %v397_v9 }
  0xd0   : > { %v468_v35 = vadd.f32 %v1034_v46, %v429_v23  ;;  %v469_v39 = vadd.f32 %v1034_v46, %v430_v1  ;;  %v470_v34 = vadd.f32 %v1034_v46, %v431_v58  ;;  %v471_v31 = vadd.f32 %v1034_v46, %v432_v25 }
  0xd1   : > { %v472_v60 = vadd.f32 %v1034_v46, %v433_v32  ;;  %v473_v13 = vadd.f32 %v1034_v46, %v434_v27  ;;  %v474_v36 = vadd.f32 %v1034_v46, %v435_v6  ;;  %v475_v8 = vadd.f32 %v1034_v46, %v436_v4 }
  0xd2   : > { %v500_v38 = vmax.f32 %v468_v35, 0.0  ;;  %v501_v10 = vmax.f32 %v469_v39, 0.0  ;;  %v502_v42 = vmax.f32 %v470_v34, 0.0  ;;  %v503_v37 = vmax.f32 %v471_v31, 0.0 }
  0xd3   : > { %v504_v41 = vmax.f32 %v472_v60, 0.0  ;;  %v505_v45 = vmax.f32 %v473_v13, 0.0  ;;  %v506_v49 = vmax.f32 %v474_v36, 0.0  ;;  %v507_v14 = vmax.f32 %v475_v8, 0.0 }
  0xd4   : > { %532 = vst [vmem:[%s1061_s26 + $0x80] sm:$0xff] %v500_v38  ;;  %533 = vst [vmem:[%s1061_s26 + $0x88] sm:$0xff] %v501_v10  ;;  %v398_v44 = vmul.f32 %v1022_v40, %v964_v43  ;;  %v399_v16 = vmul.f32 %v1022_v40, %v970_v47  ;;  %v400_v53 = vmul.f32 %v1022_v40, %v976_v51 }
  0xd5   : > { %534 = vst [vmem:[%s1061_s26 + $0x90] sm:$0xff] %v502_v42  ;;  %535 = vst [vmem:[%s1061_s26 + $0x98] sm:$0xff] %v503_v37  ;;  %v401_v57 = vmul.f32 %v1022_v40, %v982_v55  ;;  %v402_v18 = vmul.f32 %v1022_v40, %v988_v59  ;;  %v403_v61 = vmul.f32 %v1022_v40, %v994_v62 }
  0xd6   : > { %536 = vst [vmem:[%s1061_s26 + $0xa0] sm:$0xff] %v504_v41  ;;  %537 = vst [vmem:[%s1061_s26 + $0xa8] sm:$0xff] %v505_v45  ;;  %v404_v43 = vmul.f32 %v1022_v40, %v1000_v3  ;;  %v405_v47 = vmul.f32 %v1022_v40, %v1006_v7  ;;  %v437_v51 = vmul.f32 %v1024_v12, %v398_v44 }
  0xd7   : > { %538 = vst [vmem:[%s1061_s26 + $0xb0] sm:$0xff] %v506_v49  ;;  %539 = vst [vmem:[%s1061_s26 + $0xb8] sm:$0xff] %v507_v14  ;;  %v438_v55 = vmul.f32 %v1024_v12, %v399_v16  ;;  %v439_v63 = vmul.f32 %v1024_v12, %v400_v53  ;;  %v440_v48 = vmul.f32 %v1024_v12, %v401_v57 }
  0xd8   : > { %v441_v15 = vmul.f32 %v1024_v12, %v402_v18  ;;  %v442_v59 = vmul.f32 %v1024_v12, %v403_v61  ;;  %v443_v62 = vmul.f32 %v1024_v12, %v404_v43  ;;  %v444_v17 = vmul.f32 %v1024_v12, %v405_v47 }
  0xd9   : > { %v476_v3 = vadd.f32 %v1034_v46, %v437_v51  ;;  %v477_v7 = vadd.f32 %v1034_v46, %v438_v55  ;;  %v478_v40 = vadd.f32 %v1034_v46, %v439_v63  ;;  %v479_v19 = vadd.f32 %v1034_v46, %v440_v48 }
  0xda   : > { %v480_v20 = vadd.f32 %v1034_v46, %v441_v15  ;;  %v481_v21 = vadd.f32 %v1034_v46, %v442_v59  ;;  %v482_v12 = vadd.f32 %v1034_v46, %v443_v62  ;;  %v483_v50 = vadd.f32 %v1034_v46, %v444_v17 }
  0xdb   : > { %v508_v0 = vmax.f32 %v476_v3, 0.0  ;;  %v509_v22 = vmax.f32 %v477_v7, 0.0  ;;  %v510_v2 = vmax.f32 %v478_v40, 0.0  ;;  %v511_v52 = vmax.f32 %v479_v19, 0.0 }
  0xdc   : > { %v512_v29 = vmax.f32 %v480_v20, 0.0  ;;  %v513_v33 = vmax.f32 %v481_v21, 0.0  ;;  %v514_v24 = vmax.f32 %v482_v12, 0.0  ;;  %v515_v54 = vmax.f32 %v483_v50, 0.0 }
  0xdd   : > { %540 = vst [vmem:[%s1061_s26 + $0xc0] sm:$0xff] %v508_v0  ;;  %541 = vst [vmem:[%s1061_s26 + $0xc8] sm:$0xff] %v509_v22 }
  0xde   : > { %542 = vst [vmem:[%s1061_s26 + $0xd0] sm:$0xff] %v510_v2  ;;  %543 = vst [vmem:[%s1061_s26 + $0xd8] sm:$0xff] %v511_v52 }
  0xdf   : > { %544 = vst [vmem:[%s1061_s26 + $0xe0] sm:$0xff] %v512_v29  ;;  %545 = vst [vmem:[%s1061_s26 + $0xe8] sm:$0xff] %v513_v33 }
  0xe0   : > { %546 = vst [vmem:[%s1061_s26 + $0xf0] sm:$0xff] %v514_v24  ;;  %547 = vst [vmem:[%s1061_s26 + $0xf8] sm:$0xff] %v515_v54 }
  0xe1 PF: > { %s13_s12 = sadd.s32 1, %s652_s12  }
  0xe2   : > { %p10_p4 = scmp.ge.s32.totalorder %s13_s12, 4  }
  0xe4   :  { %12 = sbr.rel (!%p10_p4) target bundleno = 1 (0x1), region = 68 }

// kernel: resnet_block_adain.8
= control target key start
LH: loop header
LB: loop body
LE: loop exit
PB: predicated region body
PF: predicated region fallthrough
CT: control target
= control target key end

     0   :  { %s4012_s12 = smov 0   ;;  %s4014_s13 = smov 0   ;;  %s4812_s0 = inlined_call_operand.vmem [shape: bf16[512,1152], index: 0, kind: input, shape index: {}]   ;;  %s4813_s1 = inlined_call_operand.vmem [shape: bf16[1152,128], index: 1, kind: input, shape index: {}]   ;;  %s4814_s2 = inlined_call_operand.vmem [shape: f32[1,128], index: 2, kind: input, shape index: {}]   ;;  %s4815_s3 = inlined_call_operand.vmem [shape: f32[512,128], index: 3, kind: output, shape index: {}]  }
   0x1   :  { %s4016_s14 = smov 0  }
   0x2 LB: > { %s32_s15 = sadd.s32 1, %s3986_s13  ;;  %p2903_p0 = scmp.ge.s32.totalorder %s3990_s14, 1  ;;  %s3990_s14 = sphi %s4016_s14, %s13_s14   ;;  %s3986_s13 = sphi %s4014_s13, %s4817_s13   ;;  %s3982_s12 = sphi %s4012_s12, %s4816_s12  }
   0x3   : > { %p34_p1 = scmp.ge.s32.totalorder %s32_s15, 2  ;;  %p191_p2 = scmp.lt.s32.totalorder %s3990_s14, 3 }
   0x5   : > { %s4819_s15 = smov (%p34_p1, %s32_s15), 0  ;;  %p192_p3 = pnand %p2903_p0, %p191_p2 }
   0x6   : > { %v3688_v0 = vld [vmem:[%s4813_s1 + $0x40] sm:$0xff] (!%p192_p3)   ;;  %s2904_s18 = sshll.u32 (!%p192_p3), %s3982_s12, 5  ;;  %v3690_v2 = vld [vmem:[%s4813_s1 + $0x48] sm:$0xff] (!%p192_p3)   ;;  %v3692_v4 = vld [vmem:[%s4813_s1 + $0x50] sm:$0xff] (!%p192_p3)  }
   0x7   : > { %195 = sbr.rel (%p192_p3) target bundleno = 543 (0x21f), region = 32  ;;  %v3689_v1 = vld [vmem:[%s4813_s1] sm:$0xff] (!%p192_p3)   ;;  %3127 = vmatprep.subr.bf16.mxu0 (!%p192_p3), %v3688_v0  ;;  %3647 = vmatprep.subr.bf16.mxu1 (!%p192_p3), %v3688_v0  ;;  %p236_p4 = scmp.lt.s32.totalorder (!%p192_p3), %s2904_s18, 63  ;;  %v3691_v3 = vld [vmem:[%s4813_s1 + $0x8] sm:$0xff] (!%p192_p3)   ;;  %v3693_v5 = vld [vmem:[%s4813_s1 + $0x10] sm:$0xff] (!%p192_p3)  }
   0x8   : > { %3128 = vmatpush3.bf16.msra.mxu0 (!%p192_p3), %v3689_v1  ;;  %3655 = vmatpush3.bf16.msra.mxu1 (!%p192_p3), %v3689_v1  ;;  %v3694_v6 = vld [vmem:[%s4813_s1 + $0x58] sm:$0xff] (!%p192_p3)   ;;  %v3696_v8 = vld [vmem:[%s4813_s1 + $0x60] sm:$0xff] (!%p192_p3)   ;;  %v3698_v10 = vld [vmem:[%s4813_s1 + $0x68] sm:$0xff] (!%p192_p3)  }
   0x9   : > { %3129 = vmatprep.subr.bf16.mxu0 (!%p192_p3), %v3690_v2  ;;  %3648 = vmatprep.subr.bf16.mxu1 (!%p192_p3), %v3690_v2  ;;  %v3695_v7 = vld [vmem:[%s4813_s1 + $0x18] sm:$0xff] (!%p192_p3)   ;;  %v3697_v9 = vld [vmem:[%s4813_s1 + $0x20] sm:$0xff] (!%p192_p3)   ;;  %v3699_v13 = vld [vmem:[%s4813_s1 + $0x28] sm:$0xff] (!%p192_p3)  }
   0xa   : > { %v3700_v14 = vld [vmem:[%s4813_s1 + $0x70] sm:$0xff] (!%p192_p3)   ;;  %v3702_v16 = vld [vmem:[%s4813_s1 + $0x78] sm:$0xff] (!%p192_p3)   ;;  %v3710_v18 = vld [vmem:[%s4813_s1 + $0xc0] sm:$0xff] (!%p192_p3)  }
   0xb   : > { %v3701_v15 = vld [vmem:[%s4813_s1 + $0x30] sm:$0xff] (!%p192_p3)   ;;  %v3703_v17 = vld [vmem:[%s4813_s1 + $0x38] sm:$0xff] (!%p192_p3)   ;;  %v3713_v21 = vld [vmem:[%s4813_s1 + $0x140] sm:$0xff] (!%p192_p3)  }
   0xc   : > { %3130 = vmatpush3.bf16.msra.mxu0 (!%p192_p3), %v3691_v3  ;;  %3656 = vmatpush3.bf16.msra.mxu1 (!%p192_p3), %v3691_v3  ;;  %v3711_v22 = vld [vmem:[%s4813_s1 + $0x80] sm:$0xff] (!%p192_p3)   ;;  %v3712_v23 = vld [vmem:[%s4813_s1 + $0xc8] sm:$0xff] (!%p192_p3)   ;;  %v3722_v31 = vld [vmem:[%s4813_s1 + $0xd0] sm:$0xff] (!%p192_p3)  }
   0xd   : > { %3131 = vmatprep.subr.bf16.mxu0 (!%p192_p3), %v3692_v4  ;;  %3649 = vmatprep.subr.bf16.mxu1 (!%p192_p3), %v3692_v4  ;;  %v3715_v24 = vld [vmem:[%s4813_s1 + $0x100] sm:$0xff] (!%p192_p3)   ;;  %v3714_v27 = vld [vmem:[%s4813_s1 + $0x88] sm:$0xff] (!%p192_p3)   ;;  %v3723_v32 = vld [vmem:[%s4813_s1 + $0x90] sm:$0xff] (!%p192_p3)  }
   0xe   : > { %s4821_s18 = smov (!%p236_p4, %s2904_s18), 63  ;;  %v3733_v28 = vld [vmem:[%s4813_s1 + $0x148] sm:$0xff]   ;;  %v3724_v34 = vld [vmem:[%s4813_s1 + $0xd8] sm:$0xff]   ;;  %v3732_v40 = vld [vmem:[%s4813_s1 + $0xe0] sm:$0xff]  }
   0xf   : > { %s3663_s4 = smul.u32 36, %s4821_s18  ;;  %v3735_v33 = vld [vmem:[%s4813_s1 + $0x108] sm:$0xff]   ;;  %v3725_v37 = vld [vmem:[%s4813_s1 + $0x98] sm:$0xff]   ;;  %v3734_v41 = vld [vmem:[%s4813_s1 + $0xa0] sm:$0xff]  }
  0x10   : > { %3132 = vmatpush3.bf16.msra.mxu0 %v3693_v5  ;;  %3657 = vmatpush3.bf16.msra.mxu1 %v3693_v5  ;;  %v3736_v42 = vld [vmem:[%s4813_s1 + $0xe8] sm:$0xff]   ;;  %v3747_v43 = vld [vmem:[%s4813_s1 + $0x150] sm:$0xff]   ;;  %v3746_v52 = vld [vmem:[%s4813_s1 + $0xf8] sm:$0xff]  }
  0x11   : > { %3133 = vmatprep.subr.bf16.mxu0 %v3694_v6  ;;  %3650 = vmatprep.subr.bf16.mxu1 %v3694_v6  ;;  %s4063_s11 = scalar_lea.vmem %s4812_s0, %s3663_s4  ;;  %v3749_v46 = vld [vmem:[%s4813_s1 + $0x110] sm:$0xff]   ;;  %v3737_v47 = vld [vmem:[%s4813_s1 + $0xa8] sm:$0xff]   ;;  %v3764_v55 = vld [vmem:[%s4813_s1 + $0x158] sm:$0xff]  }
  0x12   : > { %v3706_v11 = vld [vmem:[%s4063_s11 + $0x4] ss:$36 sps:$4 sm:$0xff]   ;;  %v3716_v25 = vld [vmem:[%s4063_s11 + $0x4c] ss:$36 sps:$4 sm:$0xff]   ;;  %v3726_v35 = vld [vmem:[%s4063_s11 + $0x94] ss:$36 sps:$4 sm:$0xff]  }
  0x13   : > { %v3709_v12 = vld [vmem:[%s4063_s11 + $0x364] ss:$36 sps:$4 sm:$0xff]   ;;  %1840 = vmatprep.mubr.bf16.mxu0 %v3706_v11  ;;  %v3718_v26 = vld [vmem:[%s4063_s11 + $0x3ac] ss:$36 sps:$4 sm:$0xff]   ;;  %v3728_v36 = vld [vmem:[%s4063_s11 + $0x3f4] ss:$36 sps:$4 sm:$0xff]  }
  0x14   : > { %3134 = vmatpush3.bf16.msra.mxu0 %v3695_v7  ;;  %3658 = vmatpush3.bf16.msra.mxu1 %v3695_v7  ;;  %v3704_v19 = vld [vmem:[%s4063_s11] ss:$36 sps:$4 sm:$0xff]   ;;  %v3720_v29 = vld [vmem:[%s4063_s11 + $0x48] ss:$36 sps:$4 sm:$0xff]   ;;  %v3730_v38 = vld [vmem:[%s4063_s11 + $0x90] ss:$36 sps:$4 sm:$0xff]  }
  0x15   : > { %3135 = vmatprep.subr.bf16.mxu0 %v3696_v8  ;;  %3651 = vmatprep.subr.bf16.mxu1 %v3696_v8  ;;  %v3707_v20 = vld [vmem:[%s4063_s11 + $0x360] ss:$36 sps:$4 sm:$0xff]   ;;  %v3721_v30 = vld [vmem:[%s4063_s11 + $0x3a8] ss:$36 sps:$4 sm:$0xff]   ;;  %v3731_v39 = vld [vmem:[%s4063_s11 + $0x3f0] ss:$36 sps:$4 sm:$0xff]  }
  0x16   : > { %1936 = vmatprep.mubr.bf16.mxu1 %v3709_v12  ;;  %v3738_v44 = vld [vmem:[%s4063_s11 + $0xdc] ss:$36 sps:$4 sm:$0xff]   ;;  %v3744_v48 = vld [vmem:[%s4813_s1 + $0xf0] sm:$0xff]   ;;  %v3750_v53 = vld [vmem:[%s4063_s11 + $0x124] ss:$36 sps:$4 sm:$0xff]  }
  0x17   : > { %v3740_v45 = vld [vmem:[%s4063_s11 + $0x43c] ss:$36 sps:$4 sm:$0xff]   ;;  %v3745_v51 = vld [vmem:[%s4813_s1 + $0xb0] sm:$0xff]   ;;  %v3752_v58 = vld [vmem:[%s4063_s11 + $0x8] ss:$36 sps:$4 sm:$0xff]  }
  0x18   : > { %3136 = vmatpush3.bf16.msra.mxu0 %v3697_v9  ;;  %3659 = vmatpush3.bf16.msra.mxu1 %v3697_v9  ;;  %v3742_v49 = vld [vmem:[%s4063_s11 + $0xd8] ss:$36 sps:$4 sm:$0xff]   ;;  %v3754_v54 = vld [vmem:[%s4063_s11 + $0xc] ss:$36 sps:$4 sm:$0xff]   ;;  %v3755_v59 = vld [vmem:[%s4063_s11 + $0x120] ss:$36 sps:$4 sm:$0xff]  }
  0x19   : > { %3137 = vmatprep.subr.bf16.mxu0 %v3698_v10  ;;  %3652 = vmatprep.subr.bf16.mxu1 %v3698_v10  ;;  %v3743_v50 = vld [vmem:[%s4063_s11 + $0x438] ss:$36 sps:$4 sm:$0xff]   ;;  %v3756_v60 = vld [vmem:[%s4813_s1 + $0x1c0] sm:$0xff]   ;;  %v3758_v62 = vld [vmem:[%s4063_s11 + $0x16c] ss:$36 sps:$4 sm:$0xff]  }
  0x1a   : > { %v3765_v56 = vld [vmem:[%s4813_s1 + $0x118] sm:$0xff]   ;;  %v3757_v61 = vld [vmem:[%s4813_s1 + $0x180] sm:$0xff]   ;;  %v3772_v1 = vld [vmem:[%s4813_s1 + $0x1c8] sm:$0xff]  }
  0x1b   : > { %v3748_v57 = vld [vmem:[%s4813_s1 + $0xb8] sm:$0xff]   ;;  %v3774_v0 = vld [vmem:[%s4813_s1 + $0x160] sm:$0xff]   ;;  %v3773_v3 = vld [vmem:[%s4813_s1 + $0x188] sm:$0xff]  }
  0x1c   : > { %3138 = vmatpush3.bf16.msra.mxu0 %v3699_v13  ;;  %3660 = vmatpush3.bf16.msra.mxu1 %v3699_v13  ;;  %v3760_v63 = vld [vmem:[%s4063_s11 + $0x54] ss:$36 sps:$4 sm:$0xff]   ;;  %v3775_v2 = vld [vmem:[%s4813_s1 + $0x120] sm:$0xff]   ;;  %v3762_v4 = vld [vmem:[%s4063_s11 + $0x168] ss:$36 sps:$4 sm:$0xff]  }
  0x1d   : > { %3139 = vmatprep.subr.bf16.mxu0 %v3700_v14  ;;  %3653 = vmatprep.subr.bf16.mxu1 %v3700_v14  ;;  %v3763_v5 = vld [vmem:[%s4063_s11 + $0x50] ss:$36 sps:$4 sm:$0xff]   ;;  %v3768_v7 = vld [vmem:[%s4063_s11 + $0x9c] ss:$36 sps:$4 sm:$0xff]   ;;  %v3788_v8 = vld [vmem:[%s4813_s1 + $0x168] sm:$0xff]  }
  0x1e   : > { %v3766_v6 = vld [vmem:[%s4063_s11 + $0x1b4] ss:$36 sps:$4 sm:$0xff]   ;;  %v3790_v10 = vld [vmem:[%s4813_s1 + $0x128] sm:$0xff]   ;;  %v3776_v14 = vld [vmem:[%s4063_s11 + $0x1fc] ss:$36 sps:$4 sm:$0xff]  }
  0x1f   : > { %v3789_v9 = vld [vmem:[%s4813_s1 + $0x1d0] sm:$0xff]   ;;  %v3771_v13 = vld [vmem:[%s4063_s11 + $0x98] ss:$36 sps:$4 sm:$0xff]  }
  0x20   : > { %3140 = vmatpush3.bf16.msra.mxu0 %v3701_v15  ;;  %3661 = vmatpush3.bf16.msra.mxu1 %v3701_v15  ;;  %v3791_v11 = vld [vmem:[%s4813_s1 + $0x190] sm:$0xff]  }
  0x21   : > { %3141 = vmatprep.subr.bf16.mxu0 %v3702_v16  ;;  %3654 = vmatprep.subr.bf16.mxu1 %v3702_v16  ;;  %v3770_v12 = vld [vmem:[%s4063_s11 + $0x1b0] ss:$36 sps:$4 sm:$0xff]  }
  0x22   : > { %v3798_v15 = vld [vmem:[%s4813_s1 + $0x170] sm:$0xff]  }
  0x23   : > { %v3799_v16 = vld [vmem:[%s4813_s1 + $0x130] sm:$0xff]  }
  0x24   : > { %3142 = vmatpush3.bf16.msra.mxu0 %v3703_v17  ;;  %3662 = vmatpush3.bf16.msra.mxu1 %v3703_v17  ;;  %v3778_v17 = vld [vmem:[%s4063_s11 + $0xe4] ss:$36 sps:$4 sm:$0xff]  }
  0x25   : > { %3239 = vmatprep.subr.bf16.mxu1 %v3710_v18  ;;  %3351 = vmatprep.subr.bf16.mxu0 %v3713_v21  ;;  %v3806_v18 = vld [vmem:[%s4813_s1 + $0x1d8] sm:$0xff]   ;;  %v3781_v21 = vld [vmem:[%s4063_s11 + $0xe0] ss:$36 sps:$4 sm:$0xff]  }
  0x27   : > { %1841 = vmatmul.mubr.bf16.vlgmr.msra.gmra.mrb[0].mxu0 %v3704_v19  ;;  %1937 = vmatmul.mubr.bf16.vlgmr.msra.gmra.mrb[0].mxu1 %v3707_v20  ;;  %v3807_v19 = vld [vmem:[%s4813_s1 + $0x198] sm:$0xff]  }
  0x28   : > { %3240 = vmatpush3.bf16.msra.mxu1 %v3711_v22  ;;  %3352 = vmatpush3.bf16.msra.mxu0 %v3715_v24  ;;  %v3780_v20 = vld [vmem:[%s4063_s11 + $0x1f8] ss:$36 sps:$4 sm:$0xff]   ;;  %v3782_v22 = vld [vmem:[%s4063_s11 + $0x244] ss:$36 sps:$4 sm:$0xff]  }
  0x29   : > { %3241 = vmatprep.subr.bf16.mxu1 %v3712_v23  ;;  %1848 = vmatprep.mubr.bf16.mxu0 %v3716_v25  ;;  %v3784_v23 = vld [vmem:[%s4063_s11 + $0x12c] ss:$36 sps:$4 sm:$0xff]   ;;  %v3814_v24 = vld [vmem:[%s4813_s1 + $0x178] sm:$0xff]  }
  0x2a   : > { %1944 = vmatprep.mubr.bf16.mxu1 %v3718_v26  ;;  %3353 = vmatprep.subr.bf16.mxu0 %v3733_v28  ;;  %v3815_v25 = vld [vmem:[%s4813_s1 + $0x138] sm:$0xff]   ;;  %v3822_v26 = vld [vmem:[%s4813_s1 + $0x1e0] sm:$0xff]  }
  0x2b   : > { %v3823_v28 = vld [vmem:[%s4813_s1 + $0x1a0] sm:$0xff]  }
  0x2c   : > { %3242 = vmatpush3.bf16.msra.mxu1 %v3714_v27  ;;  %3354 = vmatpush3.bf16.msra.mxu0 %v3735_v33  ;;  %v3786_v27 = vld [vmem:[%s4063_s11 + $0x240] ss:$36 sps:$4 sm:$0xff]   ;;  %v3837_v33 = vld [vmem:[%s4813_s1 + $0x1e8] sm:$0xff]  }
  0x2d   : > { %3243 = vmatprep.subr.bf16.mxu1 %v3722_v31  ;;  %3355 = vmatprep.subr.bf16.mxu0 %v3747_v43  ;;  %v3792_v31 = vld [vmem:[%s4063_s11 + $0x28c] ss:$36 sps:$4 sm:$0xff]   ;;  %v3808_v43 = vld [vmem:[%s4063_s11 + $0x31c] ss:$36 sps:$4 sm:$0xff]  }
  0x2f   : > { %1849 = vmatmul.mubr.bf16.gmra.mrb[4].mxu0 %v3720_v29  ;;  %1945 = vmatmul.mubr.bf16.gmra.mrb[4].mxu1 %v3721_v30  ;;  %v3824_v29 = vld [vmem:[%s4813_s1 + $0x200] sm:$0xff]   ;;  %v3787_v30 = vld [vmem:[%s4063_s11 + $0x128] ss:$36 sps:$4 sm:$0xff]  }
  0x30   : > { %3244 = vmatpush3.bf16.msra.mxu1 %v3723_v32  ;;  %1856 = vmatprep.mubr.bf16.mxu0 %v3726_v35  ;;  %v3794_v32 = vld [vmem:[%s4063_s11 + $0x174] ss:$36 sps:$4 sm:$0xff]   ;;  %v3838_v35 = vld [vmem:[%s4813_s1 + $0x1a8] sm:$0xff]  }
  0x31   : > { %3245 = vmatprep.subr.bf16.mxu1 %v3724_v34  ;;  %1952 = vmatprep.mubr.bf16.mxu1 %v3728_v36  ;;  %v3796_v34 = vld [vmem:[%s4063_s11 + $0x288] ss:$36 sps:$4 sm:$0xff]   ;;  %v3797_v36 = vld [vmem:[%s4063_s11 + $0x170] ss:$36 sps:$4 sm:$0xff]  }
  0x32   : > { %3356 = vmatpush3.bf16.msra.mxu0 %v3749_v46  ;;  %v3813_v46 = vld [vmem:[%s4063_s11 + $0x200] ss:$36 sps:$4 sm:$0xff]  }
  0x33   : > { %3357 = vmatprep.subr.bf16.mxu0 %v3764_v55  ;;  %v3839_v55 = vld [vmem:[%s4813_s1 + $0x208] sm:$0xff]  }
  0x34   : > { %3246 = vmatpush3.bf16.msra.mxu1 %v3725_v37  ;;  %v3800_v37 = vld [vmem:[%s4063_s11 + $0x2d4] ss:$36 sps:$4 sm:$0xff]  }
  0x35   : > { %3247 = vmatprep.subr.bf16.mxu1 %v3732_v40  ;;  %v3805_v40 = vld [vmem:[%s4063_s11 + $0x1b8] ss:$36 sps:$4 sm:$0xff]  }
  0x36   : > { %3358 = vmatpush3.bf16.msra.mxu0 %v3765_v56  ;;  %v3854_v56 = vld [vmem:[%s4813_s1 + $0x210] sm:$0xff]  }
  0x37   : > { %1857 = vmatmul.mubr.bf16.gmra.mrb[8].mxu0 %v3730_v38  ;;  %1953 = vmatmul.mubr.bf16.gmra.mrb[8].mxu1 %v3731_v39  ;;  %v3802_v38 = vld [vmem:[%s4063_s11 + $0x1bc] ss:$36 sps:$4 sm:$0xff]   ;;  %v3804_v39 = vld [vmem:[%s4063_s11 + $0x2d0] ss:$36 sps:$4 sm:$0xff]  }
  0x38   : > { %3248 = vmatpush3.bf16.msra.mxu1 %v3734_v41  ;;  %1864 = vmatprep.mubr.bf16.mxu0 %v3738_v44  ;;  %v3852_v41 = vld [vmem:[%s4813_s1 + $0x1f0] sm:$0xff]   ;;  %v3810_v44 = vld [vmem:[%s4063_s11 + $0x204] ss:$36 sps:$4 sm:$0xff]  }
  0x39   : > { %3249 = vmatprep.subr.bf16.mxu1 %v3736_v42  ;;  %1960 = vmatprep.mubr.bf16.mxu1 %v3740_v45  ;;  %v3853_v42 = vld [vmem:[%s4813_s1 + $0x1b0] sm:$0xff]   ;;  %v3812_v45 = vld [vmem:[%s4063_s11 + $0x318] ss:$36 sps:$4 sm:$0xff]  }
  0x3a   : > { %3359 = vmatprep.subr.bf16.mxu0 %v3774_v0  ;;  %v3836_v0 = vld [vmem:[%s4063_s11 + $0xa0] ss:$36 sps:$4 sm:$0xff]  }
  0x3b   : > { %3360 = vmatpush3.bf16.msra.mxu0 %v3775_v2  ;;  %v3842_v2 = vld [vmem:[%s4063_s11 + $0xec] ss:$36 sps:$4 sm:$0xff]  }
  0x3c   : > { %3250 = vmatpush3.bf16.msra.mxu1 %v3737_v47  ;;  %3361 = vmatprep.subr.bf16.mxu0 %v3788_v8  ;;  %v3867_v47 = vld [vmem:[%s4813_s1 + $0x1f8] sm:$0xff]  }
  0x3d   : > { %3251 = vmatprep.subr.bf16.mxu1 %v3744_v48  ;;  %v3868_v48 = vld [vmem:[%s4813_s1 + $0x1b8] sm:$0xff]  }
  0x3e   : > { %v3848_v8 = vld [vmem:[%s4063_s11 + $0x134] ss:$36 sps:$4 sm:$0xff]  }
  0x3f   : > { %1865 = vmatmul.mubr.bf16.gmra.mrb[12].mxu0 %v3742_v49  ;;  %1961 = vmatmul.mubr.bf16.gmra.mrb[12].mxu1 %v3743_v50  ;;  %v3816_v49 = vld [vmem:[%s4063_s11 + $0x24c] ss:$36 sps:$4 sm:$0xff]   ;;  %v3820_v50 = vld [vmem:[%s4063_s11 + $0x14] ss:$36 sps:$4 sm:$0xff]  }
  0x40   : > { %3252 = vmatpush3.bf16.msra.mxu1 %v3745_v51  ;;  %1872 = vmatprep.mubr.bf16.mxu0 %v3750_v53  ;;  %v3818_v51 = vld [vmem:[%s4063_s11 + $0x10] ss:$36 sps:$4 sm:$0xff]  }
  0x41   : > { %3253 = vmatprep.subr.bf16.mxu1 %v3746_v52  ;;  %2001 = vmatprep.mubr.bf16.mxu1 %v3754_v54  ;;  %v3821_v52 = vld [vmem:[%s4063_s11 + $0x248] ss:$36 sps:$4 sm:$0xff]   ;;  %v3825_v53 = vld [vmem:[%s4063_s11 + $0x294] ss:$36 sps:$4 sm:$0xff]   ;;  %v3827_v54 = vld [vmem:[%s4063_s11 + $0x5c] ss:$36 sps:$4 sm:$0xff]  }
  0x42   : > { %3362 = vmatpush3.bf16.msra.mxu0 %v3790_v10  ;;  %v3850_v10 = vld [vmem:[%s4063_s11 + $0x368] ss:$36 sps:$4 sm:$0xff]  }
  0x43   : > { %3363 = vmatprep.subr.bf16.mxu0 %v3798_v15  ;;  %v3860_v15 = vld [vmem:[%s4063_s11 + $0x178] ss:$36 sps:$4 sm:$0xff]  }
  0x44   : > { %3254 = vmatpush3.bf16.msra.mxu1 %v3748_v57  ;;  %v3829_v57 = vld [vmem:[%s4063_s11 + $0x290] ss:$36 sps:$4 sm:$0xff]  }
  0x45   : > { %3463 = vmatprep.subr.bf16.mxu1 %v3756_v60  ;;  %v3833_v60 = vld [vmem:[%s4063_s11 + $0xa4] ss:$36 sps:$4 sm:$0xff]  }
  0x46   : > { %3364 = vmatpush3.bf16.msra.mxu0 %v3799_v16  ;;  %v3861_v16 = vld [vmem:[%s4063_s11 + $0x3fc] ss:$36 sps:$4 sm:$0xff]  }
  0x47   : > { %1873 = vmatmul.mubr.bf16.gmra.mrb[16].mxu0 %v3755_v59  ;;  %2002 = vmatmul.mubr.bf16.vlgmr.msra.gmra.mrb[16].mxu1 %v3752_v58  ;;  %v3830_v58 = vld [vmem:[%s4063_s11 + $0x58] ss:$36 sps:$4 sm:$0xff]  }
  0x48   : > { %3464 = vmatpush3.bf16.msra.mxu1 %v3757_v61  ;;  %1880 = vmatprep.mubr.bf16.mxu0 %v3758_v62  ;;  %v3831_v59 = vld [vmem:[%s4063_s11 + $0x2dc] ss:$36 sps:$4 sm:$0xff]  }
  0x49   : > { %2009 = vmatprep.mubr.bf16.mxu1 %v3760_v63  ;;  %3465 = vmatprep.subr.bf16.mxu1 %v3772_v1  ;;  %v3869_v61 = vld [vmem:[%s4813_s1 + $0x218] sm:$0xff]   ;;  %v3882_v62 = vld [vmem:[%s4813_s1 + $0x220] sm:$0xff]  }
  0x4a   : > { %3365 = vmatprep.subr.bf16.mxu0 %v3814_v24  ;;  %v3835_v63 = vld [vmem:[%s4063_s11 + $0x2d8] ss:$36 sps:$4 sm:$0xff]   ;;  %v3840_v1 = vld [vmem:[%s4063_s11 + $0x324] ss:$36 sps:$4 sm:$0xff]  }
  0x4b   : > { %3366 = vmatpush3.bf16.msra.mxu0 %v3815_v25  ;;  %v3876_v24 = vld [vmem:[%s4063_s11 + $0x254] ss:$36 sps:$4 sm:$0xff]   ;;  %v3880_v25 = vld [vmem:[%s4063_s11 + $0x1c] ss:$36 sps:$4 sm:$0xff]  }
  0x4c   : > { %3466 = vmatpush3.bf16.msra.mxu1 %v3773_v3  ;;  %3599 = vmatprep.subr.bf16.mxu0 %v3824_v29  ;;  %v3895_v3 = vld [vmem:[%s4813_s1 + $0x228] sm:$0xff]  }
  0x4d   : > { %3467 = vmatprep.subr.bf16.mxu1 %v3789_v9  ;;  %v3921_v9 = vld [vmem:[%s4813_s1 + $0x238] sm:$0xff]  }
  0x4f   : > { %1881 = vmatmul.mubr.bf16.gmra.mrb[20].mxu0 %v3762_v4  ;;  %2010 = vmatmul.mubr.bf16.gmra.mrb[20].mxu1 %v3763_v5  ;;  %v3844_v4 = vld [vmem:[%s4063_s11 + $0x320] ss:$36 sps:$4 sm:$0xff]   ;;  %v3845_v5 = vld [vmem:[%s4063_s11 + $0xe8] ss:$36 sps:$4 sm:$0xff]  }
  0x50   : > { %1888 = vmatprep.mubr.bf16.mxu0 %v3766_v6  ;;  %2017 = vmatprep.mubr.bf16.mxu1 %v3768_v7  ;;  %v3908_v6 = vld [vmem:[%s4813_s1 + $0x230] sm:$0xff]  }
  0x51   : > { %3468 = vmatpush3.bf16.msra.mxu1 %v3791_v11  ;;  %v3846_v7 = vld [vmem:[%s4063_s11 + $0x36c] ss:$36 sps:$4 sm:$0xff]  }
  0x52   : > { %3469 = vmatprep.subr.bf16.mxu1 %v3806_v18  ;;  %v3851_v11 = vld [vmem:[%s4063_s11 + $0x130] ss:$36 sps:$4 sm:$0xff]   ;;  %v3865_v18 = vld [vmem:[%s4063_s11 + $0x3f8] ss:$36 sps:$4 sm:$0xff]  }
  0x55   : > { %3470 = vmatpush3.bf16.msra.mxu1 %v3807_v19  ;;  %v3866_v19 = vld [vmem:[%s4063_s11 + $0x1c0] ss:$36 sps:$4 sm:$0xff]  }
  0x56   : > { %3471 = vmatprep.subr.bf16.mxu1 %v3822_v26  ;;  %v3878_v26 = vld [vmem:[%s4063_s11 + $0x18] ss:$36 sps:$4 sm:$0xff]  }
  0x57   : > { %1889 = vmatmul.mubr.bf16.gmra.mrb[24].mxu0 %v3770_v12  ;;  %2018 = vmatmul.mubr.bf16.gmra.mrb[24].mxu1 %v3771_v13  ;;  %v3855_v12 = vld [vmem:[%s4063_s11 + $0x3b4] ss:$36 sps:$4 sm:$0xff]   ;;  %v3857_v13 = vld [vmem:[%s4063_s11 + $0x17c] ss:$36 sps:$4 sm:$0xff]  }
  0x58   : > { %1896 = vmatprep.mubr.bf16.mxu0 %v3776_v14  ;;  %2025 = vmatprep.mubr.bf16.mxu1 %v3778_v17  ;;  %v3859_v14 = vld [vmem:[%s4063_s11 + $0x3b0] ss:$36 sps:$4 sm:$0xff]   ;;  %v3863_v17 = vld [vmem:[%s4063_s11 + $0x1c4] ss:$36 sps:$4 sm:$0xff]  }
  0x59   : > { %3472 = vmatpush3.bf16.msra.mxu1 %v3823_v28  ;;  %v3883_v28 = vld [vmem:[%s4063_s11 + $0x29c] ss:$36 sps:$4 sm:$0xff]  }
  0x5a   : > { %3473 = vmatprep.subr.bf16.mxu1 %v3837_v33  ;;  %v3891_v33 = vld [vmem:[%s4063_s11 + $0xac] ss:$36 sps:$4 sm:$0xff]  }
  0x5d   : > { %3474 = vmatpush3.bf16.msra.mxu1 %v3838_v35  ;;  %v3894_v35 = vld [vmem:[%s4063_s11 + $0xa8] ss:$36 sps:$4 sm:$0xff]  }
  0x5e   : > { %3475 = vmatprep.subr.bf16.mxu1 %v3852_v41  ;;  %v3904_v41 = vld [vmem:[%s4063_s11 + $0x13c] ss:$36 sps:$4 sm:$0xff]  }
  0x5f   : > { %1897 = vmatmul.mubr.bf16.gmra.mrb[28].mxu0 %v3780_v20  ;;  %2026 = vmatmul.mubr.bf16.gmra.mrb[28].mxu1 %v3781_v21  ;;  %v3870_v20 = vld [vmem:[%s4063_s11 + $0x444] ss:$36 sps:$4 sm:$0xff]   ;;  %v3872_v21 = vld [vmem:[%s4063_s11 + $0x20c] ss:$36 sps:$4 sm:$0xff]  }
  0x60   : > { %1904 = vmatprep.mubr.bf16.mxu0 %v3782_v22  ;;  %2033 = vmatprep.mubr.bf16.mxu1 %v3784_v23  ;;  %v3874_v22 = vld [vmem:[%s4063_s11 + $0x440] ss:$36 sps:$4 sm:$0xff]   ;;  %v3875_v23 = vld [vmem:[%s4063_s11 + $0x208] ss:$36 sps:$4 sm:$0xff]  }
  0x61   : > { %3476 = vmatpush3.bf16.msra.mxu1 %v3853_v42  ;;  %v3906_v42 = vld [vmem:[%s4063_s11 + $0x370] ss:$36 sps:$4 sm:$0xff]  }
  0x62   : > { %3477 = vmatprep.subr.bf16.mxu1 %v3867_v47  ;;  %v3914_v47 = vld [vmem:[%s4063_s11 + $0x180] ss:$36 sps:$4 sm:$0xff]  }
  0x65   : > { %3478 = vmatpush3.bf16.msra.mxu1 %v3868_v48  ;;  %v3915_v48 = vld [vmem:[%s4063_s11 + $0x404] ss:$36 sps:$4 sm:$0xff]  }
  0x67   : > { %1905 = vmatmul.mubr.bf16.gmra.mrb[32].mxu0 %v3786_v27  ;;  %2034 = vmatmul.mubr.bf16.gmra.mrb[32].mxu1 %v3787_v30  ;;  %v3881_v27 = vld [vmem:[%s4063_s11 + $0x250] ss:$36 sps:$4 sm:$0xff]   ;;  %v3887_v30 = vld [vmem:[%s4063_s11 + $0x298] ss:$36 sps:$4 sm:$0xff]  }
  0x68   : > { %1912 = vmatprep.mubr.bf16.mxu0 %v3792_v31  ;;  %2041 = vmatprep.mubr.bf16.mxu1 %v3794_v32  ;;  %v3888_v31 = vld [vmem:[%s4063_s11 + $0x60] ss:$36 sps:$4 sm:$0xff]  }
  0x69   : > { %v3889_v32 = vld [vmem:[%s4063_s11 + $0x2e4] ss:$36 sps:$4 sm:$0xff]  }
  0x6f   : > { %1913 = vmatmul.mubr.bf16.gmra.mrb[36].mxu0 %v3796_v34  ;;  %2042 = vmatmul.mubr.bf16.gmra.mrb[36].mxu1 %v3797_v36  ;;  %v3893_v34 = vld [vmem:[%s4063_s11 + $0x2e0] ss:$36 sps:$4 sm:$0xff]   ;;  %v3896_v36 = vld [vmem:[%s4063_s11 + $0x32c] ss:$36 sps:$4 sm:$0xff]  }
  0x70   : > { %1920 = vmatprep.mubr.bf16.mxu0 %v3800_v37  ;;  %2049 = vmatprep.mubr.bf16.mxu1 %v3802_v38  ;;  %v3898_v37 = vld [vmem:[%s4063_s11 + $0xf4] ss:$36 sps:$4 sm:$0xff]   ;;  %v3900_v38 = vld [vmem:[%s4063_s11 + $0x328] ss:$36 sps:$4 sm:$0xff]  }
  0x77   : > { %1921 = vmatmul.mubr.bf16.gmra.mrb[40].mxu0 %v3804_v39  ;;  %2050 = vmatmul.mubr.bf16.gmra.mrb[40].mxu1 %v3805_v40  ;;  %v3901_v39 = vld [vmem:[%s4063_s11 + $0xf0] ss:$36 sps:$4 sm:$0xff]  }
  0x78   : > { %1928 = vmatprep.mubr.bf16.mxu0 %v3808_v43  ;;  %2057 = vmatprep.mubr.bf16.mxu1 %v3810_v44  ;;  %v3902_v40 = vld [vmem:[%s4063_s11 + $0x374] ss:$36 sps:$4 sm:$0xff]   ;;  %v3909_v44 = vld [vmem:[%s4063_s11 + $0x3bc] ss:$36 sps:$4 sm:$0xff]  }
  0x79   : > { %v3907_v43 = vld [vmem:[%s4063_s11 + $0x138] ss:$36 sps:$4 sm:$0xff]  }
  0x7f   : > { %1929 = vmatmul.mubr.bf16.gmra.mrb[44].mxu0 %v3812_v45  ;;  %2058 = vmatmul.mubr.bf16.gmra.mrb[44].mxu1 %v3813_v46  ;;  %v3911_v45 = vld [vmem:[%s4063_s11 + $0x184] ss:$36 sps:$4 sm:$0xff]   ;;  %v3913_v46 = vld [vmem:[%s4063_s11 + $0x3b8] ss:$36 sps:$4 sm:$0xff]  }
  0x80   : > { %2065 = vmatprep.mubr.bf16.mxu1 %v3816_v49  ;;  %2162 = vmatprep.mubr.bf16.mxu0 %v3820_v50  ;;  %v3917_v49 = vld [vmem:[%s4063_s11 + $0x1cc] ss:$36 sps:$4 sm:$0xff]   ;;  %v3919_v50 = vld [vmem:[%s4063_s11 + $0x400] ss:$36 sps:$4 sm:$0xff]  }
  0x87   : > { %2066 = vmatmul.mubr.bf16.gmra.mrb[48].mxu1 %v3821_v52  ;;  %2163 = vmatmul.mubr.bf16.vlgmr.msra.gmra.mrb[48].mxu0 %v3818_v51  ;;  %v3920_v51 = vld [vmem:[%s4063_s11 + $0x1c8] ss:$36 sps:$4 sm:$0xff]  }
  0x88   : > { %3600 = vmatpush3.bf16.msra.mxu0 %v3824_v29  ;;  %2073 = vmatprep.mubr.bf16.mxu1 %v3825_v53  ;;  %v3885_v29 = vld [vmem:[%s4063_s11 + $0x64] ss:$36 sps:$4 sm:$0xff]   ;;  %v3922_v52 = vld [vmem:[%s4063_s11 + $0x44c] ss:$36 sps:$4 sm:$0xff]   ;;  %v3924_v53 = vld [vmem:[%s4063_s11 + $0x214] ss:$36 sps:$4 sm:$0xff]  }
  0x89   : > { %2170 = vmatprep.mubr.bf16.mxu0 %v3827_v54  ;;  %3601 = vmatprep.subr.bf16.mxu0 %v3839_v55 }
  0x8c   : > { %3602 = vmatpush3.bf16.msra.mxu0 %v3839_v55 }
  0x8d   : > { %3603 = vmatprep.subr.bf16.mxu0 %v3854_v56 }
  0x8f   : > { %2074 = vmatmul.mubr.bf16.gmra.mrb[52].mxu1 %v3829_v57  ;;  %2171 = vmatmul.mubr.bf16.gmra.mrb[52].mxu0 %v3830_v58  ;;  %v3926_v58 = vld [vmem:[%s4063_s11 + $0x448] ss:$36 sps:$4 sm:$0xff]  }
  0x90   : > { %2081 = vmatprep.mubr.bf16.mxu1 %v3831_v59  ;;  %2178 = vmatprep.mubr.bf16.mxu0 %v3833_v60  ;;  %v3927_v59 = vld [vmem:[%s4063_s11 + $0x210] ss:$36 sps:$4 sm:$0xff]  }
  0x91   : > { %3604 = vmatpush3.bf16.msra.mxu0 %v3854_v56 }
  0x92   : > { %3605 = vmatprep.subr.bf16.mxu0 %v3869_v61 }
  0x95   : > { %3606 = vmatpush3.bf16.msra.mxu0 %v3869_v61 }
  0x96   : > { %3607 = vmatprep.subr.bf16.mxu0 %v3882_v62 }
  0x97   : > { %2082 = vmatmul.mubr.bf16.gmra.mrb[56].mxu1 %v3835_v63  ;;  %2179 = vmatmul.mubr.bf16.gmra.mrb[56].mxu0 %v3836_v0  ;;  %v3928_v0 = vld [vmem:[%s4063_s11 + $0x25c] ss:$36 sps:$4 sm:$0xff]  }
  0x98   : > { %2089 = vmatprep.mubr.bf16.mxu1 %v3840_v1  ;;  %2186 = vmatprep.mubr.bf16.mxu0 %v3842_v2  ;;  %v3930_v1 = vld [vmem:[%s4063_s11 + $0x20] ss:$36 sps:$4 sm:$0xff]  }
  0x99   : > { %3608 = vmatpush3.bf16.msra.mxu0 %v3882_v62 }
  0x9a   : > { %3609 = vmatprep.subr.bf16.mxu0 %v3895_v3 }
  0x9d   : > { %3610 = vmatpush3.bf16.msra.mxu0 %v3895_v3 }
  0x9e   : > { %3611 = vmatprep.subr.bf16.mxu0 %v3908_v6 }
  0x9f   : > { %2090 = vmatmul.mubr.bf16.gmra.mrb[60].mxu1 %v3844_v4  ;;  %2187 = vmatmul.mubr.bf16.gmra.mrb[60].mxu0 %v3845_v5 }
  0xa0   : > { %2097 = vmatprep.mubr.bf16.mxu1 %v3846_v7  ;;  %2194 = vmatprep.mubr.bf16.mxu0 %v3848_v8 }
  0xa1   : > { %3612 = vmatpush3.bf16.msra.mxu0 %v3908_v6 }
  0xa2   : > { %3613 = vmatprep.subr.bf16.mxu0 %v3921_v9 }
  0xa5   : > { %3614 = vmatpush3.bf16.msra.mxu0 %v3921_v9 }
  0xa7   : > { %2098 = vmatmul.mubr.bf16.gmra.mrb[64].mxu1 %v3850_v10  ;;  %2195 = vmatmul.mubr.bf16.gmra.mrb[64].mxu0 %v3851_v11  ;;  %v3931_v10 = vld [vmem:[%s4063_s11 + $0x258] ss:$36 sps:$4 sm:$0xff]   ;;  %v3932_v11 = vld [vmem:[%s4063_s11 + $0x68] ss:$36 sps:$4 sm:$0xff]  }
  0xa8   : > { %2105 = vmatprep.mubr.bf16.mxu1 %v3855_v12  ;;  %2202 = vmatprep.mubr.bf16.mxu0 %v3857_v13 }
  0xaf   : > { %2106 = vmatmul.mubr.bf16.gmra.mrb[68].mxu1 %v3859_v14  ;;  %2203 = vmatmul.mubr.bf16.gmra.mrb[68].mxu0 %v3860_v15 }
  0xb0   : > { %2113 = vmatprep.mubr.bf16.mxu1 %v3861_v16  ;;  %2210 = vmatprep.mubr.bf16.mxu0 %v3863_v17  ;;  %v3933_v16 = vld [vmem:[%s4063_s11 + $0x2a4] ss:$36 sps:$4 sm:$0xff]   ;;  %v3935_v17 = vld [vmem:[%s4063_s11 + $0xb0] ss:$36 sps:$4 sm:$0xff]  }
  0xb7   : > { %2114 = vmatmul.mubr.bf16.gmra.mrb[72].mxu1 %v3865_v18  ;;  %2211 = vmatmul.mubr.bf16.gmra.mrb[72].mxu0 %v3866_v19 }
  0xb8   : > { %2121 = vmatprep.mubr.bf16.mxu1 %v3870_v20  ;;  %2218 = vmatprep.mubr.bf16.mxu0 %v3872_v21 }
  0xbf   : > { %2122 = vmatmul.mubr.bf16.gmra.mrb[76].mxu1 %v3874_v22  ;;  %2219 = vmatmul.mubr.bf16.gmra.mrb[76].mxu0 %v3875_v23 }
  0xc0   : > { %2226 = vmatprep.mubr.bf16.mxu0 %v3876_v24  ;;  %2323 = vmatprep.mubr.bf16.mxu1 %v3880_v25 }
  0xc7   : > { %2227 = vmatmul.mubr.bf16.gmra.mrb[80].mxu0 %v3881_v27  ;;  %2324 = vmatmul.mubr.bf16.vlgmr.msra.gmra.mrb[80].mxu1 %v3878_v26  ;;  %v3936_v26 = vld [vmem:[%s4063_s11 + $0x2a0] ss:$36 sps:$4 sm:$0xff]   ;;  %v3937_v27 = vld [vmem:[%s4063_s11 + $0xf8] ss:$36 sps:$4 sm:$0xff]  }
  0xc8   : > { %2234 = vmatprep.mubr.bf16.mxu0 %v3883_v28  ;;  %2331 = vmatprep.mubr.bf16.mxu1 %v3885_v29 }
  0xcf   : > { %2235 = vmatmul.mubr.bf16.gmra.mrb[84].mxu0 %v3887_v30  ;;  %2332 = vmatmul.mubr.bf16.gmra.mrb[84].mxu1 %v3888_v31 }
  0xd0   : > { %2242 = vmatprep.mubr.bf16.mxu0 %v3889_v32  ;;  %2339 = vmatprep.mubr.bf16.mxu1 %v3891_v33  ;;  %v3938_v32 = vld [vmem:[%s4063_s11 + $0x2ec] ss:$36 sps:$4 sm:$0xff]   ;;  %v3940_v33 = vld [vmem:[%s4063_s11 + $0x140] ss:$36 sps:$4 sm:$0xff]  }
  0xd7   : > { %2243 = vmatmul.mubr.bf16.gmra.mrb[88].mxu0 %v3893_v34  ;;  %2340 = vmatmul.mubr.bf16.gmra.mrb[88].mxu1 %v3894_v35 }
  0xd8   : > { %2250 = vmatprep.mubr.bf16.mxu0 %v3896_v36  ;;  %2347 = vmatprep.mubr.bf16.mxu1 %v3898_v37 }
  0xdf   : > { %2251 = vmatmul.mubr.bf16.gmra.mrb[92].mxu0 %v3900_v38  ;;  %2348 = vmatmul.mubr.bf16.gmra.mrb[92].mxu1 %v3901_v39 }
  0xe0   : > { %2258 = vmatprep.mubr.bf16.mxu0 %v3902_v40  ;;  %2355 = vmatprep.mubr.bf16.mxu1 %v3904_v41 }
  0xe7   : > { %2259 = vmatmul.mubr.bf16.gmra.mrb[96].mxu0 %v3906_v42  ;;  %2356 = vmatmul.mubr.bf16.gmra.mrb[96].mxu1 %v3907_v43  ;;  %v3941_v42 = vld [vmem:[%s4063_s11 + $0x2e8] ss:$36 sps:$4 sm:$0xff]  }
  0xe8   : > { %2266 = vmatprep.mubr.bf16.mxu0 %v3909_v44  ;;  %2363 = vmatprep.mubr.bf16.mxu1 %v3911_v45  ;;  %v3942_v43 = vld [vmem:[%s4063_s11 + $0x188] ss:$36 sps:$4 sm:$0xff]  }
  0xef   : > { %2267 = vmatmul.mubr.bf16.gmra.mrb[100].mxu0 %v3913_v46  ;;  %2364 = vmatmul.mubr.bf16.gmra.mrb[100].mxu1 %v3914_v47 }
  0xf0   : > { %2274 = vmatprep.mubr.bf16.mxu0 %v3915_v48  ;;  %2371 = vmatprep.mubr.bf16.mxu1 %v3917_v49  ;;  %v3943_v48 = vld [vmem:[%s4063_s11 + $0x334] ss:$36 sps:$4 sm:$0xff]  }
  0xf1   : > { %v3945_v49 = vld [vmem:[%s4063_s11 + $0x1d0] ss:$36 sps:$4 sm:$0xff]  }
  0xf7   : > { %2275 = vmatmul.mubr.bf16.gmra.mrb[104].mxu0 %v3919_v50  ;;  %2372 = vmatmul.mubr.bf16.gmra.mrb[104].mxu1 %v3920_v51 }
  0xf8   : > { %2282 = vmatprep.mubr.bf16.mxu0 %v3922_v52  ;;  %2379 = vmatprep.mubr.bf16.mxu1 %v3924_v53 }
  0xfa   : > { %v3215_v54 = vpop.f32.mrb[0].mxu1  ;;  %v3143_v55 = vpop.f32.mrb[0].mxu0 }
  0xfb   : > { %v3216_v56 = vpop.f32.mrb[1].mxu1  ;;  %v3144_v57 = vpop.f32.mrb[1].mxu0 }
  0xfc   : > { %v4366_v60 = vadd.f32 %v3216_v56, %v3215_v54  ;;  %v3218_v61 = vpop.f32.mrb[2].mxu1  ;;  %v4368_v62 = vadd.f32 %v3144_v57, %v3143_v55  ;;  %v3146_v63 = vpop.f32.mrb[2].mxu0 }
  0xfd   : > { %v3219_v2 = vpop.f32.mrb[3].mxu1  ;;  %v3147_v3 = vpop.f32.mrb[3].mxu0 }
  0xfe   : > { %v4372_v4 = vadd.f32 %v3219_v2, %v3218_v61  ;;  %v4374_v5 = vadd.f32 %v3147_v3, %v3146_v63  ;;  %v3948_v2 = vld [vmem:[%s4063_s11 + $0x37c] ss:$36 sps:$4 sm:$0xff]  }
  0xff   : > { %2283 = vmatmul.mubr.bf16.gmra.mrb[108].mxu0 %v3926_v58  ;;  %2380 = vmatmul.mubr.bf16.gmra.mrb[108].mxu1 %v3927_v59  ;;  %v3946_v58 = vld [vmem:[%s4063_s11 + $0x330] ss:$36 sps:$4 sm:$0xff]   ;;  %v3947_v59 = vld [vmem:[%s4063_s11 + $0x218] ss:$36 sps:$4 sm:$0xff]   ;;  %v3950_v3 = vld [vmem:[%s4063_s11 + $0x260] ss:$36 sps:$4 sm:$0xff]  }
 0x100   : > { %2387 = vmatprep.mubr.bf16.mxu1 %v3928_v0  ;;  %3615 = vmatprep.mubr.bf16.mxu0 %v3930_v1 }
 0x102   : > { %v3221_v6 = vpop.f32.mrb[4].mxu1  ;;  %v3149_v7 = vpop.f32.mrb[4].mxu0 }
 0x103   : > { %v3222_v8 = vpop.f32.mrb[5].mxu1  ;;  %v3150_v9 = vpop.f32.mrb[5].mxu0 }
 0x104   : > { %v4378_v12 = vadd.f32 %v3222_v8, %v3221_v6  ;;  %v3224_v13 = vpop.f32.mrb[6].mxu1  ;;  %v4380_v14 = vadd.f32 %v3150_v9, %v3149_v7  ;;  %v3152_v15 = vpop.f32.mrb[6].mxu0 }
 0x105   : > { %v3225_v18 = vpop.f32.mrb[7].mxu1  ;;  %v3153_v19 = vpop.f32.mrb[7].mxu0 }
 0x106   : > { %v4384_v20 = vadd.f32 %v3225_v18, %v3224_v13  ;;  %v4386_v21 = vadd.f32 %v3153_v19, %v3152_v15  ;;  %v3951_v18 = vld [vmem:[%s4063_s11 + $0x378] ss:$36 sps:$4 sm:$0xff]   ;;  %v3952_v19 = vld [vmem:[%s4063_s11 + $0x2a8] ss:$36 sps:$4 sm:$0xff]  }
 0x107   : > { %2388 = vmatmul.mubr.bf16.gmra.mrb[112].mxu1 %v3931_v10  ;;  %3616 = vmatmul.mubr.bf16.vlgmr.msra.gmra.mrb[112].mxu0 %v3932_v11 }
 0x108   : > { %2395 = vmatprep.mubr.bf16.mxu1 %v3933_v16  ;;  %3619 = vmatprep.mubr.bf16.mxu0 %v3935_v17 }
 0x10a   : > { %v3227_v22 = vpop.f32.mrb[8].mxu1  ;;  %v3155_v23 = vpop.f32.mrb[8].mxu0 }
 0x10b   : > { %v3228_v24 = vpop.f32.mrb[9].mxu1  ;;  %v3156_v25 = vpop.f32.mrb[9].mxu0 }
 0x10c   : > { %v4390_v28 = vadd.f32 %v3228_v24, %v3227_v22  ;;  %v3230_v29 = vpop.f32.mrb[10].mxu1  ;;  %v4392_v30 = vadd.f32 %v3156_v25, %v3155_v23  ;;  %v3158_v31 = vpop.f32.mrb[10].mxu0  ;;  %v3953_v25 = vld [vmem:[%s4063_s11 + $0x3c4] ss:$36 sps:$4 sm:$0xff]  }
 0x10d   : > { %v3231_v34 = vpop.f32.mrb[11].mxu1  ;;  %v3159_v35 = vpop.f32.mrb[11].mxu0 }
 0x10e   : > { %v4396_v36 = vadd.f32 %v3231_v34, %v3230_v29  ;;  %v4398_v37 = vadd.f32 %v3159_v35, %v3158_v31 }
 0x10f   : > { %2396 = vmatmul.mubr.bf16.gmra.mrb[116].mxu1 %v3936_v26  ;;  %3620 = vmatmul.mubr.bf16.gmra.mrb[116].mxu0 %v3937_v27  ;;  %v3955_v26 = vld [vmem:[%s4063_s11 + $0x2f0] ss:$36 sps:$4 sm:$0xff]  }
 0x110   : > { %2403 = vmatprep.mubr.bf16.mxu1 %v3938_v32  ;;  %3623 = vmatprep.mubr.bf16.mxu0 %v3940_v33 }
 0x112   : > { %v3233_v38 = vpop.f32.mrb[12].mxu1  ;;  %v3161_v39 = vpop.f32.mrb[12].mxu0 }
 0x113   : > { %v3234_v40 = vpop.f32.mrb[13].mxu1  ;;  %v3162_v41 = vpop.f32.mrb[13].mxu0 }
 0x114   : > { %v4402_v44 = vadd.f32 %v3234_v40, %v3233_v38  ;;  %v3236_v45 = vpop.f32.mrb[14].mxu1  ;;  %v4404_v46 = vadd.f32 %v3162_v41, %v3161_v39  ;;  %v3164_v47 = vpop.f32.mrb[14].mxu0  ;;  %v3956_v40 = vld [vmem:[%s4063_s11 + $0x3c0] ss:$36 sps:$4 sm:$0xff]   ;;  %v3957_v41 = vld [vmem:[%s4063_s11 + $0x338] ss:$36 sps:$4 sm:$0xff]  }
 0x115   : > { %v3237_v50 = vpop.f32.mrb[15].mxu1  ;;  %v3165_v51 = vpop.f32.mrb[15].mxu0 }
 0x116   : > { %v4408_v52 = vadd.f32 %v3237_v50, %v3236_v45  ;;  %v4410_v53 = vadd.f32 %v3165_v51, %v3164_v47  ;;  %v3958_v47 = vld [vmem:[%s4063_s11 + $0x40c] ss:$36 sps:$4 sm:$0xff]  }
 0x117   : > { %2404 = vmatmul.mubr.bf16.gmra.mrb[120].mxu1 %v3941_v42  ;;  %3624 = vmatmul.mubr.bf16.gmra.mrb[120].mxu0 %v3942_v43 }
 0x118   : > { %2411 = vmatprep.mubr.bf16.mxu1 %v3943_v48  ;;  %3627 = vmatprep.mubr.bf16.mxu0 %v3945_v49  ;;  %v3960_v48 = vld [vmem:[%s4063_s11 + $0x380] ss:$36 sps:$4 sm:$0xff]  }
 0x11a   : > { %v3255_v54 = vpop.f32.mrb[16].mxu1  ;;  %v3167_v55 = vpop.f32.mrb[16].mxu0 }
 0x11b   : > { %v3256_v56 = vpop.f32.mrb[17].mxu1  ;;  %v3168_v57 = vpop.f32.mrb[17].mxu0 }
 0x11c   : > { %v3257_v61 = vadd.f32 %v3256_v56, %v3255_v54  ;;  %v3258_v63 = vpop.f32.mrb[18].mxu1  ;;  %v4414_v0 = vadd.f32 %v3168_v57, %v3167_v55  ;;  %v3170_v1 = vpop.f32.mrb[18].mxu0 }
 0x11d   : > { %v3259_v6 = vpop.f32.mrb[19].mxu1  ;;  %v3171_v7 = vpop.f32.mrb[19].mxu0 }
 0x11e   : > { %v4419_v8 = vadd.f32 %v3257_v61, %v4368_v62  ;;  %v3260_v9 = vadd.f32 %v3259_v6, %v3258_v63  ;;  %v4421_v10 = vadd.f32 %v3171_v7, %v3170_v1  ;;  %v3961_v61 = vld [vmem:[%s4063_s11 + $0x408] ss:$36 sps:$4 sm:$0xff]   ;;  %v3963_v6 = vld [vmem:[%s4063_s11 + $0x454] ss:$36 sps:$4 sm:$0xff]  }
 0x11f   : > { %2412 = vmatmul.mubr.bf16.gmra.mrb[124].mxu1 %v3946_v58  ;;  %3628 = vmatmul.mubr.bf16.gmra.mrb[124].mxu0 %v3947_v59  ;;  %v3962_v63 = vld [vmem:[%s4063_s11 + $0x3c8] ss:$36 sps:$4 sm:$0xff]   ;;  %v3965_v7 = vld [vmem:[%s4063_s11 + $0x410] ss:$36 sps:$4 sm:$0xff]  }
 0x120   : > { %v4424_v11 = vadd.f32 %v3260_v9, %v4374_v5  ;;  %2419 = vmatprep.mubr.bf16.mxu1 %v3948_v2  ;;  %3631 = vmatprep.mubr.bf16.mxu0 %v3950_v3 }
 0x122   : > { %v3261_v13 = vpop.f32.mrb[20].mxu1  ;;  %v3173_v15 = vpop.f32.mrb[20].mxu0 }
 0x123   : > { %v3262_v16 = vpop.f32.mrb[21].mxu1  ;;  %v3174_v17 = vpop.f32.mrb[21].mxu0 }
 0x124   : > { %v3263_v62 = vadd.f32 %v3262_v16, %v3261_v13  ;;  %v3264_v22 = vpop.f32.mrb[22].mxu1  ;;  %v4428_v23 = vadd.f32 %v3174_v17, %v3173_v15  ;;  %v3176_v24 = vpop.f32.mrb[22].mxu0 }
 0x125   : > { %v3265_v27 = vpop.f32.mrb[23].mxu1  ;;  %v3177_v5 = vpop.f32.mrb[23].mxu0 }
 0x126   : > { %v4433_v29 = vadd.f32 %v3263_v62, %v4380_v14  ;;  %v3266_v31 = vadd.f32 %v3265_v27, %v3264_v22  ;;  %v4435_v32 = vadd.f32 %v3177_v5, %v3176_v24  ;;  %v3966_v24 = vld [vmem:[%s4063_s11 + $0x450] ss:$36 sps:$4 sm:$0xff]  }
 0x127   : > { %2420 = vmatmul.mubr.bf16.gmra.mrb[128].mxu1 %v3951_v18  ;;  %3632 = vmatmul.mubr.bf16.gmra.mrb[128].mxu0 %v3952_v19 }
 0x128   : > { %v4438_v33 = vadd.f32 %v3266_v31, %v4386_v21  ;;  %2427 = vmatprep.mubr.bf16.mxu1 %v3953_v25  ;;  %3635 = vmatprep.mubr.bf16.mxu0 %v3955_v26  ;;  %v3967_v25 = vld [vmem:[%s4063_s11 + $0x458] ss:$36 sps:$4 sm:$0xff]   ;;  %s2907_s11 = sshll.u32 %s4821_s18, 3 }
 0x129   : > { %s4697_s9 = scalar_lea.vmem %s4815_s3, %s2907_s11 }
 0x12a   : > { %v3267_v34 = vpop.f32.mrb[24].mxu1  ;;  %v3179_v35 = vpop.f32.mrb[24].mxu0 }
 0x12b   : > { %v3268_v38 = vpop.f32.mrb[25].mxu1  ;;  %v3180_v39 = vpop.f32.mrb[25].mxu0 }
 0x12c   : > { %v3269_v14 = vadd.f32 %v3268_v38, %v3267_v34  ;;  %v3270_v42 = vpop.f32.mrb[26].mxu1  ;;  %v4442_v43 = vadd.f32 %v3180_v39, %v3179_v35  ;;  %v3182_v45 = vpop.f32.mrb[26].mxu0 }
 0x12d   : > { %v3271_v49 = vpop.f32.mrb[27].mxu1  ;;  %v3183_v21 = vpop.f32.mrb[27].mxu0 }
 0x12e   : > { %v4447_v50 = vadd.f32 %v3269_v14, %v4392_v30  ;;  %v3272_v51 = vadd.f32 %v3271_v49, %v3270_v42  ;;  %v4449_v54 = vadd.f32 %v3183_v21, %v3182_v45 }
 0x12f   : > { %2428 = vmatmul.mubr.bf16.gmra.mrb[132].mxu1 %v3956_v40  ;;  %3636 = vmatmul.mubr.bf16.gmra.mrb[132].mxu0 %v3957_v41 }
 0x130   : > { %v4452_v55 = vadd.f32 %v3272_v51, %v4398_v37  ;;  %2435 = vmatprep.mubr.bf16.mxu1 %v3958_v47  ;;  %3639 = vmatprep.mubr.bf16.mxu0 %v3960_v48 }
 0x132   : > { %v3273_v56 = vpop.f32.mrb[28].mxu1  ;;  %v3185_v57 = vpop.f32.mrb[28].mxu0 }
 0x133   : > { %v3274_v58 = vpop.f32.mrb[29].mxu1  ;;  %v3186_v59 = vpop.f32.mrb[29].mxu0 }
 0x134   : > { %v3275_v30 = vadd.f32 %v3274_v58, %v3273_v56  ;;  %v3276_v1 = vpop.f32.mrb[30].mxu1  ;;  %v4456_v2 = vadd.f32 %v3186_v59, %v3185_v57  ;;  %v3188_v3 = vpop.f32.mrb[30].mxu0 }
 0x135   : > { %v3277_v9 = vpop.f32.mrb[31].mxu1  ;;  %v3189_v37 = vpop.f32.mrb[31].mxu0 }
 0x136   : > { %v4461_v13 = vadd.f32 %v3275_v30, %v4404_v46  ;;  %v3278_v15 = vadd.f32 %v3277_v9, %v3276_v1  ;;  %v4463_v16 = vadd.f32 %v3189_v37, %v3188_v3 }
 0x137   : > { %2436 = vmatmul.mubr.bf16.gmra.mrb[136].mxu1 %v3961_v61  ;;  %3640 = vmatmul.mubr.bf16.gmra.mrb[136].mxu0 %v3962_v63 }
 0x138   : > { %v4466_v17 = vadd.f32 %v3278_v15, %v4410_v53  ;;  %2443 = vmatprep.mubr.bf16.mxu1 %v3963_v6  ;;  %3643 = vmatprep.mubr.bf16.mxu0 %v3965_v7 }
 0x13a   : > { %v3279_v18 = vpop.f32.mrb[32].mxu1  ;;  %v3191_v19 = vpop.f32.mrb[32].mxu0 }
 0x13b   : > { %v3280_v62 = vpop.f32.mrb[33].mxu1  ;;  %v3192_v22 = vpop.f32.mrb[33].mxu0 }
 0x13c   : > { %v3281_v26 = vadd.f32 %v3280_v62, %v3279_v18  ;;  %v3282_v27 = vpop.f32.mrb[34].mxu1  ;;  %v3193_v46 = vadd.f32 %v3192_v22, %v3191_v19  ;;  %v3194_v5 = vpop.f32.mrb[34].mxu0 }
 0x13d   : > { %v3283_v31 = vpop.f32.mrb[35].mxu1  ;;  %v3195_v34 = vpop.f32.mrb[35].mxu0 }
 0x13e   : > { %v4471_v35 = vadd.f32 %v3281_v26, %v4414_v0  ;;  %v3284_v38 = vadd.f32 %v3283_v31, %v3282_v27  ;;  %v3196_v53 = vadd.f32 %v3195_v34, %v3194_v5 }
 0x13f   : > { %2444 = vmatmul.mubr.bf16.gmra.mrb[140].mxu1 %v3966_v24  ;;  %3644 = vmatmul.mubr.bf16.gmra.mrb[140].mxu0 %v3967_v25 }
 0x140   : > { %v4474_v39 = vadd.f32 %v3284_v38, %v4421_v10 }
 0x142   : > { %v3285_v40 = vpop.f32.mrb[36].mxu1  ;;  %v3197_v41 = vpop.f32.mrb[36].mxu0 }
 0x143   : > { %v3286_v14 = vpop.f32.mrb[37].mxu1  ;;  %v3198_v42 = vpop.f32.mrb[37].mxu0 }
 0x144   : > { %v3287_v45 = vadd.f32 %v3286_v14, %v3285_v40  ;;  %v3288_v47 = vpop.f32.mrb[38].mxu1  ;;  %v3199_v48 = vadd.f32 %v3198_v42, %v3197_v41  ;;  %v3200_v49 = vpop.f32.mrb[38].mxu0 }
 0x145   : > { %v3289_v21 = vpop.f32.mrb[39].mxu1  ;;  %v3201_v51 = vpop.f32.mrb[39].mxu0 }
 0x146   : > { %v4477_v0 = vadd.f32 %v3287_v45, %v4428_v23  ;;  %v3290_v56 = vadd.f32 %v3289_v21, %v3288_v47  ;;  %v3202_v57 = vadd.f32 %v3201_v51, %v3200_v49 }
 0x148   : > { %v4480_v58 = vadd.f32 %v3290_v56, %v4435_v32 }
 0x14a   : > { %v3291_v10 = vpop.f32.mrb[40].mxu1  ;;  %v3203_v59 = vpop.f32.mrb[40].mxu0 }
 0x14b   : > { %v3292_v61 = vpop.f32.mrb[41].mxu1  ;;  %v3204_v63 = vpop.f32.mrb[41].mxu0 }
 0x14c   : > { %v3293_v30 = vadd.f32 %v3292_v61, %v3291_v10  ;;  %v3294_v1 = vpop.f32.mrb[42].mxu1  ;;  %v4482_v3 = vadd.f32 %v3204_v63, %v3203_v59  ;;  %v3206_v6 = vpop.f32.mrb[42].mxu0 }
 0x14d   : > { %v3295_v7 = vpop.f32.mrb[43].mxu1  ;;  %v3207_v9 = vpop.f32.mrb[43].mxu0 }
 0x14e   : > { %v4485_v37 = vadd.f32 %v3293_v30, %v4442_v43  ;;  %v3296_v23 = vadd.f32 %v3295_v7, %v3294_v1  ;;  %v3208_v15 = vadd.f32 %v3207_v9, %v3206_v6 }
 0x150   : > { %v4488_v18 = vadd.f32 %v3296_v23, %v4449_v54 }
 0x152   : > { %v3297_v32 = vpop.f32.mrb[44].mxu1  ;;  %v3209_v19 = vpop.f32.mrb[44].mxu0 }
 0x153   : > { %v3298_v62 = vpop.f32.mrb[45].mxu1  ;;  %v3210_v22 = vpop.f32.mrb[45].mxu0 }
 0x154   : > { %v3299_v24 = vadd.f32 %v3298_v62, %v3297_v32  ;;  %v3300_v25 = vpop.f32.mrb[46].mxu1  ;;  %v4490_v26 = vadd.f32 %v3210_v22, %v3209_v19  ;;  %v3212_v27 = vpop.f32.mrb[46].mxu0 }
 0x155   : > { %v3301_v5 = vpop.f32.mrb[47].mxu1  ;;  %v3213_v31 = vpop.f32.mrb[47].mxu0 }
 0x156   : > { %v4493_v34 = vadd.f32 %v3299_v24, %v4456_v2  ;;  %v3302_v43 = vadd.f32 %v3301_v5, %v3300_v25  ;;  %v4495_v38 = vadd.f32 %v3213_v31, %v3212_v27 }
 0x158   : > { %v4498_v54 = vadd.f32 %v3302_v43, %v4463_v16 }
 0x15a   : > { %v3303_v40 = vpop.f32.mrb[48].mxu1  ;;  %v3367_v41 = vpop.f32.mrb[48].mxu0 }
 0x15b   : > { %v3304_v14 = vpop.f32.mrb[49].mxu1  ;;  %v3368_v42 = vpop.f32.mrb[49].mxu0 }
 0x15c   : > { %v3305_v45 = vadd.f32 %v3304_v14, %v3303_v40  ;;  %v3369_v47 = vadd.f32 %v3368_v42, %v3367_v41  ;;  %v3306_v49 = vpop.f32.mrb[50].mxu1  ;;  %v3370_v21 = vpop.f32.mrb[50].mxu0 }
 0x15d   : > { %v3307_v51 = vpop.f32.mrb[51].mxu1  ;;  %v3371_v56 = vpop.f32.mrb[51].mxu0 }
 0x15e   : > { %v4500_v10 = vadd.f32 %v3305_v45, %v3193_v46  ;;  %v4503_v2 = vadd.f32 %v3369_v47, %v4419_v8  ;;  %v3308_v59 = vadd.f32 %v3307_v51, %v3306_v49  ;;  %v3372_v61 = vadd.f32 %v3371_v56, %v3370_v21 }
 0x160   : > { %v4505_v63 = vadd.f32 %v3308_v59, %v3196_v53  ;;  %v4508_v16 = vadd.f32 %v3372_v61, %v4424_v11 }
 0x162   : > { %v3309_v30 = vpop.f32.mrb[52].mxu1  ;;  %v3373_v1 = vpop.f32.mrb[52].mxu0 }
 0x163   : > { %v3310_v6 = vpop.f32.mrb[53].mxu1  ;;  %v3374_v7 = vpop.f32.mrb[53].mxu0 }
 0x164   : > { %v3311_v9 = vadd.f32 %v3310_v6, %v3309_v30  ;;  %v3375_v23 = vadd.f32 %v3374_v7, %v3373_v1  ;;  %v3312_v32 = vpop.f32.mrb[54].mxu1  ;;  %v3376_v19 = vpop.f32.mrb[54].mxu0 }
 0x165   : > { %v3313_v46 = vpop.f32.mrb[55].mxu1  ;;  %v3377_v62 = vpop.f32.mrb[55].mxu0 }
 0x166   : > { %v4510_v22 = vadd.f32 %v3311_v9, %v3199_v48  ;;  %v4513_v8 = vadd.f32 %v3375_v23, %v4433_v29  ;;  %v3314_v53 = vadd.f32 %v3313_v46, %v3312_v32  ;;  %v3378_v24 = vadd.f32 %v3377_v62, %v3376_v19 }
 0x168   : > { %v4515_v25 = vadd.f32 %v3314_v53, %v3202_v57  ;;  %v4518_v11 = vadd.f32 %v3378_v24, %v4438_v33 }
 0x16a   : > { %v3315_v27 = vpop.f32.mrb[56].mxu1  ;;  %v3379_v5 = vpop.f32.mrb[56].mxu0 }
 0x16b   : > { %v3316_v31 = vpop.f32.mrb[57].mxu1  ;;  %v3380_v43 = vpop.f32.mrb[57].mxu0 }
 0x16c   : > { %v3317_v40 = vadd.f32 %v3316_v31, %v3315_v27  ;;  %v3381_v41 = vadd.f32 %v3380_v43, %v3379_v5  ;;  %v3318_v14 = vpop.f32.mrb[58].mxu1  ;;  %v3382_v42 = vpop.f32.mrb[58].mxu0 }
 0x16d   : > { %v3319_v48 = vpop.f32.mrb[59].mxu1  ;;  %v3383_v45 = vpop.f32.mrb[59].mxu0 }
 0x16e   : > { %v4521_v29 = vadd.f32 %v3317_v40, %v4482_v3  ;;  %v4524_v47 = vadd.f32 %v3381_v41, %v4447_v50  ;;  %v3320_v57 = vadd.f32 %v3319_v48, %v3318_v14  ;;  %v3384_v49 = vadd.f32 %v3383_v45, %v3382_v42 }
 0x170   : > { %v4526_v33 = vadd.f32 %v3320_v57, %v3208_v15  ;;  %v4529_v21 = vadd.f32 %v3384_v49, %v4452_v55 }
 0x172   : > { %v3321_v51 = vpop.f32.mrb[60].mxu1  ;;  %v3385_v56 = vpop.f32.mrb[60].mxu0 }
 0x173   : > { %v3322_v59 = vpop.f32.mrb[61].mxu1  ;;  %v3386_v61 = vpop.f32.mrb[61].mxu0 }
 0x174   : > { %v3323_v30 = vadd.f32 %v3322_v59, %v3321_v51  ;;  %v3387_v1 = vadd.f32 %v3386_v61, %v3385_v56  ;;  %v3324_v6 = vpop.f32.mrb[62].mxu1  ;;  %v3388_v7 = vpop.f32.mrb[62].mxu0 }
 0x175   : > { %v3325_v3 = vpop.f32.mrb[63].mxu1  ;;  %v3389_v9 = vpop.f32.mrb[63].mxu0 }
 0x176   : > { %v4532_v50 = vadd.f32 %v3323_v30, %v4490_v26  ;;  %v4535_v23 = vadd.f32 %v3387_v1, %v4461_v13  ;;  %v3326_v15 = vadd.f32 %v3325_v3, %v3324_v6  ;;  %v3390_v32 = vadd.f32 %v3389_v9, %v3388_v7 }
 0x178   : > { %v4538_v55 = vadd.f32 %v3326_v15, %v4495_v38  ;;  %v4541_v19 = vadd.f32 %v3390_v32, %v4466_v17 }
 0x17a   : > { %v3327_v46 = vpop.f32.mrb[64].mxu1  ;;  %v3391_v62 = vpop.f32.mrb[64].mxu0 }
 0x17b   : > { %v3328_v53 = vpop.f32.mrb[65].mxu1  ;;  %v3392_v24 = vpop.f32.mrb[65].mxu0 }
 0x17c   : > { %v3329_v27 = vadd.f32 %v3328_v53, %v3327_v46  ;;  %v3393_v5 = vadd.f32 %v3392_v24, %v3391_v62  ;;  %v3330_v31 = vpop.f32.mrb[66].mxu1  ;;  %v3394_v26 = vpop.f32.mrb[66].mxu0 }
 0x17d   : > { %v3331_v43 = vpop.f32.mrb[67].mxu1  ;;  %v3395_v40 = vpop.f32.mrb[67].mxu0 }
 0x17e   : > { %v4544_v13 = vadd.f32 %v3329_v27, %v4366_v60  ;;  %v4547_v41 = vadd.f32 %v3393_v5, %v4471_v35  ;;  %v3332_v38 = vadd.f32 %v3331_v43, %v3330_v31  ;;  %v3396_v14 = vadd.f32 %v3395_v40, %v3394_v26 }
 0x180   : > { %v4550_v17 = vadd.f32 %v3332_v38, %v4372_v4  ;;  %v4553_v42 = vadd.f32 %v3396_v14, %v4474_v39 }
 0x182   : > { %v3333_v48 = vpop.f32.mrb[68].mxu1  ;;  %v3397_v45 = vpop.f32.mrb[68].mxu0 }
 0x183   : > { %v3334_v57 = vpop.f32.mrb[69].mxu1  ;;  %v3398_v49 = vpop.f32.mrb[69].mxu0 }
 0x184   : > { %v3335_v51 = vadd.f32 %v3334_v57, %v3333_v48  ;;  %v3399_v56 = vadd.f32 %v3398_v49, %v3397_v45  ;;  %v3336_v59 = vpop.f32.mrb[70].mxu1  ;;  %v3400_v60 = vpop.f32.mrb[70].mxu0 }
 0x185   : > { %v3337_v61 = vpop.f32.mrb[71].mxu1  ;;  %v3401_v30 = vpop.f32.mrb[71].mxu0 }
 0x186   : > { %v4556_v35 = vadd.f32 %v3335_v51, %v4378_v12  ;;  %v4559_v1 = vadd.f32 %v3399_v56, %v4477_v0  ;;  %v3338_v4 = vadd.f32 %v3337_v61, %v3336_v59  ;;  %v3402_v6 = vadd.f32 %v3401_v30, %v3400_v60 }
 0x188   : > { %v4562_v39 = vadd.f32 %v3338_v4, %v4384_v20  ;;  %v4565_v7 = vadd.f32 %v3402_v6, %v4480_v58 }
 0x18a   : > { %v3339_v3 = vpop.f32.mrb[72].mxu1  ;;  %v3403_v9 = vpop.f32.mrb[72].mxu0 }
 0x18b   : > { %v3340_v15 = vpop.f32.mrb[73].mxu1  ;;  %v3404_v32 = vpop.f32.mrb[73].mxu0 }
 0x18c   : > { %v3341_v46 = vadd.f32 %v3340_v15, %v3339_v3  ;;  %v3405_v62 = vadd.f32 %v3404_v32, %v3403_v9  ;;  %v3342_v53 = vpop.f32.mrb[74].mxu1  ;;  %v3406_v12 = vpop.f32.mrb[74].mxu0 }
 0x18d   : > { %v3343_v24 = vpop.f32.mrb[75].mxu1  ;;  %v3407_v27 = vpop.f32.mrb[75].mxu0 }
 0x18e   : > { %v4568_v0 = vadd.f32 %v3341_v46, %v4390_v28  ;;  %v4571_v5 = vadd.f32 %v3405_v62, %v4485_v37  ;;  %v3344_v20 = vadd.f32 %v3343_v24, %v3342_v53  ;;  %v3408_v31 = vadd.f32 %v3407_v27, %v3406_v12 }
 0x190   : > { %v4574_v58 = vadd.f32 %v3344_v20, %v4396_v36  ;;  %v4577_v26 = vadd.f32 %v3408_v31, %v4488_v18 }
 0x192   : > { %v3345_v43 = vpop.f32.mrb[76].mxu1  ;;  %v3409_v40 = vpop.f32.mrb[76].mxu0 }
 0x193   : > { %v3346_v38 = vpop.f32.mrb[77].mxu1  ;;  %v3410_v14 = vpop.f32.mrb[77].mxu0 }
 0x194   : > { %v3347_v48 = vadd.f32 %v3346_v38, %v3345_v43  ;;  %v3411_v45 = vadd.f32 %v3410_v14, %v3409_v40  ;;  %v3348_v57 = vpop.f32.mrb[78].mxu1  ;;  %v3412_v28 = vpop.f32.mrb[78].mxu0 }
 0x195   : > { %v3349_v49 = vpop.f32.mrb[79].mxu1  ;;  %v3413_v51 = vpop.f32.mrb[79].mxu0 }
 0x196   : > { %v4580_v37 = vadd.f32 %v3347_v48, %v4402_v44  ;;  %v4583_v56 = vadd.f32 %v3411_v45, %v4493_v34  ;;  %v3350_v36 = vadd.f32 %v3349_v49, %v3348_v57  ;;  %v3414_v59 = vadd.f32 %v3413_v51, %v3412_v28 }
 0x198   : > { %v4586_v18 = vadd.f32 %v3350_v36, %v4408_v52  ;;  %v4589_v60 = vadd.f32 %v3414_v59, %v4498_v54 }
 0x19a   : > { %v3415_v61 = vpop.f32.mrb[80].mxu0  ;;  %v3479_v30 = vpop.f32.mrb[80].mxu1 }
 0x19b   : > { %v3416_v4 = vpop.f32.mrb[81].mxu0  ;;  %v3480_v6 = vpop.f32.mrb[81].mxu1 }
 0x19c   : > { %v3417_v3 = vadd.f32 %v3416_v4, %v3415_v61  ;;  %v3481_v9 = vadd.f32 %v3480_v6, %v3479_v30  ;;  %v3418_v15 = vpop.f32.mrb[82].mxu0  ;;  %v3482_v44 = vpop.f32.mrb[82].mxu1 }
 0x19d   : > { %v3419_v32 = vpop.f32.mrb[83].mxu0  ;;  %v3483_v46 = vpop.f32.mrb[83].mxu1 }
 0x19e   : > { %v4592_v34 = vadd.f32 %v3417_v3, %v4500_v10  ;;  %v3420_v62 = vadd.f32 %v3419_v32, %v3418_v15  ;;  %v3484_v53 = vadd.f32 %v3483_v46, %v3482_v44  ;;  %v4595_v52 = vadd.f32 %v3481_v9, %v4503_v2 }
 0x1a0   : > { %v4598_v54 = vadd.f32 %v3420_v62, %v4505_v63  ;;  %v4601_v12 = vadd.f32 %v3484_v53, %v4508_v16 }
 0x1a2   : > { %v3421_v24 = vpop.f32.mrb[84].mxu0  ;;  %v3485_v27 = vpop.f32.mrb[84].mxu1 }
 0x1a3   : > { %v3422_v20 = vpop.f32.mrb[85].mxu0  ;;  %v3486_v31 = vpop.f32.mrb[85].mxu1 }
 0x1a4   : > { %v3423_v43 = vadd.f32 %v3422_v20, %v3421_v24  ;;  %v3487_v40 = vadd.f32 %v3486_v31, %v3485_v27  ;;  %v3424_v38 = vpop.f32.mrb[86].mxu0  ;;  %v3488_v10 = vpop.f32.mrb[86].mxu1 }
 0x1a5   : > { %v3425_v14 = vpop.f32.mrb[87].mxu0  ;;  %v3489_v48 = vpop.f32.mrb[87].mxu1 }
 0x1a6   : > { %v4604_v45 = vadd.f32 %v3423_v43, %v4510_v22  ;;  %v3426_v2 = vadd.f32 %v3425_v14, %v3424_v38  ;;  %v3490_v57 = vadd.f32 %v3489_v48, %v3488_v10  ;;  %v4607_v63 = vadd.f32 %v3487_v40, %v4513_v8 }
 0x1a8   : > { %v4610_v16 = vadd.f32 %v3426_v2, %v4515_v25  ;;  %v4613_v28 = vadd.f32 %v3490_v57, %v4518_v11 }
 0x1aa   : > { %v3427_v49 = vpop.f32.mrb[88].mxu0  ;;  %v3491_v51 = vpop.f32.mrb[88].mxu1 }
 0x1ab   : > { %v3428_v36 = vpop.f32.mrb[89].mxu0  ;;  %v3492_v59 = vpop.f32.mrb[89].mxu1 }
 0x1ac   : > { %v3429_v61 = vadd.f32 %v3428_v36, %v3427_v49  ;;  %v3493_v30 = vadd.f32 %v3492_v59, %v3491_v51  ;;  %v3430_v4 = vpop.f32.mrb[90].mxu0  ;;  %v3494_v22 = vpop.f32.mrb[90].mxu1 }
 0x1ad   : > { %v3431_v6 = vpop.f32.mrb[91].mxu0  ;;  %v3495_v3 = vpop.f32.mrb[91].mxu1 }
 0x1ae   : > { %v4616_v9 = vadd.f32 %v3429_v61, %v4521_v29  ;;  %v3432_v8 = vadd.f32 %v3431_v6, %v3430_v4  ;;  %v3496_v15 = vadd.f32 %v3495_v3, %v3494_v22  ;;  %v4619_v25 = vadd.f32 %v3493_v30, %v4524_v47 }
 0x1b0   : > { %v4622_v11 = vadd.f32 %v3432_v8, %v4526_v33  ;;  %v4625_v44 = vadd.f32 %v3496_v15, %v4529_v21 }
 0x1b2   : > { %v3433_v32 = vpop.f32.mrb[92].mxu0  ;;  %v3497_v46 = vpop.f32.mrb[92].mxu1 }
 0x1b3   : > { %v3434_v62 = vpop.f32.mrb[93].mxu0  ;;  %v3498_v53 = vpop.f32.mrb[93].mxu1 }
 0x1b4   : > { %v3435_v24 = vadd.f32 %v3434_v62, %v3433_v32  ;;  %v3499_v27 = vadd.f32 %v3498_v53, %v3497_v46  ;;  %v3436_v20 = vpop.f32.mrb[94].mxu0  ;;  %v3500_v29 = vpop.f32.mrb[94].mxu1 }
 0x1b5   : > { %v3437_v31 = vpop.f32.mrb[95].mxu0  ;;  %v3501_v43 = vpop.f32.mrb[95].mxu1 }
 0x1b6   : > { %v4628_v40 = vadd.f32 %v3435_v24, %v4532_v50  ;;  %v3438_v47 = vadd.f32 %v3437_v31, %v3436_v20  ;;  %v3502_v38 = vadd.f32 %v3501_v43, %v3500_v29  ;;  %v4631_v33 = vadd.f32 %v3499_v27, %v4535_v23 }
 0x1b8   : > { %v4634_v21 = vadd.f32 %v3438_v47, %v4538_v55  ;;  %v4637_v10 = vadd.f32 %v3502_v38, %v4541_v19 }
 0x1ba   : > { %v3439_v14 = vpop.f32.mrb[96].mxu0  ;;  %v3503_v48 = vpop.f32.mrb[96].mxu1 }
 0x1bb   : > { %v3440_v2 = vpop.f32.mrb[97].mxu0  ;;  %v3504_v57 = vpop.f32.mrb[97].mxu1 }
 0x1bc   : > { %v3441_v49 = vadd.f32 %v3440_v2, %v3439_v14  ;;  %v3505_v51 = vadd.f32 %v3504_v57, %v3503_v48  ;;  %v3442_v36 = vpop.f32.mrb[98].mxu0  ;;  %v3506_v50 = vpop.f32.mrb[98].mxu1 }
 0x1bd   : > { %v3443_v59 = vpop.f32.mrb[99].mxu0  ;;  %v3507_v61 = vpop.f32.mrb[99].mxu1 }
 0x1be   : > { %v4640_v30 = vadd.f32 %v3441_v49, %v4544_v13  ;;  %v3444_v23 = vadd.f32 %v3443_v59, %v3442_v36  ;;  %v3508_v4 = vadd.f32 %v3507_v61, %v3506_v50  ;;  %v4643_v55 = vadd.f32 %v3505_v51, %v4547_v41 }
 0x1c0   : > { %v4646_v19 = vadd.f32 %v3444_v23, %v4550_v17  ;;  %v4649_v22 = vadd.f32 %v3508_v4, %v4553_v42 }
 0x1c2   : > { %v3445_v6 = vpop.f32.mrb[100].mxu0  ;;  %v3509_v3 = vpop.f32.mrb[100].mxu1 }
 0x1c3   : > { %v3446_v8 = vpop.f32.mrb[101].mxu0  ;;  %v3510_v15 = vpop.f32.mrb[101].mxu1 }
 0x1c4   : > { %v3447_v32 = vadd.f32 %v3446_v8, %v3445_v6  ;;  %v3511_v46 = vadd.f32 %v3510_v15, %v3509_v3  ;;  %v3448_v62 = vpop.f32.mrb[102].mxu0  ;;  %v3512_v13 = vpop.f32.mrb[102].mxu1 }
 0x1c5   : > { %v3449_v53 = vpop.f32.mrb[103].mxu0  ;;  %v3513_v24 = vpop.f32.mrb[103].mxu1 }
 0x1c6   : > { %v4652_v27 = vadd.f32 %v3447_v32, %v4556_v35  ;;  %v3450_v41 = vadd.f32 %v3449_v53, %v3448_v62  ;;  %v3514_v20 = vadd.f32 %v3513_v24, %v3512_v13  ;;  %v4655_v17 = vadd.f32 %v3511_v46, %v4559_v1 }
 0x1c8   : > { %v4658_v42 = vadd.f32 %v3450_v41, %v4562_v39  ;;  %v4661_v29 = vadd.f32 %v3514_v20, %v4565_v7  ;;  %v4691_v41 = vld [vmem:[%s4814_s2] ss:$0 sm:$0xff] }
 0x1ca   : > { %v3451_v31 = vpop.f32.mrb[104].mxu0  ;;  %v3515_v43 = vpop.f32.mrb[104].mxu1 }
 0x1cb   : > { %v3452_v47 = vpop.f32.mrb[105].mxu0  ;;  %v3516_v38 = vpop.f32.mrb[105].mxu1 }
 0x1cc   : > { %v3453_v14 = vadd.f32 %v3452_v47, %v3451_v31  ;;  %v3517_v48 = vadd.f32 %v3516_v38, %v3515_v43  ;;  %v3454_v2 = vpop.f32.mrb[106].mxu0  ;;  %v3518_v35 = vpop.f32.mrb[106].mxu1 }
 0x1cd   : > { %v3455_v57 = vpop.f32.mrb[107].mxu0  ;;  %v3519_v49 = vpop.f32.mrb[107].mxu1 }
 0x1ce   : > { %v4664_v51 = vadd.f32 %v3453_v14, %v4568_v0  ;;  %v3456_v1 = vadd.f32 %v3455_v57, %v3454_v2  ;;  %v3520_v36 = vadd.f32 %v3519_v49, %v3518_v35  ;;  %v4667_v39 = vadd.f32 %v3517_v48, %v4571_v5 }
 0x1d0   : > { %v4670_v7 = vadd.f32 %v3456_v1, %v4574_v58  ;;  %v4673_v50 = vadd.f32 %v3520_v36, %v4577_v26 }
 0x1d2   : > { %v3457_v59 = vpop.f32.mrb[108].mxu0  ;;  %v3521_v61 = vpop.f32.mrb[108].mxu1 }
 0x1d3   : > { %v3458_v23 = vpop.f32.mrb[109].mxu0  ;;  %v3522_v4 = vpop.f32.mrb[109].mxu1 }
 0x1d4   : > { %v3459_v6 = vadd.f32 %v3458_v23, %v3457_v59  ;;  %v3523_v3 = vadd.f32 %v3522_v4, %v3521_v61  ;;  %v3460_v0 = vpop.f32.mrb[110].mxu0  ;;  %v3524_v8 = vpop.f32.mrb[110].mxu1 }
 0x1d5   : > { %v3461_v15 = vpop.f32.mrb[111].mxu0  ;;  %v3525_v32 = vpop.f32.mrb[111].mxu1 }
 0x1d6   : > { %v4676_v5 = vadd.f32 %v3459_v6, %v4580_v37  ;;  %v3462_v46 = vadd.f32 %v3461_v15, %v3460_v0  ;;  %v3526_v58 = vadd.f32 %v3525_v32, %v3524_v8  ;;  %v4679_v62 = vadd.f32 %v3523_v3, %v4583_v56 }
 0x1d8   : > { %v4682_v26 = vadd.f32 %v3462_v46, %v4586_v18  ;;  %v4685_v13 = vadd.f32 %v3526_v58, %v4589_v60 }
 0x1da   : > { %v3527_v53 = vpop.f32.mrb[112].mxu1  ;;  %v3617_v24 = vpop.f32.mrb[112].mxu0 }
 0x1db   : > { %v2495_v37 = vadd.f32 %v3617_v24, %v4607_v63  ;;  %v3528_v20 = vpop.f32.mrb[113].mxu1  ;;  %v2486_v31 = vpop.f32.mrb[113].mxu0 }
 0x1dc   : > { %v3529_v56 = vadd.f32 %v3528_v20, %v3527_v53  ;;  %v2487_v18 = vadd.f32 %v2486_v31, %v4595_v52  ;;  %v3530_v60 = vpop.f32.mrb[114].mxu1  ;;  %v3618_v43 = vpop.f32.mrb[114].mxu0 }
 0x1dd   : > { %v2721_v47 = vadd.f32 %v4691_v41, %v2495_v37  ;;  %v2498_v63 = vadd.f32 %v3618_v43, %v4613_v28  ;;  %v3531_v38 = vpop.f32.mrb[115].mxu1  ;;  %v2489_v14 = vpop.f32.mrb[115].mxu0 }
 0x1de   : > { %v2719_v48 = vadd.f32 %v4691_v41, %v2487_v18  ;;  %v3532_v2 = vadd.f32 %v3531_v38, %v3530_v60  ;;  %v2490_v35 = vadd.f32 %v2489_v14, %v4601_v12  ;;  %v4705_v57 = vadd.f32 %v3529_v56, %v4592_v34 }
 0x1df   : > { %2753 = vst [vmem:[%s4697_s9 + $0x10] sm:$0xff] %v2721_v47  ;;  %v2722_v52 = vadd.f32 %v4691_v41, %v2498_v63 }
 0x1e0   : > { %2751 = vst [vmem:[%s4697_s9] sm:$0xff] %v2719_v48  ;;  %v2720_v49 = vadd.f32 %v4691_v41, %v2490_v35  ;;  %v4712_v1 = vadd.f32 %v3532_v2, %v4598_v54 }
 0x1e1   : > { %2754 = vst [vmem:[%s4697_s9 + $0x18] sm:$0xff] %v2722_v52 }
 0x1e2   : > { %2752 = vst [vmem:[%s4697_s9 + $0x8] sm:$0xff] %v2720_v49  ;;  %v3533_v28 = vpop.f32.mrb[116].mxu1  ;;  %v3621_v36 = vpop.f32.mrb[116].mxu0 }
 0x1e3   : > { %v2511_v59 = vadd.f32 %v3621_v36, %v4631_v33  ;;  %v3534_v12 = vpop.f32.mrb[117].mxu1  ;;  %v2502_v34 = vpop.f32.mrb[117].mxu0 }
 0x1e4   : > { %v3535_v61 = vadd.f32 %v3534_v12, %v3533_v28  ;;  %v2503_v23 = vadd.f32 %v2502_v34, %v4619_v25  ;;  %v3536_v4 = vpop.f32.mrb[118].mxu1  ;;  %v3622_v6 = vpop.f32.mrb[118].mxu0 }
 0x1e5   : > { %v2725_v54 = vadd.f32 %v4691_v41, %v2511_v59  ;;  %v2514_v3 = vadd.f32 %v3622_v6, %v4637_v10  ;;  %v3537_v0 = vpop.f32.mrb[119].mxu1  ;;  %v2505_v8 = vpop.f32.mrb[119].mxu0 }
 0x1e6   : > { %v2723_v15 = vadd.f32 %v4691_v41, %v2503_v23  ;;  %v3538_v32 = vadd.f32 %v3537_v0, %v3536_v4  ;;  %v2506_v33 = vadd.f32 %v2505_v8, %v4625_v44  ;;  %v2398_v46 = vadd.f32 %v3535_v61, %v4604_v45 }
 0x1e7   : > { %2757 = vst [vmem:[%s4697_s9 + $0x30] sm:$0xff] %v2725_v54  ;;  %v2726_v25 = vadd.f32 %v4691_v41, %v2514_v3 }
 0x1e8   : > { %2755 = vst [vmem:[%s4697_s9 + $0x20] sm:$0xff] %v2723_v15  ;;  %v2724_v58 = vadd.f32 %v4691_v41, %v2506_v33  ;;  %v2401_v53 = vadd.f32 %v3538_v32, %v4610_v16 }
 0x1e9   : > { %2758 = vst [vmem:[%s4697_s9 + $0x38] sm:$0xff] %v2726_v25 }
 0x1ea   : > { %2756 = vst [vmem:[%s4697_s9 + $0x28] sm:$0xff] %v2724_v58  ;;  %v3539_v10 = vpop.f32.mrb[120].mxu1  ;;  %v3625_v24 = vpop.f32.mrb[120].mxu0 }
 0x1eb   : > { %v2527_v37 = vadd.f32 %v3625_v24, %v4655_v17  ;;  %v3540_v20 = vpop.f32.mrb[121].mxu1  ;;  %v2518_v44 = vpop.f32.mrb[121].mxu0 }
 0x1ec   : > { %v3541_v31 = vadd.f32 %v3540_v20, %v3539_v10  ;;  %v2519_v45 = vadd.f32 %v2518_v44, %v4643_v55  ;;  %v3542_v56 = vpop.f32.mrb[122].mxu1  ;;  %v3626_v18 = vpop.f32.mrb[122].mxu0 }
 0x1ed   : > { %v2729_v60 = vadd.f32 %v4691_v41, %v2527_v37  ;;  %v2530_v16 = vadd.f32 %v3626_v18, %v4661_v29  ;;  %v3543_v43 = vpop.f32.mrb[123].mxu1  ;;  %v2521_v47 = vpop.f32.mrb[123].mxu0 }
 0x1ee   : > { %v2727_v63 = vadd.f32 %v4691_v41, %v2519_v45  ;;  %v3544_v38 = vadd.f32 %v3543_v43, %v3542_v56  ;;  %v2522_v17 = vadd.f32 %v2521_v47, %v4649_v22  ;;  %v2406_v14 = vadd.f32 %v3541_v31, %v4616_v9 }
 0x1ef   : > { %2761 = vst [vmem:[%s4697_s9 + $0x50] sm:$0xff] %v2729_v60  ;;  %v2730_v55 = vadd.f32 %v4691_v41, %v2530_v16 }
 0x1f0   : > { %2759 = vst [vmem:[%s4697_s9 + $0x40] sm:$0xff] %v2727_v63  ;;  %v2728_v48 = vadd.f32 %v4691_v41, %v2522_v17  ;;  %v4742_v2 = vadd.f32 %v3544_v38, %v4622_v11 }
 0x1f1   : > { %2762 = vst [vmem:[%s4697_s9 + $0x58] sm:$0xff] %v2730_v55 }
 0x1f2   : > { %2760 = vst [vmem:[%s4697_s9 + $0x48] sm:$0xff] %v2728_v48  ;;  %v3545_v29 = vpop.f32.mrb[124].mxu1  ;;  %v3629_v35 = vpop.f32.mrb[124].mxu0 }
 0x1f3   : > { %v2543_v52 = vadd.f32 %v3629_v35, %v4679_v62  ;;  %v3546_v49 = vpop.f32.mrb[125].mxu1  ;;  %v2534_v22 = vpop.f32.mrb[125].mxu0 }
 0x1f4   : > { %v3547_v9 = vadd.f32 %v3546_v49, %v3545_v29  ;;  %v2535_v28 = vadd.f32 %v2534_v22, %v4667_v39  ;;  %v3548_v36 = vpop.f32.mrb[126].mxu1  ;;  %v3630_v59 = vpop.f32.mrb[126].mxu0 }
 0x1f5   : > { %v2733_v11 = vadd.f32 %v4691_v41, %v2543_v52  ;;  %v2546_v12 = vadd.f32 %v3630_v59, %v4685_v13  ;;  %v3549_v34 = vpop.f32.mrb[127].mxu1  ;;  %v2537_v61 = vpop.f32.mrb[127].mxu0 }
 0x1f6   : > { %v2731_v23 = vadd.f32 %v4691_v41, %v2535_v28  ;;  %v3550_v4 = vadd.f32 %v3549_v34, %v3548_v36  ;;  %v2538_v62 = vadd.f32 %v2537_v61, %v4673_v50  ;;  %v2414_v6 = vadd.f32 %v3547_v9, %v4628_v40 }
 0x1f7   : > { %2765 = vst [vmem:[%s4697_s9 + $0x70] sm:$0xff] %v2733_v11  ;;  %v2734_v39 = vadd.f32 %v4691_v41, %v2546_v12 }
 0x1f8   : > { %2763 = vst [vmem:[%s4697_s9 + $0x60] sm:$0xff] %v2731_v23  ;;  %v2732_v54 = vadd.f32 %v4691_v41, %v2538_v62  ;;  %v2417_v3 = vadd.f32 %v3550_v4, %v4634_v21 }
 0x1f9   : > { %2766 = vst [vmem:[%s4697_s9 + $0x78] sm:$0xff] %v2734_v39 }
 0x1fa   : > { %2764 = vst [vmem:[%s4697_s9 + $0x68] sm:$0xff] %v2732_v54  ;;  %v3551_v13 = vpop.f32.mrb[128].mxu1  ;;  %v3633_v0 = vpop.f32.mrb[128].mxu0 }
 0x1fb   : > { %v2559_v8 = vadd.f32 %v3633_v0, %v2398_v46  ;;  %v3552_v15 = vpop.f32.mrb[129].mxu1  ;;  %v2550_v32 = vpop.f32.mrb[129].mxu0 }
 0x1fc   : > { %v3553_v50 = vadd.f32 %v3552_v15, %v3551_v13  ;;  %v2551_v40 = vadd.f32 %v2550_v32, %v4705_v57  ;;  %v3554_v33 = vpop.f32.mrb[130].mxu1  ;;  %v3634_v25 = vpop.f32.mrb[130].mxu0 }
 0x1fd   : > { %v2737_v58 = vadd.f32 %v4691_v41, %v2559_v8  ;;  %v2562_v10 = vadd.f32 %v3634_v25, %v2401_v53  ;;  %v3555_v21 = vpop.f32.mrb[131].mxu1  ;;  %v2553_v24 = vpop.f32.mrb[131].mxu0 }
 0x1fe   : > { %v2735_v37 = vadd.f32 %v4691_v41, %v2551_v40  ;;  %v3556_v20 = vadd.f32 %v3555_v21, %v3554_v33  ;;  %v2554_v46 = vadd.f32 %v2553_v24, %v4712_v1  ;;  %v2422_v44 = vadd.f32 %v3553_v50, %v4640_v30 }
 0x1ff   : > { %2769 = vst [vmem:[%s4697_s9 + $0x90] sm:$0xff] %v2737_v58  ;;  %v2738_v31 = vadd.f32 %v4691_v41, %v2562_v10 }
 0x200   : > { %2767 = vst [vmem:[%s4697_s9 + $0x80] sm:$0xff] %v2735_v37  ;;  %v2736_v57 = vadd.f32 %v4691_v41, %v2554_v46  ;;  %v2425_v45 = vadd.f32 %v3556_v20, %v4646_v19 }
 0x201   : > { %2770 = vst [vmem:[%s4697_s9 + $0x98] sm:$0xff] %v2738_v31 }
 0x202   : > { %2768 = vst [vmem:[%s4697_s9 + $0x88] sm:$0xff] %v2736_v57  ;;  %v3557_v53 = vpop.f32.mrb[132].mxu1  ;;  %v3637_v56 = vpop.f32.mrb[132].mxu0 }
 0x203   : > { %v2575_v18 = vadd.f32 %v3637_v56, %v2414_v6  ;;  %v3558_v60 = vpop.f32.mrb[133].mxu1  ;;  %v2566_v16 = vpop.f32.mrb[133].mxu0 }
 0x204   : > { %v3559_v1 = vadd.f32 %v3558_v60, %v3557_v53  ;;  %v2567_v43 = vadd.f32 %v2566_v16, %v2406_v14  ;;  %v3560_v30 = vpop.f32.mrb[134].mxu1  ;;  %v3638_v47 = vpop.f32.mrb[134].mxu0 }
 0x205   : > { %v2741_v63 = vadd.f32 %v4691_v41, %v2575_v18  ;;  %v2578_v38 = vadd.f32 %v3638_v47, %v2417_v3  ;;  %v3561_v17 = vpop.f32.mrb[135].mxu1  ;;  %v2569_v19 = vpop.f32.mrb[135].mxu0 }
 0x206   : > { %v2739_v55 = vadd.f32 %v4691_v41, %v2567_v43  ;;  %v3562_v48 = vadd.f32 %v3561_v17, %v3560_v30  ;;  %v2570_v29 = vadd.f32 %v2569_v19, %v4742_v2  ;;  %v2430_v35 = vadd.f32 %v3559_v1, %v4652_v27 }
 0x207   : > { %2773 = vst [vmem:[%s4697_s9 + $0xb0] sm:$0xff] %v2741_v63  ;;  %v2742_v52 = vadd.f32 %v4691_v41, %v2578_v38 }
 0x208   : > { %2771 = vst [vmem:[%s4697_s9 + $0xa0] sm:$0xff] %v2739_v55  ;;  %v2740_v14 = vadd.f32 %v4691_v41, %v2570_v29  ;;  %v2433_v49 = vadd.f32 %v3562_v48, %v4658_v42 }
 0x209   : > { %2774 = vst [vmem:[%s4697_s9 + $0xb8] sm:$0xff] %v2742_v52 }
 0x20a   : > { %2772 = vst [vmem:[%s4697_s9 + $0xa8] sm:$0xff] %v2740_v14  ;;  %v3563_v22 = vpop.f32.mrb[136].mxu1  ;;  %v3641_v9 = vpop.f32.mrb[136].mxu0 }
 0x20b   : > { %v2591_v28 = vadd.f32 %v3641_v9, %v2430_v35  ;;  %v3564_v36 = vpop.f32.mrb[137].mxu1  ;;  %v2582_v59 = vpop.f32.mrb[137].mxu0 }
 0x20c   : > { %v3565_v2 = vadd.f32 %v3564_v36, %v3563_v22  ;;  %v2583_v11 = vadd.f32 %v2582_v59, %v2422_v44  ;;  %v3566_v27 = vpop.f32.mrb[138].mxu1  ;;  %v3642_v12 = vpop.f32.mrb[138].mxu0 }
 0x20d   : > { %v2745_v34 = vadd.f32 %v4691_v41, %v2591_v28  ;;  %v2594_v61 = vadd.f32 %v3642_v12, %v2433_v49  ;;  %v3567_v23 = vpop.f32.mrb[139].mxu1  ;;  %v2585_v42 = vpop.f32.mrb[139].mxu0 }
 0x20e   : > { %v2743_v4 = vadd.f32 %v4691_v41, %v2583_v11  ;;  %v3568_v62 = vadd.f32 %v3567_v23, %v3566_v27  ;;  %v2586_v6 = vadd.f32 %v2585_v42, %v2425_v45  ;;  %v2438_v39 = vadd.f32 %v3565_v2, %v4664_v51 }
 0x20f   : > { %2777 = vst [vmem:[%s4697_s9 + $0xd0] sm:$0xff] %v2745_v34  ;;  %v2746_v54 = vadd.f32 %v4691_v41, %v2594_v61 }
 0x210   : > { %2775 = vst [vmem:[%s4697_s9 + $0xc0] sm:$0xff] %v2743_v4  ;;  %v2744_v3 = vadd.f32 %v4691_v41, %v2586_v6  ;;  %v2441_v13 = vadd.f32 %v3568_v62, %v4670_v7 }
 0x211   : > { %2778 = vst [vmem:[%s4697_s9 + $0xd8] sm:$0xff] %v2746_v54 }
 0x212   : > { %2776 = vst [vmem:[%s4697_s9 + $0xc8] sm:$0xff] %v2744_v3  ;;  %v3569_v0 = vpop.f32.mrb[140].mxu1  ;;  %v3645_v8 = vpop.f32.mrb[140].mxu0 }
 0x213   : > { %v3570_v15 = vpop.f32.mrb[141].mxu1  ;;  %v2598_v32 = vpop.f32.mrb[141].mxu0 }
 0x214   : > { %v3571_v50 = vadd.f32 %v3570_v15, %v3569_v0  ;;  %v2599_v40 = vadd.f32 %v2598_v32, %v2438_v39  ;;  %v3572_v51 = vpop.f32.mrb[142].mxu1  ;;  %v3646_v33 = vpop.f32.mrb[142].mxu0 }
 0x215   : > { %v3573_v25 = vpop.f32.mrb[143].mxu1  ;;  %v2601_v58 = vpop.f32.mrb[143].mxu0 }
 0x216   : > { %v2446_v10 = vadd.f32 %v3571_v50, %v4676_v5  ;;  %v2747_v7 = vadd.f32 %v4691_v41, %v2599_v40  ;;  %v3574_v21 = vadd.f32 %v3573_v25, %v3572_v51  ;;  %v2602_v24 = vadd.f32 %v2601_v58, %v2441_v13 }
 0x218   : > { %v2607_v37 = vadd.f32 %v3645_v8, %v2446_v10  ;;  %2779 = vst [vmem:[%s4697_s9 + $0xe0] sm:$0xff] %v2747_v7  ;;  %v2449_v20 = vadd.f32 %v3574_v21, %v4682_v26  ;;  %v2748_v46 = vadd.f32 %v4691_v41, %v2602_v24 }
 0x21a   : > { %v2749_v44 = vadd.f32 %v4691_v41, %v2607_v37  ;;  %v2610_v31 = vadd.f32 %v3646_v33, %v2449_v20  ;;  %2780 = vst [vmem:[%s4697_s9 + $0xe8] sm:$0xff] %v2748_v46 }
 0x21c   : > { %2781 = vst [vmem:[%s4697_s9 + $0xf0] sm:$0xff] %v2749_v44  ;;  %v2750_v57 = vadd.f32 %v4691_v41, %v2610_v31 }
 0x21e   : > { %2782 = vst [vmem:[%s4697_s9 + $0xf8] sm:$0xff] %v2750_v57 }
 0x21f PF: > { %s13_s14 = sadd.s32 1, %s3990_s14   ;;  %s4816_s12 = smov %s3986_s13 }
 0x220   : > { %p10_p5 = scmp.ge.s32.totalorder %s13_s14, 4   ;;  %s4817_s13 = smov %s4819_s15 }
 0x222   :  { %12 = sbr.rel (!%p10_p5) target bundleno = 2 (0x2), region = 76 }

// kernel: resnet_block_adain.11
= control target key start
LH: loop header
LB: loop body
LE: loop exit
PB: predicated region body
PF: predicated region fallthrough
CT: control target
= control target key end

     0   :  { %9 = vsyncpa [#allocation3], 0  ;;  %s1540_s0 = inlined_call_operand.vmem [shape: f32[2,256,128], index: 0, kind: input, shape index: {}]   ;;  %s1541_s1 = inlined_call_operand.vmem [shape: f32[2,1,128], index: 1, kind: input, shape index: {}]   ;;  %s1542_s2 = inlined_call_operand.vmem [shape: f32[2,1,128], index: 2, kind: input, shape index: {}]   ;;  %s1543_s3 = inlined_call_operand.vmem [shape: f32[2,256,128], index: 3, kind: input, shape index: {}]   ;;  %s1544_s4 = inlined_call_operand.hbm [shape: f32[2,256,128], index: 4, kind: output, shape index: {}]  }
   0x1   :  { %11 = vsyncpa [#allocation3 + $0x1], 0  ;;  %s885_s15 = smov 0   ;;  %s887_s16 = smov 0  }
   0x2   :  { %s889_s17 = smov 0   ;;  %s891_s18 = smov 0  }
   0x3 LB: > { %s906_s19 = sadd.s32 4294967295, %s855_s18   ;;  %s731_s20 = sadd.s32 4294967294, %s855_s18   ;;  %s855_s18 = sphi %s891_s18, %s1550_s18   ;;  %s851_s17 = sphi %s889_s17, %s1549_s17   ;;  %s847_s16 = sphi %s887_s16, %s1548_s16   ;;  %s843_s15 = sphi %s885_s15, %s1547_s15  }
   0x4   : > { %s910_s21 = sadd.s32 1, %s855_s18   ;;  %s128_s22 = sadd.s32 1, %s851_s17 }
   0x5   : > { %s125_s23 = ssub.s32 %s855_s18, %s910_s21  ;;  %p138_p0 = scmp.ne.s32.totalorder %s851_s17, %s847_s16 }
   0x6   : > { %p126_p1 = scmp.eq.s32.totalorder %s125_s23, 0  ;;  %p139_p2 = scmp.eq.s32.totalorder %s906_s19, 1 }
   0x7   : > { %p144_p3 = scmp.ne.s32.totalorder %s847_s16, %s843_s15  ;;  %p145_p4 = scmp.eq.s32.totalorder %s731_s20, 1 }
   0x8   : > { %s921_s24 = scalar_select %p126_p1, %s851_s17, %s128_s22  }
   0x9   : > { %p923_p5 = por %p139_p2, %p138_p0  ;;  %p927_p6 = por %p145_p4, %p144_p3 }
   0xa   : > { %p734_p7 = scmp.ge.s32.totalorder %s855_s18, 1  ;;  %p191_p8 = scmp.lt.s32.totalorder %s855_s18, 3 }
   0xc   : > { %p192_p9 = pnand %p734_p7, %p191_p8 }
   0xd   : > { %p228_p10 = scmp.lt.s32.totalorder (!%p192_p9), %s906_s19, 1  ;;  %s225_s12 = sand.u32 (!%p192_p9), 1, %s847_s16  }
   0xe   : > { %195 = sbr.rel (%p192_p9) target bundleno = 248 (0xf8), region = 36  ;;  %s1307_s22 = sshll.u32 (!%p192_p9), %s225_s12, 8 }
   0xf   : > { %s1334_s23 = scalar_lea.vmem (!%p192_p9), [#allocation2], %s1307_s22  ;;  %s857_s7 = smov (!%p192_p9), [#allocation2]  }
  0x15   : > { %s935_s27 = scalar_select %p228_p10, %s906_s19, 1 }
  0x17   : > { %s747_s28 = sshll.u32 %s935_s27, 8  ;;  %s235_s8 = scalar_lea.vmem %s1541_s1, %s935_s27 }
  0x18   : > { %s943_s5 = scalar_lea.vmem %s1540_s0, %s747_s28  ;;  %s238_s11 = scalar_lea.vmem %s1542_s2, %s935_s27 }
  0x19   : > { %v946_v0 = vld [vmem:[%s943_s5] sm:$0xff]  ;;  %v949_v1 = vld [vmem:[%s943_s5 + $0x8] sm:$0xff]  ;;  %v952_v2 = vld [vmem:[%s943_s5 + $0x10] sm:$0xff]  ;;  %s1283_s20 = scalar_lea.vmem %s1543_s3, %s747_s28  ;;  %s749_s27 = sshll.u32 %s906_s19, 12 }
  0x1a   : > { %v276_v3 = vadd.f32 %v949_v1, %v946_v0  ;;  %v957_v4 = vld [vmem:[%s943_s5 + $0x18] sm:$0xff]  ;;  %v961_v6 = vld [vmem:[%s943_s5 + $0x20] sm:$0xff]  ;;  %v965_v8 = vld [vmem:[%s943_s5 + $0x28] sm:$0xff]  ;;  %s639_s28 = sshll.u32 %s1334_s23, 4  ;;  %s1485_s30 = scalar_lea.hbm %s1544_s4, %s749_s27  ;;  %s1487_s28 = int_to_ptr.vmem [resolvable:$true] %s639_s28 }
  0x1b   : > { %v969_v10 = vld [vmem:[%s943_s5 + $0x30] sm:$0xff]  ;;  %v973_v12 = vld [vmem:[%s943_s5 + $0x38] sm:$0xff]  ;;  %v977_v14 = vld [vmem:[%s943_s5 + $0x40] sm:$0xff]  ;;  %s793_s6 = scalar_lea.vmem %s1487_s28, 4096 }
  0x1c   : > { %v277_v5 = vadd.f32 %v276_v3, %v952_v2  ;;  %v981_v16 = vld [vmem:[%s943_s5 + $0x48] sm:$0xff]  ;;  %v985_v18 = vld [vmem:[%s943_s5 + $0x50] sm:$0xff]  ;;  %v989_v20 = vld [vmem:[%s943_s5 + $0x58] sm:$0xff]  ;;  %p794_p11 = scmp.ne.s32.totalorder %s1487_s28, %s793_s6 }
  0x1d   : > { %v993_v22 = vld [vmem:[%s943_s5 + $0x60] sm:$0xff]  ;;  %v997_v24 = vld [vmem:[%s943_s5 + $0x68] sm:$0xff]  ;;  %v1001_v26 = vld [vmem:[%s943_s5 + $0x70] sm:$0xff] }
  0x1e   : > { %v278_v7 = vadd.f32 %v277_v5, %v957_v4  ;;  %v1005_v28 = vld [vmem:[%s943_s5 + $0x78] sm:$0xff]  ;;  %v1009_v30 = vld [vmem:[%s943_s5 + $0x80] sm:$0xff]  ;;  %v1013_v32 = vld [vmem:[%s943_s5 + $0x88] sm:$0xff]  ;;  %p795_p12 = pnand %p794_p11, %p923_p5 }
  0x1f   : > { %v1017_v34 = vld [vmem:[%s943_s5 + $0x90] sm:$0xff]  ;;  %v1021_v36 = vld [vmem:[%s943_s5 + $0x98] sm:$0xff]  ;;  %v1025_v38 = vld [vmem:[%s943_s5 + $0xa0] sm:$0xff] }
  0x20   : > { %v279_v9 = vadd.f32 %v278_v7, %v961_v6  ;;  %v1029_v40 = vld [vmem:[%s943_s5 + $0xa8] sm:$0xff]  ;;  %v1033_v42 = vld [vmem:[%s943_s5 + $0xb0] sm:$0xff]  ;;  %v1037_v44 = vld [vmem:[%s943_s5 + $0xb8] sm:$0xff]  ;;  %p796_p13 = pneg %p795_p12 }
  0x21   : > { %v1041_v46 = vld [vmem:[%s943_s5 + $0xc0] sm:$0xff]  ;;  %v1045_v48 = vld [vmem:[%s943_s5 + $0xc8] sm:$0xff]  ;;  %v1049_v50 = vld [vmem:[%s943_s5 + $0xd0] sm:$0xff] }
  0x22   : > { %v280_v11 = vadd.f32 %v279_v9, %v965_v8  ;;  %v1053_v52 = vld [vmem:[%s943_s5 + $0xd8] sm:$0xff]  ;;  %v1057_v54 = vld [vmem:[%s943_s5 + $0xe0] sm:$0xff]  ;;  %v1061_v56 = vld [vmem:[%s943_s5 + $0xe8] sm:$0xff] }
  0x23   : > { %v1065_v58 = vld [vmem:[%s943_s5 + $0xf0] sm:$0xff]  ;;  %v1069_v60 = vld [vmem:[%s943_s5 + $0xf8] sm:$0xff]  ;;  %s1499_s5 = scalar_lea.sflag [#allocation3], %s225_s12 }
  0x24   : > { %v281_v13 = vadd.f32 %v280_v11, %v969_v10 }
  0x26   : > { %v282_v15 = vadd.f32 %v281_v13, %v973_v12 }
  0x28   : > { %v283_v17 = vadd.f32 %v282_v15, %v977_v14 }
  0x2a   : > { %v284_v19 = vadd.f32 %v283_v17, %v981_v16 }
  0x2c   : > { %v285_v21 = vadd.f32 %v284_v19, %v985_v18 }
  0x2e   : > { %v286_v23 = vadd.f32 %v285_v21, %v989_v20 }
  0x30   : > { %v287_v25 = vadd.f32 %v286_v23, %v993_v22 }
  0x32   : > { %v288_v27 = vadd.f32 %v287_v25, %v997_v24 }
  0x34   : > { %v289_v29 = vadd.f32 %v288_v27, %v1001_v26 }
  0x36   : > { %v290_v31 = vadd.f32 %v289_v29, %v1005_v28 }
  0x38   : > { %v291_v33 = vadd.f32 %v290_v31, %v1009_v30 }
  0x3a   : > { %v292_v35 = vadd.f32 %v291_v33, %v1013_v32 }
  0x3c   : > { %v293_v37 = vadd.f32 %v292_v35, %v1017_v34 }
  0x3e   : > { %v294_v39 = vadd.f32 %v293_v37, %v1021_v36 }
  0x40   : > { %v295_v41 = vadd.f32 %v294_v39, %v1025_v38 }
  0x42   : > { %v296_v43 = vadd.f32 %v295_v41, %v1029_v40 }
  0x44   : > { %v297_v45 = vadd.f32 %v296_v43, %v1033_v42 }
  0x46   : > { %v298_v47 = vadd.f32 %v297_v45, %v1037_v44 }
  0x48   : > { %v299_v49 = vadd.f32 %v298_v47, %v1041_v46 }
  0x4a   : > { %v300_v51 = vadd.f32 %v299_v49, %v1045_v48 }
  0x4c   : > { %v301_v53 = vadd.f32 %v300_v51, %v1049_v50 }
  0x4e   : > { %v302_v55 = vadd.f32 %v301_v53, %v1053_v52 }
  0x50   : > { %v303_v57 = vadd.f32 %v302_v55, %v1057_v54 }
  0x52   : > { %v304_v59 = vadd.f32 %v303_v57, %v1061_v56 }
  0x54   : > { %v305_v61 = vadd.f32 %v304_v59, %v1065_v58 }
  0x56   : > { %v306_v62 = vadd.f32 %v305_v61, %v1069_v60 }
  0x58   : > { %v307_v63 = vrot.slane %v306_v62, 4 }
  0x5a   : > { %v308_v3 = vadd.f32 %v307_v63, %v306_v62 }
  0x5c   : > { %v309_v5 = vrot.slane %v308_v3, 2 }
  0x5e   : > { %v310_v7 = vadd.f32 %v309_v5, %v308_v3 }
  0x60   : > { %v311_v9 = vrot.slane %v310_v7, 1 }
  0x62   : > { %v312_v11 = vadd.f32 %v311_v9, %v310_v7 }
  0x64   : > { %v1073_v13 = vmul.f32 0.00390625, %v312_v11 }
  0x66   : > { %v1077_v15 = vsub.f32 %v946_v0, %v1073_v13  ;;  %v1081_v17 = vsub.f32 %v949_v1, %v1073_v13  ;;  %v1085_v19 = vsub.f32 %v952_v2, %v1073_v13  ;;  %v1089_v21 = vsub.f32 %v957_v4, %v1073_v13 }
  0x67   : > { %v1097_v0 = vsub.f32 %v961_v6, %v1073_v13  ;;  %v1103_v2 = vsub.f32 %v965_v8, %v1073_v13  ;;  %v1109_v29 = vsub.f32 %v969_v10, %v1073_v13  ;;  %v1115_v33 = vsub.f32 %v973_v12, %v1073_v13 }
  0x68   : > { %v347_v23 = vmul.f32 %v1077_v15, %v1077_v15  ;;  %v348_v25 = vmul.f32 %v1081_v17, %v1081_v17  ;;  %v349_v1 = vmul.f32 %v1085_v19, %v1085_v19  ;;  %v350_v4 = vmul.f32 %v1089_v21, %v1089_v21 }
  0x69   : > { %v351_v31 = vmul.f32 %v1097_v0, %v1097_v0  ;;  %v352_v8 = vmul.f32 %v1103_v2, %v1103_v2  ;;  %v1121_v37 = vsub.f32 %v977_v14, %v1073_v13  ;;  %v353_v10 = vmul.f32 %v1109_v29, %v1109_v29 }
  0x6a   : > { %v379_v27 = vadd.f32 %v348_v25, %v347_v23  ;;  %v1127_v41 = vsub.f32 %v981_v16, %v1073_v13  ;;  %v354_v12 = vmul.f32 %v1115_v33, %v1115_v33  ;;  %v1133_v45 = vsub.f32 %v985_v18, %v1073_v13 }
  0x6b   : > { %v355_v14 = vmul.f32 %v1121_v37, %v1121_v37  ;;  %v1139_v49 = vsub.f32 %v989_v20, %v1073_v13  ;;  %v1145_v53 = vsub.f32 %v993_v22, %v1073_v13  ;;  %v1151_v57 = vsub.f32 %v997_v24, %v1073_v13 }
  0x6c   : > { %v380_v6 = vadd.f32 %v379_v27, %v349_v1  ;;  %v356_v16 = vmul.f32 %v1127_v41, %v1127_v41  ;;  %v357_v18 = vmul.f32 %v1133_v45, %v1133_v45  ;;  %v1157_v61 = vsub.f32 %v1001_v26, %v1073_v13 }
  0x6d   : > { %v358_v20 = vmul.f32 %v1139_v49, %v1139_v49  ;;  %v359_v22 = vmul.f32 %v1145_v53, %v1145_v53  ;;  %v1163_v63 = vsub.f32 %v1005_v28, %v1073_v13  ;;  %v360_v24 = vmul.f32 %v1151_v57, %v1151_v57 }
  0x6e   : > { %v381_v35 = vadd.f32 %v380_v6, %v350_v4  ;;  %v1169_v5 = vsub.f32 %v1009_v30, %v1073_v13  ;;  %v361_v26 = vmul.f32 %v1157_v61, %v1157_v61  ;;  %v1175_v9 = vsub.f32 %v1013_v32, %v1073_v13 }
  0x6f   : > { %v362_v28 = vmul.f32 %v1163_v63, %v1163_v63  ;;  %v1181_v23 = vsub.f32 %v1017_v34, %v1073_v13  ;;  %v1187_v1 = vsub.f32 %v1021_v36, %v1073_v13  ;;  %v1193_v27 = vsub.f32 %v1025_v38, %v1073_v13 }
  0x70   : > { %v382_v39 = vadd.f32 %v381_v35, %v351_v31  ;;  %v363_v30 = vmul.f32 %v1169_v5, %v1169_v5  ;;  %v364_v32 = vmul.f32 %v1175_v9, %v1175_v9  ;;  %v1199_v6 = vsub.f32 %v1029_v40, %v1073_v13 }
  0x71   : > { %v365_v34 = vmul.f32 %v1181_v23, %v1181_v23  ;;  %v366_v36 = vmul.f32 %v1187_v1, %v1187_v1  ;;  %v1205_v35 = vsub.f32 %v1033_v42, %v1073_v13  ;;  %v367_v38 = vmul.f32 %v1193_v27, %v1193_v27 }
  0x72   : > { %v383_v43 = vadd.f32 %v382_v39, %v352_v8  ;;  %v1211_v39 = vsub.f32 %v1037_v44, %v1073_v13  ;;  %v368_v40 = vmul.f32 %v1199_v6, %v1199_v6 }
  0x73   : > { %v369_v42 = vmul.f32 %v1205_v35, %v1205_v35 }
  0x74   : > { %v384_v47 = vadd.f32 %v383_v43, %v353_v10  ;;  %v1217_v43 = vsub.f32 %v1041_v46, %v1073_v13  ;;  %v370_v44 = vmul.f32 %v1211_v39, %v1211_v39 }
  0x76   : > { %v385_v51 = vadd.f32 %v384_v47, %v354_v12  ;;  %v1223_v47 = vsub.f32 %v1045_v48, %v1073_v13  ;;  %v371_v46 = vmul.f32 %v1217_v43, %v1217_v43 }
  0x78   : > { %v386_v55 = vadd.f32 %v385_v51, %v355_v14  ;;  %v1229_v51 = vsub.f32 %v1049_v50, %v1073_v13  ;;  %v372_v48 = vmul.f32 %v1223_v47, %v1223_v47 }
  0x7a   : > { %v387_v59 = vadd.f32 %v386_v55, %v356_v16  ;;  %v1235_v55 = vsub.f32 %v1053_v52, %v1073_v13  ;;  %v373_v50 = vmul.f32 %v1229_v51, %v1229_v51 }
  0x7c   : > { %v388_v62 = vadd.f32 %v387_v59, %v357_v18  ;;  %v1241_v59 = vsub.f32 %v1057_v54, %v1073_v13  ;;  %v374_v52 = vmul.f32 %v1235_v55, %v1235_v55 }
  0x7e   : > { %v389_v3 = vadd.f32 %v388_v62, %v358_v20  ;;  %v1247_v62 = vsub.f32 %v1061_v56, %v1073_v13  ;;  %v375_v54 = vmul.f32 %v1241_v59, %v1241_v59 }
  0x80   : > { %v390_v7 = vadd.f32 %v389_v3, %v359_v22  ;;  %v1253_v3 = vsub.f32 %v1065_v58, %v1073_v13  ;;  %v376_v56 = vmul.f32 %v1247_v62, %v1247_v62 }
  0x82   : > { %v391_v11 = vadd.f32 %v390_v7, %v360_v24  ;;  %v1259_v7 = vsub.f32 %v1069_v60, %v1073_v13 }
  0x84   : > { %v392_v25 = vadd.f32 %v391_v11, %v361_v26  ;;  %v377_v11 = vmul.f32 %v1253_v3, %v1253_v3  ;;  %v378_v58 = vmul.f32 %v1259_v7, %v1259_v7 }
  0x86   : > { %v393_v4 = vadd.f32 %v392_v25, %v362_v28 }
  0x88   : > { %v394_v31 = vadd.f32 %v393_v4, %v363_v30 }
  0x8a   : > { %v395_v8 = vadd.f32 %v394_v31, %v364_v32 }
  0x8c   : > { %v396_v10 = vadd.f32 %v395_v8, %v365_v34 }
  0x8e   : > { %v397_v12 = vadd.f32 %v396_v10, %v366_v36 }
  0x90   : > { %v398_v14 = vadd.f32 %v397_v12, %v367_v38  ;;  %v1285_v12 = vld [vmem:[%s235_s8] ss:$0 sm:$0xff]  ;;  %s797_s8 = sshll.u32 %s857_s7, 4  ;;  %s798_s8 = int_to_ptr.vmem [resolvable:$false] %s797_s8 }
  0x91   : > { %s799_s9 = scalar_lea.vmem %s798_s8, 8192  ;;  %p800_p0 = scmp.lt.s32.totalorder %s1487_s28, %s798_s8 }
  0x92   : > { %v399_v16 = vadd.f32 %v398_v14, %v368_v40  ;;  %p801_p1 = scmp.lt.s32.totalorder %s799_s9, %s793_s6 }
  0x94   : > { %v400_v18 = vadd.f32 %v399_v16, %v369_v42  ;;  %p802_p2 = por %p801_p1, %p800_p0 }
  0x96   : > { %v401_v20 = vadd.f32 %v400_v18, %v370_v44  ;;  %p803_p3 = pnand %p802_p2, %p796_p13 }
  0x98   : > { %v402_v22 = vadd.f32 %v401_v20, %v371_v46  ;;  %v1295_v46 = vld [vmem:[%s238_s11] ss:$0 sm:$0xff] }
  0x9a   : > { %v403_v24 = vadd.f32 %v402_v22, %v372_v48  ;;  %v532_v22 = vld [vmem:[%s1283_s20 + $0x18] sm:$0xff] }
  0x9c   : > { %v404_v26 = vadd.f32 %v403_v24, %v373_v50 }
  0x9e   : > { %v405_v28 = vadd.f32 %v404_v26, %v374_v52  ;;  %v533_v52 = vld [vmem:[%s1283_s20 + $0x20] sm:$0xff] }
  0xa0   : > { %v406_v30 = vadd.f32 %v405_v28, %v375_v54 }
  0xa2   : > { %v407_v25 = vadd.f32 %v406_v30, %v376_v56 }
  0xa4   : > { %v408_v32 = vadd.f32 %v407_v25, %v377_v11  ;;  %v535_v25 = vld [vmem:[%s1283_s20 + $0x30] sm:$0xff] }
  0xa6   : > { %v409_v4 = vadd.f32 %v408_v32, %v378_v58  ;;  %v534_v58 = vld [vmem:[%s1283_s20 + $0x28] sm:$0xff]  ;;  %v536_v32 = vld [vmem:[%s1283_s20 + $0x38] sm:$0xff] }
  0xa8   : > { %v410_v60 = vrot.slane %v409_v4, 4 }
  0xaa   : > { %v411_v13 = vadd.f32 %v410_v60, %v409_v4 }
  0xac   : > { %v412_v34 = vrot.slane %v411_v13, 2 }
  0xae   : > { %v413_v31 = vadd.f32 %v412_v34, %v411_v13 }
  0xb0   : > { %v414_v36 = vrot.slane %v413_v31, 1 }
  0xb2   : > { %v415_v8 = vadd.f32 %v414_v36, %v413_v31 }
  0xb4   : > { %v416_v38 = vmul.f32 0.00390625, %v415_v8 }
  0xb6   : > { %v417_v10 = vadd.f32 1e-08, %v416_v38 }
  0xb8   : > { %791 = vrsqrt.f32 %v417_v10 }
  0xc2   : > { %v1275_v40 = vpop.eup %791 }
  0xc3   : > { %v419_v42 = vmul.f32 %v1275_v40, %v1077_v15  ;;  %v420_v14 = vmul.f32 %v1275_v40, %v1081_v17  ;;  %v421_v44 = vmul.f32 %v1275_v40, %v1085_v19  ;;  %v422_v16 = vmul.f32 %v1275_v40, %v1089_v21  ;;  %v529_v21 = vld [vmem:[%s1283_s20] sm:$0xff] }
  0xc4   : > { %v423_v18 = vmul.f32 %v1275_v40, %v1097_v0  ;;  %v424_v15 = vmul.f32 %v1275_v40, %v1103_v2  ;;  %v425_v48 = vmul.f32 %v1275_v40, %v1109_v29  ;;  %v426_v17 = vmul.f32 %v1275_v40, %v1115_v33  ;;  %v530_v0 = vld [vmem:[%s1283_s20 + $0x8] sm:$0xff]  ;;  %v531_v29 = vld [vmem:[%s1283_s20 + $0x10] sm:$0xff] }
  0xc5   : > { %v458_v19 = vmul.f32 %v1285_v12, %v419_v42  ;;  %v459_v20 = vmul.f32 %v1285_v12, %v420_v14  ;;  %v460_v2 = vmul.f32 %v1285_v12, %v421_v44  ;;  %v461_v50 = vmul.f32 %v1285_v12, %v422_v16 }
  0xc6   : > { %v462_v33 = vmul.f32 %v1285_v12, %v423_v18  ;;  %v463_v24 = vmul.f32 %v1285_v12, %v424_v15  ;;  %v464_v54 = vmul.f32 %v1285_v12, %v425_v48  ;;  %v465_v26 = vmul.f32 %v1285_v12, %v426_v17 }
  0xc7   : > { %v497_v56 = vadd.f32 %v1295_v46, %v458_v19  ;;  %v498_v28 = vadd.f32 %v1295_v46, %v459_v20  ;;  %v499_v11 = vadd.f32 %v1295_v46, %v460_v2  ;;  %v500_v30 = vadd.f32 %v1295_v46, %v461_v50  ;;  %v537_v19 = vld [vmem:[%s1283_s20 + $0x40] sm:$0xff]  ;;  %v538_v20 = vld [vmem:[%s1283_s20 + $0x48] sm:$0xff]  ;;  %v540_v2 = vld [vmem:[%s1283_s20 + $0x58] sm:$0xff] }
  0xc8   : > { %v501_v4 = vadd.f32 %v1295_v46, %v462_v33  ;;  %v502_v60 = vadd.f32 %v1295_v46, %v463_v24  ;;  %v503_v13 = vadd.f32 %v1295_v46, %v464_v54  ;;  %v504_v34 = vadd.f32 %v1295_v46, %v465_v26  ;;  %v541_v50 = vld [vmem:[%s1283_s20 + $0x60] sm:$0xff]  ;;  %v542_v26 = vld [vmem:[%s1283_s20 + $0x68] sm:$0xff] }
  0xc9   : > { %v561_v31 = vadd.f32 %v529_v21, %v497_v56  ;;  %v562_v36 = vadd.f32 %v530_v0, %v498_v28  ;;  %v563_v8 = vadd.f32 %v531_v29, %v499_v11  ;;  %v564_v38 = vadd.f32 %v532_v22, %v500_v30  ;;  %v543_v56 = vld [vmem:[%s1283_s20 + $0x70] sm:$0xff]  ;;  %v544_v28 = vld [vmem:[%s1283_s20 + $0x78] sm:$0xff] }
  0xca   : > { %v565_v10 = vadd.f32 %v533_v52, %v501_v4  ;;  %v566_v42 = vadd.f32 %v534_v58, %v502_v60  ;;  %v567_v14 = vadd.f32 %v535_v25, %v503_v13  ;;  %v568_v44 = vadd.f32 %v536_v32, %v504_v34 }
  0xcb   : > { %593 = vst [vmem:[%s1334_s23] sm:$0xff] %v561_v31  ;;  %594 = vst [vmem:[%s1334_s23 + $0x8] sm:$0xff] %v562_v36  ;;  %v427_v16 = vmul.f32 %v1275_v40, %v1121_v37  ;;  %v428_v18 = vmul.f32 %v1275_v40, %v1127_v41  ;;  %v429_v15 = vmul.f32 %v1275_v40, %v1133_v45 }
  0xcc   : > { %595 = vst [vmem:[%s1334_s23 + $0x10] sm:$0xff] %v563_v8  ;;  %596 = vst [vmem:[%s1334_s23 + $0x18] sm:$0xff] %v564_v38  ;;  %v430_v48 = vmul.f32 %v1275_v40, %v1139_v49  ;;  %v431_v17 = vmul.f32 %v1275_v40, %v1145_v53  ;;  %v432_v37 = vmul.f32 %v1275_v40, %v1151_v57  ;;  %v539_v57 = vld [vmem:[%s1283_s20 + $0x50] sm:$0xff] }
  0xcd   : > { %597 = vst [vmem:[%s1334_s23 + $0x20] sm:$0xff] %v565_v10  ;;  %598 = vst [vmem:[%s1334_s23 + $0x28] sm:$0xff] %v566_v42  ;;  %v433_v41 = vmul.f32 %v1275_v40, %v1157_v61  ;;  %v434_v45 = vmul.f32 %v1275_v40, %v1163_v63  ;;  %v466_v49 = vmul.f32 %v1285_v12, %v427_v16  ;;  %v545_v16 = vld [vmem:[%s1283_s20 + $0x80] sm:$0xff] }
  0xce   : > { %599 = vst [vmem:[%s1334_s23 + $0x30] sm:$0xff] %v567_v14  ;;  %600 = vst [vmem:[%s1334_s23 + $0x38] sm:$0xff] %v568_v44  ;;  %v467_v21 = vmul.f32 %v1285_v12, %v428_v18  ;;  %v468_v53 = vmul.f32 %v1285_v12, %v429_v15  ;;  %v469_v0 = vmul.f32 %v1285_v12, %v430_v48  ;;  %v546_v15 = vld [vmem:[%s1283_s20 + $0x88] sm:$0xff] }
  0xcf   : > { %v470_v61 = vmul.f32 %v1285_v12, %v431_v17  ;;  %v471_v63 = vmul.f32 %v1285_v12, %v432_v37  ;;  %v472_v29 = vmul.f32 %v1285_v12, %v433_v41  ;;  %v473_v22 = vmul.f32 %v1285_v12, %v434_v45  ;;  %v548_v17 = vld [vmem:[%s1283_s20 + $0x98] sm:$0xff]  ;;  %v549_v37 = vld [vmem:[%s1283_s20 + $0xa0] sm:$0xff] }
  0xd0   : > { %v505_v33 = vadd.f32 %v1295_v46, %v466_v49  ;;  %v506_v52 = vadd.f32 %v1295_v46, %v467_v21  ;;  %v507_v24 = vadd.f32 %v1295_v46, %v468_v53  ;;  %v508_v54 = vadd.f32 %v1295_v46, %v469_v0  ;;  %v550_v53 = vld [vmem:[%s1283_s20 + $0xa8] sm:$0xff]  ;;  %v551_v0 = vld [vmem:[%s1283_s20 + $0xb0] sm:$0xff] }
  0xd1   : > { %v509_v11 = vadd.f32 %v1295_v46, %v470_v61  ;;  %v510_v30 = vadd.f32 %v1295_v46, %v471_v63  ;;  %v511_v58 = vadd.f32 %v1295_v46, %v472_v29  ;;  %v512_v25 = vadd.f32 %v1295_v46, %v473_v22 }
  0xd2   : > { %v569_v32 = vadd.f32 %v537_v19, %v505_v33  ;;  %v570_v4 = vadd.f32 %v538_v20, %v506_v52  ;;  %v571_v60 = vadd.f32 %v539_v57, %v507_v24  ;;  %v572_v13 = vadd.f32 %v540_v2, %v508_v54  ;;  %v552_v57 = vld [vmem:[%s1283_s20 + $0xb8] sm:$0xff] }
  0xd3   : > { %v573_v34 = vadd.f32 %v541_v50, %v509_v11  ;;  %v574_v31 = vadd.f32 %v542_v26, %v510_v30  ;;  %v575_v36 = vadd.f32 %v543_v56, %v511_v58  ;;  %v576_v8 = vadd.f32 %v544_v28, %v512_v25 }
  0xd4   : > { %601 = vst [vmem:[%s1334_s23 + $0x40] sm:$0xff] %v569_v32  ;;  %602 = vst [vmem:[%s1334_s23 + $0x48] sm:$0xff] %v570_v4  ;;  %v435_v38 = vmul.f32 %v1275_v40, %v1169_v5  ;;  %v436_v10 = vmul.f32 %v1275_v40, %v1175_v9  ;;  %v437_v42 = vmul.f32 %v1275_v40, %v1181_v23  ;;  %v553_v32 = vld [vmem:[%s1283_s20 + $0xc0] sm:$0xff] }
  0xd5   : > { %603 = vst [vmem:[%s1334_s23 + $0x50] sm:$0xff] %v571_v60  ;;  %604 = vst [vmem:[%s1334_s23 + $0x58] sm:$0xff] %v572_v13  ;;  %v438_v14 = vmul.f32 %v1275_v40, %v1187_v1  ;;  %v439_v44 = vmul.f32 %v1275_v40, %v1193_v27  ;;  %v440_v5 = vmul.f32 %v1275_v40, %v1199_v6  ;;  %v547_v6 = vld [vmem:[%s1283_s20 + $0x90] sm:$0xff]  ;;  %v554_v60 = vld [vmem:[%s1283_s20 + $0xc8] sm:$0xff] }
  0xd6   : > { %605 = vst [vmem:[%s1334_s23 + $0x60] sm:$0xff] %v573_v34  ;;  %606 = vst [vmem:[%s1334_s23 + $0x68] sm:$0xff] %v574_v31  ;;  %v441_v9 = vmul.f32 %v1275_v40, %v1205_v35  ;;  %v442_v23 = vmul.f32 %v1275_v40, %v1211_v39  ;;  %v474_v1 = vmul.f32 %v1285_v12, %v435_v38  ;;  %v555_v13 = vld [vmem:[%s1283_s20 + $0xd0] sm:$0xff]  ;;  %v556_v34 = vld [vmem:[%s1283_s20 + $0xd8] sm:$0xff] }
  0xd7   : > { %607 = vst [vmem:[%s1334_s23 + $0x70] sm:$0xff] %v575_v36  ;;  %608 = vst [vmem:[%s1334_s23 + $0x78] sm:$0xff] %v576_v8  ;;  %v475_v18 = vmul.f32 %v1285_v12, %v436_v10  ;;  %v476_v27 = vmul.f32 %v1285_v12, %v437_v42  ;;  %v477_v48 = vmul.f32 %v1285_v12, %v438_v14  ;;  %v557_v31 = vld [vmem:[%s1283_s20 + $0xe0] sm:$0xff]  ;;  %v558_v14 = vld [vmem:[%s1283_s20 + $0xe8] sm:$0xff] }
  0xd8   : > { %v478_v35 = vmul.f32 %v1285_v12, %v439_v44  ;;  %v479_v39 = vmul.f32 %v1285_v12, %v440_v5  ;;  %v480_v41 = vmul.f32 %v1285_v12, %v441_v9  ;;  %v481_v45 = vmul.f32 %v1285_v12, %v442_v23  ;;  %v559_v44 = vld [vmem:[%s1283_s20 + $0xf0] sm:$0xff]  ;;  %v560_v5 = vld [vmem:[%s1283_s20 + $0xf8] sm:$0xff] }
  0xd9   : > { %v513_v49 = vadd.f32 %v1295_v46, %v474_v1  ;;  %v514_v19 = vadd.f32 %v1295_v46, %v475_v18  ;;  %v515_v21 = vadd.f32 %v1295_v46, %v476_v27  ;;  %v516_v20 = vadd.f32 %v1295_v46, %v477_v48 }
  0xda   : > { %v517_v2 = vadd.f32 %v1295_v46, %v478_v35  ;;  %v518_v61 = vadd.f32 %v1295_v46, %v479_v39  ;;  %v519_v50 = vadd.f32 %v1295_v46, %v480_v41  ;;  %v520_v63 = vadd.f32 %v1295_v46, %v481_v45 }
  0xdb   : > { %v577_v29 = vadd.f32 %v545_v16, %v513_v49  ;;  %v578_v22 = vadd.f32 %v546_v15, %v514_v19  ;;  %v579_v33 = vadd.f32 %v547_v6, %v515_v21  ;;  %v580_v52 = vadd.f32 %v548_v17, %v516_v20 }
  0xdc   : > { %v581_v24 = vadd.f32 %v549_v37, %v517_v2  ;;  %v582_v54 = vadd.f32 %v550_v53, %v518_v61  ;;  %v583_v26 = vadd.f32 %v551_v0, %v519_v50  ;;  %v584_v56 = vadd.f32 %v552_v57, %v520_v63 }
  0xdd   : > { %609 = vst [vmem:[%s1334_s23 + $0x80] sm:$0xff] %v577_v29  ;;  %610 = vst [vmem:[%s1334_s23 + $0x88] sm:$0xff] %v578_v22  ;;  %v443_v28 = vmul.f32 %v1275_v40, %v1217_v43  ;;  %v444_v11 = vmul.f32 %v1275_v40, %v1223_v47  ;;  %v445_v30 = vmul.f32 %v1275_v40, %v1229_v51 }
  0xde   : > { %611 = vst [vmem:[%s1334_s23 + $0x90] sm:$0xff] %v579_v33  ;;  %612 = vst [vmem:[%s1334_s23 + $0x98] sm:$0xff] %v580_v52  ;;  %v446_v58 = vmul.f32 %v1275_v40, %v1235_v55  ;;  %v447_v25 = vmul.f32 %v1275_v40, %v1241_v59  ;;  %v448_v43 = vmul.f32 %v1275_v40, %v1247_v62 }
  0xdf   : > { %613 = vst [vmem:[%s1334_s23 + $0xa0] sm:$0xff] %v581_v24  ;;  %614 = vst [vmem:[%s1334_s23 + $0xa8] sm:$0xff] %v582_v54  ;;  %v449_v47 = vmul.f32 %v1275_v40, %v1253_v3  ;;  %v450_v51 = vmul.f32 %v1275_v40, %v1259_v7  ;;  %v482_v55 = vmul.f32 %v1285_v12, %v443_v28 }
  0xe0   : > { %615 = vst [vmem:[%s1334_s23 + $0xb0] sm:$0xff] %v583_v26  ;;  %616 = vst [vmem:[%s1334_s23 + $0xb8] sm:$0xff] %v584_v56  ;;  %v483_v4 = vmul.f32 %v1285_v12, %v444_v11  ;;  %v484_v59 = vmul.f32 %v1285_v12, %v445_v30  ;;  %v485_v62 = vmul.f32 %v1285_v12, %v446_v58 }
  0xe1   : > { %v486_v3 = vmul.f32 %v1285_v12, %v447_v25  ;;  %v487_v7 = vmul.f32 %v1285_v12, %v448_v43  ;;  %v488_v40 = vmul.f32 %v1285_v12, %v449_v47  ;;  %v489_v36 = vmul.f32 %v1285_v12, %v450_v51 }
  0xe2   : > { %v521_v8 = vadd.f32 %v1295_v46, %v482_v55  ;;  %v522_v38 = vadd.f32 %v1295_v46, %v483_v4  ;;  %v523_v10 = vadd.f32 %v1295_v46, %v484_v59  ;;  %v524_v42 = vadd.f32 %v1295_v46, %v485_v62 }
  0xe3   : > { %v525_v9 = vadd.f32 %v1295_v46, %v486_v3  ;;  %v526_v12 = vadd.f32 %v1295_v46, %v487_v7  ;;  %v527_v23 = vadd.f32 %v1295_v46, %v488_v40  ;;  %v528_v1 = vadd.f32 %v1295_v46, %v489_v36 }
  0xe4   : > { %v585_v16 = vadd.f32 %v553_v32, %v521_v8  ;;  %v586_v18 = vadd.f32 %v554_v60, %v522_v38  ;;  %v587_v15 = vadd.f32 %v555_v13, %v523_v10  ;;  %v588_v27 = vadd.f32 %v556_v34, %v524_v42 }
  0xe5   : > { %v589_v48 = vadd.f32 %v557_v31, %v525_v9  ;;  %v590_v46 = vadd.f32 %v558_v14, %v526_v12  ;;  %v591_v6 = vadd.f32 %v559_v44, %v527_v23  ;;  %v592_v17 = vadd.f32 %v560_v5, %v528_v1 }
  0xe6   : > { %617 = vst [vmem:[%s1334_s23 + $0xc0] sm:$0xff] %v585_v16  ;;  %618 = vst [vmem:[%s1334_s23 + $0xc8] sm:$0xff] %v586_v18 }
  0xe7   : > { %619 = vst [vmem:[%s1334_s23 + $0xd0] sm:$0xff] %v587_v15  ;;  %620 = vst [vmem:[%s1334_s23 + $0xd8] sm:$0xff] %v588_v27 }
  0xe8   : > { %621 = vst [vmem:[%s1334_s23 + $0xe0] sm:$0xff] %v589_v48  ;;  %622 = vst [vmem:[%s1334_s23 + $0xe8] sm:$0xff] %v590_v46 }
  0xe9   : > { %623 = vst [vmem:[%s1334_s23 + $0xf0] sm:$0xff] %v591_v6  ;;  %624 = vst [vmem:[%s1334_s23 + $0xf8] sm:$0xff] %v592_v17 }
  0xea   : > { %806 = shalt.err (!%p803_p3)
}
  0xeb   : > { %s807_s10 = scalar_lea.hbm %s1485_s30, 4096  ;;  %s811_s13 = scalar_lea.hbm %s1544_s4, 8192 }
  0xec   : > { %p808_p4 = scmp.ne.s32.totalorder %s1485_s30, %s807_s10  ;;  %p812_p9 = scmp.lt.u32.totalorder %s1485_s30, %s1544_s4 }
  0xed   : > { %p813_p10 = scmp.lt.u32.totalorder %s811_s13, %s807_s10  ;;  %p815_p12 = scmp.lt.u32.totalorder %s807_s10, %s1485_s30 }
  0xee   : > { %p809_p7 = pnand %p808_p4, %p923_p5 }
  0xef   : > { %p814_p11 = por %p813_p10, %p812_p9 }
  0xf0   : > { %p810_p8 = pneg %p809_p7 }
  0xf1   : > { %p816_p13 = por %p815_p12, %p814_p11 }
  0xf3   : > { %p817_p0 = pnand %p816_p13, %p810_p8 }
  0xf5   : > { %820 = shalt.err (!%p817_p0)
}
  0xf6   : > { %s858_s22 = smov 128   ;;  %s859_s23 = smov 8  }
  0xf7   : > { %750 = dma.vmem_to_hbm [thread:$0]  (%p923_p5), %s1487_s28, 4096, %s1485_s30, %s1499_s5, %s858_s22, %s858_s22, %s859_s23  }
  0xf8 PF: > { %p756_p1 = scmp.ge.s32.totalorder %s855_s18, 2  ;;  %s654_s27 = sand.u32 1, %s843_s15  }
  0xf9   : > { %s655_s19 = scalar_lea.sflag [#allocation3], %s654_s27 }
  0xfa   : > { %p753_p2 = pnand %p756_p1, %p927_p6 }
  0xfc   : > { %838 = dma.done.wait (!%p753_p2), %s655_s19, 4096  }
  0xfd   : > { %840 = vsyncadd (!%p753_p2), %s655_s19, 4294963200  ;;  %p14_p3 = scmp.ge.s32.totalorder %s910_s21, 4   ;;  %s1547_s15 = smov %s847_s16 }
  0xfe   : > { %s1548_s16 = smov %s851_s17  ;;  %s1549_s17 = smov %s921_s24 }
  0xff   : > { %s1550_s18 = smov %s910_s21  ;;  %16 = sbr.rel (!%p14_p3) target bundleno = 3 (0x3), region = 80 }
 0x106   :  { %660 = vsyncpa [#allocation3], 1 }
 0x107   :  { %662 = vsyncpa [#allocation3 + $0x1], 1 }

</bundles_post_ra>
